<compile_context>
chip_gen: v7x
topology: tpu7x:2x2x1
jax: 0.10.0
libtpu: 0.0.40
codegen_flags: <defaults>
</compile_context>

<pallas_src>
import functools
import math

import jax
import jax.numpy as jnp
from jax.experimental import pallas as pl
from jax.experimental.pallas import tpu as pltpu


_USE_BF16_MATMUL = True      # cast MXU operands to bf16, accumulate in f32
_LN_EPS = 1e-6


# ----------------------------------------------------------------------------
# Small in-kernel helpers
# ----------------------------------------------------------------------------

def _vmem_spec():
    return pl.BlockSpec(memory_space=pltpu.MemorySpace.VMEM)


def _mm(a, b):
    if _USE_BF16_MATMUL:
        a = a.astype(jnp.bfloat16)
        b = b.astype(jnp.bfloat16)
    return jnp.dot(a, b, preferred_element_type=jnp.float32)


def _bmm(eq, a, b):
    if _USE_BF16_MATMUL:
        a = a.astype(jnp.bfloat16)
        b = b.astype(jnp.bfloat16)
    return jnp.einsum(eq, a, b, preferred_element_type=jnp.float32)


def _layer_norm(x, alpha, bias, eps):
    # torch reference: alpha * (x - mean) / (std(unbiased) + eps) + bias
    d = x.shape[-1]
    mean = jnp.mean(x, axis=-1, keepdims=True)
    var = jnp.sum((x - mean) ** 2, axis=-1, keepdims=True) / (d - 1)  # unbiased
    std = jnp.sqrt(var)
    return alpha * (x - mean) / (std + eps) + bias


# ----------------------------------------------------------------------------
# Pallas kernels (fused blocks)
# ----------------------------------------------------------------------------

def pe_kernel(x_ref, pe_ref, o_ref, *, scale):
    # PositionalEncoder: x * sqrt(d_model) + pe   (pe is (1,S,D), broadcast here)
    o_ref[...] = x_ref[...] * scale + pe_ref[...]


def layernorm_kernel(x_ref, a_ref, b_ref, o_ref, *, eps):
    o_ref[...] = _layer_norm(x_ref[...], a_ref[...], b_ref[...], eps)


def ln_linear_kernel(x_ref, a_ref, b_ref, w_ref, bo_ref, o_ref, *, eps):
    # Fused: final decoder LayerNorm + output projection
    xn = _layer_norm(x_ref[...], a_ref[...], b_ref[...], eps)
    o_ref[...] = _mm(xn, w_ref[...]) + bo_ref[...]


def ffn_block_kernel(x_ref, a_ref, b_ref, w1_ref, b1_ref, w2_ref, b2_ref,
                     o_ref, *, eps):
    # Fused: x + FFN(LayerNorm(x));  FFN = linear -> relu -> (dropout=id) -> linear
    x = x_ref[...]
    xn = _layer_norm(x, a_ref[...], b_ref[...], eps)
    h = _mm(xn, w1_ref[...]) + b1_ref[...]
    h = jnp.maximum(h, 0.0)
    y = _mm(h, w2_ref[...]) + b2_ref[...]
    o_ref[...] = x + y


def mha_block_kernel(*refs, B, Sq, Sk, D, heads, d_k, sequential, self_attn, eps):
    # Fused: x + Wo( Attention( LN(x)Wq, kv Wk, kv Wv ) )
    #   self_attn=True : kv source is LN(x)   (encoder / decoder self-attn)
    #   self_attn=False: kv source is `memory` (decoder cross-attn, not normed)
    if self_attn:
        (x_ref, m_ref, a_ref, b_ref, wqkv_ref, wo_ref, bo_ref, o_ref) = refs
    else:
        (x_ref, kv_ref, m_ref, a_ref, b_ref, wqkv_ref, wo_ref, bo_ref, o_ref) = refs

    x = x_ref[...]                                     # (B*Sq, D) residual input
    xn = _layer_norm(x, a_ref[...], b_ref[...], eps)
    w_qkv = wqkv_ref[...]                              # (D, 3D)

    if self_attn:
        qkv = _mm(xn, w_qkv)                           # one fused QKV matmul
        q = qkv[:, :D]
        k = qkv[:, D:2 * D]
        v = qkv[:, 2 * D:]
    else:
        q = _mm(xn, w_qkv[:, :D])
        kv = _mm(kv_ref[...], w_qkv[:, D:])            # fused K/V matmul
        k = kv[:, :D]
        v = kv[:, D:]

    m = m_ref[...]                                     # (B, Sk) {0,1} pad mask
    inv_sqrt_dk = 1.0 / math.sqrt(d_k)

    head_outs = []
    for h in range(heads):                             # static unroll, heads small
        qh = q[:, h * d_k:(h + 1) * d_k].reshape(B, Sq, d_k)
        kh = k[:, h * d_k:(h + 1) * d_k].reshape(B, Sk, d_k)
        vh = v[:, h * d_k:(h + 1) * d_k].reshape(B, Sk, d_k)

        s = _bmm('bqd,bkd->bqk', qh, kh) * inv_sqrt_dk         # (B, Sq, Sk)
        s = s * m[:, None, :]                                  # padding_mask
        if sequential:
            row = jax.lax.broadcasted_iota(jnp.int32, s.shape, 1)
            col = jax.lax.broadcasted_iota(jnp.int32, s.shape, 2)
            s = jnp.where(row >= col, s, 0.0)                  # subsequent_mask
        s = jnp.where(s == 0.0, -jnp.inf, s)                   # masked_fill quirk

        mx = jnp.max(s, axis=-1, keepdims=True)
        e = jnp.exp(s - mx)
        p = e * pl.reciprocal(jnp.sum(e, axis=-1, keepdims=True), approx=True)
        head_outs.append(_bmm('bqk,bkd->bqd', p, vh))          # (B, Sq, d_k)

    concat = jnp.concatenate(head_outs, axis=-1).reshape(B * Sq, D)
    o_ref[...] = x + _mm(concat, wo_ref[...]) + bo_ref[...]


# ----------------------------------------------------------------------------
# pallas_call wrappers
# ----------------------------------------------------------------------------

def positional_encode(x, pe_table, d_model):
    B, S, D = x.shape
    return pl.pallas_call(
        functools.partial(pe_kernel, scale=math.sqrt(d_model)),
        out_shape=jax.ShapeDtypeStruct((B, S, D), jnp.float32),
        in_specs=[_vmem_spec(), _vmem_spec()],
        out_specs=_vmem_spec(),
    )(x, pe_table[:, :S])


def layer_norm(x, ln):
    lead = x.shape[:-1]
    D = x.shape[-1]
    M = int(math.prod(lead))
    out = pl.pallas_call(
        functools.partial(layernorm_kernel, eps=_LN_EPS),
        out_shape=jax.ShapeDtypeStruct((M, D), jnp.float32),
        in_specs=[_vmem_spec()] * 3,
        out_specs=_vmem_spec(),
    )(x.reshape(M, D), ln['a'].reshape(1, D), ln['b'].reshape(1, D))
    return out.reshape(*lead, D)


def ln_linear(x, ln, w, b):
    lead = x.shape[:-1]
    D = x.shape[-1]
    V = w.shape[1]
    M = int(math.prod(lead))
    out = pl.pallas_call(
        functools.partial(ln_linear_kernel, eps=_LN_EPS),
        out_shape=jax.ShapeDtypeStruct((M, V), jnp.float32),
        in_specs=[_vmem_spec()] * 5,
        out_specs=_vmem_spec(),
    )(x.reshape(M, D), ln['a'].reshape(1, D), ln['b'].reshape(1, D),
      w, b.reshape(1, V))
    return out.reshape(*lead, V)


def ffn_block(x, p_ff, ln, *, tile_m=512):
    # M-row grid ("parallel") so the kernel scales to large B*S (v7x VMEM, 2 TCs).
    B, S, D = x.shape
    M = B * S
    dff = p_ff['w1'].shape[1]
    tm = M if M <= tile_m else tile_m
    out = pl.pallas_call(
        functools.partial(ffn_block_kernel, eps=_LN_EPS),
        grid=(pl.cdiv(M, tm),),
        in_specs=[
            pl.BlockSpec((tm, D), lambda i: (i, 0)),
            pl.BlockSpec((1, D), lambda i: (0, 0)),
            pl.BlockSpec((1, D), lambda i: (0, 0)),
            pl.BlockSpec((D, dff), lambda i: (0, 0)),
            pl.BlockSpec((1, dff), lambda i: (0, 0)),
            pl.BlockSpec((dff, D), lambda i: (0, 0)),
            pl.BlockSpec((1, D), lambda i: (0, 0)),
        ],
        out_specs=pl.BlockSpec((tm, D), lambda i: (i, 0)),
        out_shape=jax.ShapeDtypeStruct((M, D), jnp.float32),
        compiler_params=pltpu.CompilerParams(
            dimension_semantics=("parallel",),
            vmem_limit_bytes=32 * 1024 * 1024),
    )(x.reshape(M, D), ln['a'].reshape(1, D), ln['b'].reshape(1, D),
      p_ff['w1'], p_ff['b1'].reshape(1, dff), p_ff['w2'], p_ff['b2'].reshape(1, D))
    return out.reshape(B, S, D)


def mha_block(x, kv, mask, p_attn, ln, heads, sequential, self_attn):
    B, Sq, D = x.shape
    Sk = kv.shape[1]
    d_k = D // heads
    args = [x.reshape(B * Sq, D)]
    if not self_attn:
        args.append(kv.reshape(B * Sk, D))
    args += [mask, ln['a'].reshape(1, D), ln['b'].reshape(1, D),
             p_attn['w_qkv'], p_attn['wo'], p_attn['bo'].reshape(1, D)]
    kern = functools.partial(
        mha_block_kernel, B=B, Sq=Sq, Sk=Sk, D=D, heads=heads, d_k=d_k,
        sequential=sequential, self_attn=self_attn, eps=_LN_EPS)
    out = pl.pallas_call(
        kern,
        out_shape=jax.ShapeDtypeStruct((B * Sq, D), jnp.float32),
        in_specs=[_vmem_spec()] * len(args),
        out_specs=_vmem_spec(),
    )(*args)
    return out.reshape(B, Sq, D)


# ----------------------------------------------------------------------------
# Model composition (glue in JAX, hot paths in fused Pallas kernels)
# ----------------------------------------------------------------------------

def encoder_layer(p, x, src_mask, heads):
    x = mha_block(x, x, src_mask, p['attn'], p['ln1'], heads,
                  sequential=False, self_attn=True)
    x = ffn_block(x, p['ff'], p['ln2'])
    return x


def decoder_layer(p, x, memory, src_mask, trg_mask, heads):
    x = mha_block(x, x, trg_mask, p['attn1'], p['ln1'], heads,
                  sequential=True, self_attn=True)
    x = mha_block(x, memory, src_mask, p['attn2'], p['ln2'], heads,
                  sequential=False, self_attn=False)
    x = ffn_block(x, p['ff'], p['ln3'])
    return x


def get_mask(embedding):
    # 1 - (sum(embed, -1) == 0) -> (B, S); broadcast over heads/query inside kernel
    return 1.0 - (jnp.sum(embedding, axis=-1) == 0).astype(jnp.float32)


def transformer_forward(params, src_tokens, trg_tokens, cfg):
    d_model, heads = cfg['d_model'], cfg['heads']

    # Embedding lookup is a gather -> plain JAX glue.
    src = jnp.take(params['emb_src'], src_tokens, axis=0)
    trg = jnp.take(params['emb_trg'], trg_tokens, axis=0)

    src_mask = get_mask(src)
    trg_mask = get_mask(trg)

    src = positional_encode(src, params['pe'], d_model)
    trg = positional_encode(trg, params['pe'], d_model)

    memory = src
    for lp in params['enc_layers']:
        memory = encoder_layer(lp, memory, src_mask, heads)
    memory = layer_norm(memory, params['enc_norm'])

    x = trg
    for lp in params['dec_layers']:
        x = decoder_layer(lp, x, memory, src_mask, trg_mask, heads)

    # Final decoder LayerNorm fused with the output projection.
    return ln_linear(x, params['dec_norm'], params['out_w'], params['out_b'])


# ----------------------------------------------------------------------------
# Deterministic parameter init (synthetic; shapes follow the PyTorch module)
# ----------------------------------------------------------------------------

def make_pe_table(d_model, max_seq_len):
    # Reference PositionalEncoder (note: no sin/cos, both halves identical).
    d = d_model / 2.0
    pos = jnp.arange(max_seq_len, dtype=jnp.float32)[:, None]
    i = jnp.arange(d_model // 2, dtype=jnp.float32)
    half = pos / (10000.0 ** (i / (d - 1.0)))
    return jnp.concatenate([half, half], axis=-1)[None]   # (1, max_seq_len, d_model)


def init_params(key, cfg):
    d, dff, N = cfg['d_model'], cfg['d_ff'], cfg['N']
    keys = iter(jax.random.split(key, 512))

    def nrm(shape, scale=0.05):
        return scale * jax.random.normal(next(keys), shape, dtype=jnp.float32)

    def ln():
        return dict(a=jnp.ones((d,), jnp.float32), b=jnp.zeros((d,), jnp.float32))

    def attn():
        # fused (in, 3*out) QKV weight (bias-free) + output projection
        return dict(
            w_qkv=jnp.concatenate([nrm((d, d)), nrm((d, d)), nrm((d, d))], axis=1),
            wo=nrm((d, d)), bo=nrm((d,)))

    def ff():
        return dict(w1=nrm((d, dff)), b1=nrm((dff,)), w2=nrm((dff, d)), b2=nrm((d,)))

    emb_src = nrm((cfg['src_vocab'], d), scale=1.0).at[0].set(0.0)   # padding_idx=0
    emb_trg = nrm((cfg['trg_vocab'], d), scale=1.0).at[0].set(0.0)

    enc_layers = [dict(ln1=ln(), ln2=ln(), attn=attn(), ff=ff()) for _ in range(N)]
    dec_layers = [dict(ln1=ln(), ln2=ln(), ln3=ln(),
                       attn1=attn(), attn2=attn(), ff=ff()) for _ in range(N)]

    return dict(
        emb_src=emb_src, emb_trg=emb_trg,
        pe=make_pe_table(d, cfg['max_seq_len']),
        enc_layers=enc_layers, dec_layers=dec_layers,
        enc_norm=ln(), dec_norm=ln(),
        out_w=nrm((d, cfg['trg_vocab'])), out_b=nrm((cfg['trg_vocab'],)),
    )


# ----------------------------------------------------------------------------
# Run
# ----------------------------------------------------------------------------

if __name__ == "__main__":
    cfg = dict(src_vocab=11, trg_vocab=13, d_model=32, N=2, heads=4,
               d_ff=2048, max_seq_len=200, batch=2, seq=8)

    key = jax.random.PRNGKey(0)
    pkey, skey, tkey = jax.random.split(key, 3)
    params = init_params(pkey, cfg)

    # tokens in [1, vocab); sprinkle one padding token (id 0) away from position 0
    src = jax.random.randint(skey, (cfg['batch'], cfg['seq']), 1, cfg['src_vocab'])
    trg = jax.random.randint(tkey, (cfg['batch'], cfg['seq']), 1, cfg['trg_vocab'])
    src = src.at[0, -1].set(0)
    trg = trg.at[1, -1].set(0)

    # TODO(synk): nn.Dropout layers are treated as identity (eval mode).
    fwd = jax.jit(functools.partial(transformer_forward, cfg=cfg))
    out = jax.block_until_ready(fwd(params, src, trg))

    assert out.shape == (cfg['batch'], cfg['seq'], cfg['trg_vocab'])
    assert bool(jnp.all(jnp.isfinite(out)))
    print("KERNEL_OK")
</pallas_src>

<mosaic_0001>
module attributes {stable_mosaic.version = 11 : i64} {
  func.func @pe_kernel(%arg0: memref<2x8x32xf32, #tpu.memory_space<vmem>>, %arg1: memref<1x8x32xf32, #tpu.memory_space<vmem>>, %arg2: memref<2x8x32xf32, #tpu.memory_space<vmem>>) attributes {dimension_semantics = [], scalar_prefetch = 0 : i64, scratch_operands = 0 : i64, tpu.core_type = #tpu.core_type<tc>} {
    %c0 = arith.constant 0 : index
    %c0_0 = arith.constant 0 : index
    %c0_1 = arith.constant 0 : index
    %0 = vector.load %arg0[%c0, %c0_0, %c0_1] : memref<2x8x32xf32, #tpu.memory_space<vmem>>, vector<2x8x32xf32>
    %cst = arith.constant 5.65685415 : f32
    %1 = vector.broadcast %cst : f32 to vector<2x8x32xf32>
    %2 = arith.mulf %0, %1 : vector<2x8x32xf32>
    %c0_2 = arith.constant 0 : index
    %c0_3 = arith.constant 0 : index
    %c0_4 = arith.constant 0 : index
    %3 = vector.load %arg1[%c0_2, %c0_3, %c0_4] : memref<1x8x32xf32, #tpu.memory_space<vmem>>, vector<1x8x32xf32>
    %4 = vector.broadcast %3 : vector<1x8x32xf32> to vector<2x8x32xf32>
    %5 = arith.addf %2, %4 : vector<2x8x32xf32>
    %c0_5 = arith.constant 0 : index
    %c0_6 = arith.constant 0 : index
    %c0_7 = arith.constant 0 : index
    %6 = vector.load %arg2[%c0_5, %c0_6, %c0_7] : memref<2x8x32xf32, #tpu.memory_space<vmem>>, vector<2x8x32xf32>
    tpu.vector_store %arg2[%c0_5, %c0_6, %c0_7], %5 {strides = array<i32>} : memref<2x8x32xf32, #tpu.memory_space<vmem>>, vector<2x8x32xf32>,
    return
  }
}

module attributes {stable_mosaic.version = 11 : i64} {
  func.func @mha_block_kernel(%arg0: memref<16x32xf32, #tpu.memory_space<vmem>>, %arg1: memref<2x8xf32, #tpu.memory_space<vmem>>, %arg2: memref<1x32xf32, #tpu.memory_space<vmem>>, %arg3: memref<1x32xf32, #tpu.memory_space<vmem>>, %arg4: memref<32x96xf32, #tpu.memory_space<vmem>>, %arg5: memref<32x32xf32, #tpu.memory_space<vmem>>, %arg6: memref<1x32xf32, #tpu.memory_space<vmem>>, %arg7: memref<16x32xf32, #tpu.memory_space<vmem>>) attributes {dimension_semantics = [], scalar_prefetch = 0 : i64, scratch_operands = 0 : i64, tpu.core_type = #tpu.core_type<tc>} {
    %c0 = arith.constant 0 : index
    %c0_0 = arith.constant 0 : index
    %0 = vector.load %arg0[%c0, %c0_0] : memref<16x32xf32, #tpu.memory_space<vmem>>, vector<16x32xf32>
    %c0_1 = arith.constant 0 : index
    %c0_2 = arith.constant 0 : index
    %1 = vector.load %arg2[%c0_1, %c0_2] : memref<1x32xf32, #tpu.memory_space<vmem>>, vector<1x32xf32>
    %c0_3 = arith.constant 0 : index
    %c0_4 = arith.constant 0 : index
    %2 = vector.load %arg3[%c0_3, %c0_4] : memref<1x32xf32, #tpu.memory_space<vmem>>, vector<1x32xf32>
    %cst = arith.constant dense<0.000000e+00> : vector<16xf32>
    %3 = vector.multi_reduction <add>, %0, %cst [1] : vector<16x32xf32> to vector<16xf32>
    %4 = vector.shape_cast %3 : vector<16xf32> to vector<16x1xf32>
    %cst_5 = arith.constant 3.200000e+01 : f32
    %5 = vector.broadcast %cst_5 : f32 to vector<16x1xf32>
    %6 = arith.divf %4, %5 : vector<16x1xf32>
    %7 = vector.broadcast %6 : vector<16x1xf32> to vector<16x32xf32>
    %8 = arith.subf %0, %7 : vector<16x32xf32>
    %9 = arith.mulf %8, %8 : vector<16x32xf32>
    %cst_6 = arith.constant dense<0.000000e+00> : vector<16xf32>
    %10 = vector.multi_reduction <add>, %9, %cst_6 [1] : vector<16x32xf32> to vector<16xf32>
    %11 = vector.shape_cast %10 : vector<16xf32> to vector<16x1xf32>
    %cst_7 = arith.constant 3.100000e+01 : f32
    %12 = vector.broadcast %cst_7 : f32 to vector<16x1xf32>
    %13 = arith.divf %11, %12 : vector<16x1xf32>
    %14 = math.sqrt %13 : vector<16x1xf32>
    %15 = vector.broadcast %6 : vector<16x1xf32> to vector<16x32xf32>
    %16 = arith.subf %0, %15 : vector<16x32xf32>
    %17 = vector.broadcast %1 : vector<1x32xf32> to vector<16x32xf32>
    %18 = arith.mulf %17, %16 : vector<16x32xf32>
    %cst_8 = arith.constant 9.99999997E-7 : f32
    %19 = vector.broadcast %cst_8 : f32 to vector<16x1xf32>
    %20 = arith.addf %14, %19 : vector<16x1xf32>
    %21 = vector.broadcast %20 : vector<16x1xf32> to vector<16x32xf32>
    %22 = arith.divf %18, %21 : vector<16x32xf32>
    %23 = vector.broadcast %2 : vector<1x32xf32> to vector<16x32xf32>
    %24 = arith.addf %22, %23 : vector<16x32xf32>
    %c0_9 = arith.constant 0 : index
    %c0_10 = arith.constant 0 : index
    %25 = vector.load %arg4[%c0_9, %c0_10] : memref<32x96xf32, #tpu.memory_space<vmem>>, vector<32x96xf32>
    %26 = arith.truncf %24 : vector<16x32xf32> to vector<16x32xbf16>
    %27 = arith.truncf %25 : vector<32x96xf32> to vector<32x96xbf16>
    %cst_11 = arith.constant dense<0.000000e+00> : vector<16x96xf32>
    %28 = tpu.matmul %26, %27, %cst_11 {dimension_numbers = #tpu.dot_dimension_numbers<[1], [0], [0], [1], [0, 0, 1, 1], [], []>} : vector<16x32xbf16>, vector<32x96xbf16>, vector<16x96xf32> -> vector<16x96xf32>
    %29 = vector.extract_strided_slice %28 {offsets = [0, 0], sizes = [16, 32], strides = [1, 1]} : vector<16x96xf32> to vector<16x32xf32>
    %30 = vector.extract_strided_slice %28 {offsets = [0, 32], sizes = [16, 32], strides = [1, 1]} : vector<16x96xf32> to vector<16x32xf32>
    %31 = vector.extract_strided_slice %28 {offsets = [0, 64], sizes = [16, 32], strides = [1, 1]} : vector<16x96xf32> to vector<16x32xf32>
    %c0_12 = arith.constant 0 : index
    %c0_13 = arith.constant 0 : index
    %32 = vector.load %arg1[%c0_12, %c0_13] : memref<2x8xf32, #tpu.memory_space<vmem>>, vector<2x8xf32>
    %33 = vector.extract_strided_slice %29 {offsets = [0, 0], sizes = [16, 8], strides = [1, 1]} : vector<16x32xf32> to vector<16x8xf32>
    %34 = vector.shape_cast %33 : vector<16x8xf32> to vector<2x8x8xf32>
    %35 = vector.extract_strided_slice %30 {offsets = [0, 0], sizes = [16, 8], strides = [1, 1]} : vector<16x32xf32> to vector<16x8xf32>
    %36 = vector.shape_cast %35 : vector<16x8xf32> to vector<2x8x8xf32>
    %37 = vector.extract_strided_slice %31 {offsets = [0, 0], sizes = [16, 8], strides = [1, 1]} : vector<16x32xf32> to vector<16x8xf32>
    %38 = vector.shape_cast %37 : vector<16x8xf32> to vector<2x8x8xf32>
    %39 = arith.truncf %34 : vector<2x8x8xf32> to vector<2x8x8xbf16>
    %40 = arith.truncf %36 : vector<2x8x8xf32> to vector<2x8x8xbf16>
    "tpu.trace_start"() <{level = 10 : i32, message = "bqd,bkd->bqk"}> : () -> ()
    %cst_14 = arith.constant dense<0.000000e+00> : vector<2x8x8xf32>
    %41 = tpu.matmul %39, %40, %cst_14 {dimension_numbers = #tpu.dot_dimension_numbers<[2], [2], [1], [1], [0, 0, 0, 1, 1, 1], [0], [0]>} : vector<2x8x8xbf16>, vector<2x8x8xbf16>, vector<2x8x8xf32> -> vector<2x8x8xf32>
    "tpu.trace_stop"() : () -> ()
    %cst_15 = arith.constant 0.353553385 : f32
    %42 = vector.broadcast %cst_15 : f32 to vector<2x8x8xf32>
    %43 = arith.mulf %41, %42 : vector<2x8x8xf32>
    %44 = vector.shape_cast %32 : vector<2x8xf32> to vector<2x1x8xf32>
    %45 = vector.broadcast %44 : vector<2x1x8xf32> to vector<2x8x8xf32>
    %46 = arith.mulf %43, %45 : vector<2x8x8xf32>
    %47 = tpu.iota {dimensions = array<i32: 1>} : vector<2x8x8xi32>
    %48 = tpu.iota {dimensions = array<i32: 2>} : vector<2x8x8xi32>
    %49 = arith.cmpi sge, %47, %48 : vector<2x8x8xi32>
    %cst_16 = arith.constant 0.000000e+00 : f32
    %50 = vector.broadcast %cst_16 : f32 to vector<2x8x8xf32>
    %51 = arith.select %49, %46, %50 : vector<2x8x8xi1>, vector<2x8x8xf32>
    %cst_17 = arith.constant 0.000000e+00 : f32
    %52 = vector.broadcast %cst_17 : f32 to vector<2x8x8xf32>
    %53 = arith.cmpf oeq, %51, %52 : vector<2x8x8xf32>
    %cst_18 = arith.constant 0xFF800000 : f32
    %54 = vector.broadcast %cst_18 : f32 to vector<2x8x8xf32>
    %55 = arith.select %53, %54, %51 : vector<2x8x8xi1>, vector<2x8x8xf32>
    %cst_19 = arith.constant dense<0xFF800000> : vector<2x8xf32>
    %56 = vector.multi_reduction <maximumf>, %55, %cst_19 [2] : vector<2x8x8xf32> to vector<2x8xf32>
    %57 = vector.shape_cast %56 : vector<2x8xf32> to vector<2x8x1xf32>
    %58 = vector.broadcast %57 : vector<2x8x1xf32> to vector<2x8x8xf32>
    %59 = arith.subf %55, %58 : vector<2x8x8xf32>
    %60 = math.exp %59 : vector<2x8x8xf32>
    %cst_20 = arith.constant dense<0.000000e+00> : vector<2x8xf32>
    %61 = vector.multi_reduction <add>, %60, %cst_20 [2] : vector<2x8x8xf32> to vector<2x8xf32>
    %62 = vector.shape_cast %61 : vector<2x8xf32> to vector<2x8x1xf32>
    %63 = tpu.reciprocal %62 {approx = true} : vector<2x8x1xf32> -> vector<2x8x1xf32>
    %64 = vector.broadcast %63 : vector<2x8x1xf32> to vector<2x8x8xf32>
    %65 = arith.mulf %60, %64 : vector<2x8x8xf32>
    %66 = arith.truncf %65 : vector<2x8x8xf32> to vector<2x8x8xbf16>
    %67 = arith.truncf %38 : vector<2x8x8xf32> to vector<2x8x8xbf16>
    "tpu.trace_start"() <{level = 10 : i32, message = "bqk,bkd->bqd"}> : () -> ()
    %cst_21 = arith.constant dense<0.000000e+00> : vector<2x8x8xf32>
    %68 = tpu.matmul %66, %67, %cst_21 {dimension_numbers = #tpu.dot_dimension_numbers<[2], [1], [1], [2], [0, 0, 0, 1, 1, 2], [0], [0]>} : vector<2x8x8xbf16>, vector<2x8x8xbf16>, vector<2x8x8xf32> -> vector<2x8x8xf32>
    "tpu.trace_stop"() : () -> ()
    %69 = vector.extract_strided_slice %29 {offsets = [0, 8], sizes = [16, 8], strides = [1, 1]} : vector<16x32xf32> to vector<16x8xf32>
    %70 = vector.shape_cast %69 : vector<16x8xf32> to vector<2x8x8xf32>
    %71 = vector.extract_strided_slice %30 {offsets = [0, 8], sizes = [16, 8], strides = [1, 1]} : vector<16x32xf32> to vector<16x8xf32>
    %72 = vector.shape_cast %71 : vector<16x8xf32> to vector<2x8x8xf32>
    %73 = vector.extract_strided_slice %31 {offsets = [0, 8], sizes = [16, 8], strides = [1, 1]} : vector<16x32xf32> to vector<16x8xf32>
    %74 = vector.shape_cast %73 : vector<16x8xf32> to vector<2x8x8xf32>
    %75 = arith.truncf %70 : vector<2x8x8xf32> to vector<2x8x8xbf16>
    %76 = arith.truncf %72 : vector<2x8x8xf32> to vector<2x8x8xbf16>
    "tpu.trace_start"() <{level = 10 : i32, message = "bqd,bkd->bqk"}> : () -> ()
    %cst_22 = arith.constant dense<0.000000e+00> : vector<2x8x8xf32>
    %77 = tpu.matmul %75, %76, %cst_22 {dimension_numbers = #tpu.dot_dimension_numbers<[2], [2], [1], [1], [0, 0, 0, 1, 1, 1], [0], [0]>} : vector<2x8x8xbf16>, vector<2x8x8xbf16>, vector<2x8x8xf32> -> vector<2x8x8xf32>
    "tpu.trace_stop"() : () -> ()
    %cst_23 = arith.constant 0.353553385 : f32
    %78 = vector.broadcast %cst_23 : f32 to vector<2x8x8xf32>
    %79 = arith.mulf %77, %78 : vector<2x8x8xf32>
    %80 = vector.shape_cast %32 : vector<2x8xf32> to vector<2x1x8xf32>
    %81 = vector.broadcast %80 : vector<2x1x8xf32> to vector<2x8x8xf32>
    %82 = arith.mulf %79, %81 : vector<2x8x8xf32>
    %83 = tpu.iota {dimensions = array<i32: 1>} : vector<2x8x8xi32>
    %84 = tpu.iota {dimensions = array<i32: 2>} : vector<2x8x8xi32>
    %85 = arith.cmpi sge, %83, %84 : vector<2x8x8xi32>
    %cst_24 = arith.constant 0.000000e+00 : f32
    %86 = vector.broadcast %cst_24 : f32 to vector<2x8x8xf32>
    %87 = arith.select %85, %82, %86 : vector<2x8x8xi1>, vector<2x8x8xf32>
    %cst_25 = arith.constant 0.000000e+00 : f32
    %88 = vector.broadcast %cst_25 : f32 to vector<2x8x8xf32>
    %89 = arith.cmpf oeq, %87, %88 : vector<2x8x8xf32>
    %cst_26 = arith.constant 0xFF800000 : f32
    %90 = vector.broadcast %cst_26 : f32 to vector<2x8x8xf32>
    %91 = arith.select %89, %90, %87 : vector<2x8x8xi1>, vector<2x8x8xf32>
    %cst_27 = arith.constant dense<0xFF800000> : vector<2x8xf32>
    %92 = vector.multi_reduction <maximumf>, %91, %cst_27 [2] : vector<2x8x8xf32> to vector<2x8xf32>
    %93 = vector.shape_cast %92 : vector<2x8xf32> to vector<2x8x1xf32>
    %94 = vector.broadcast %93 : vector<2x8x1xf32> to vector<2x8x8xf32>
    %95 = arith.subf %91, %94 : vector<2x8x8xf32>
    %96 = math.exp %95 : vector<2x8x8xf32>
    %cst_28 = arith.constant dense<0.000000e+00> : vector<2x8xf32>
    %97 = vector.multi_reduction <add>, %96, %cst_28 [2] : vector<2x8x8xf32> to vector<2x8xf32>
    %98 = vector.shape_cast %97 : vector<2x8xf32> to vector<2x8x1xf32>
    %99 = tpu.reciprocal %98 {approx = true} : vector<2x8x1xf32> -> vector<2x8x1xf32>
    %100 = vector.broadcast %99 : vector<2x8x1xf32> to vector<2x8x8xf32>
    %101 = arith.mulf %96, %100 : vector<2x8x8xf32>
    %102 = arith.truncf %101 : vector<2x8x8xf32> to vector<2x8x8xbf16>
    %103 = arith.truncf %74 : vector<2x8x8xf32> to vector<2x8x8xbf16>
    "tpu.trace_start"() <{level = 10 : i32, message = "bqk,bkd->bqd"}> : () -> ()
    %cst_29 = arith.constant dense<0.000000e+00> : vector<2x8x8xf32>
    %104 = tpu.matmul %102, %103, %cst_29 {dimension_numbers = #tpu.dot_dimension_numbers<[2], [1], [1], [2], [0, 0, 0, 1, 1, 2], [0], [0]>} : vector<2x8x8xbf16>, vector<2x8x8xbf16>, vector<2x8x8xf32> -> vector<2x8x8xf32>
    "tpu.trace_stop"() : () -> ()
    %105 = vector.extract_strided_slice %29 {offsets = [0, 16], sizes = [16, 8], strides = [1, 1]} : vector<16x32xf32> to vector<16x8xf32>
    %106 = vector.shape_cast %105 : vector<16x8xf32> to vector<2x8x8xf32>
    %107 = vector.extract_strided_slice %30 {offsets = [0, 16], sizes = [16, 8], strides = [1, 1]} : vector<16x32xf32> to vector<16x8xf32>
    %108 = vector.shape_cast %107 : vector<16x8xf32> to vector<2x8x8xf32>
    %109 = vector.extract_strided_slice %31 {offsets = [0, 16], sizes = [16, 8], strides = [1, 1]} : vector<16x32xf32> to vector<16x8xf32>
    %110 = vector.shape_cast %109 : vector<16x8xf32> to vector<2x8x8xf32>
    %111 = arith.truncf %106 : vector<2x8x8xf32> to vector<2x8x8xbf16>
    %112 = arith.truncf %108 : vector<2x8x8xf32> to vector<2x8x8xbf16>
    "tpu.trace_start"() <{level = 10 : i32, message = "bqd,bkd->bqk"}> : () -> ()
    %cst_30 = arith.constant dense<0.000000e+00> : vector<2x8x8xf32>
    %113 = tpu.matmul %111, %112, %cst_30 {dimension_numbers = #tpu.dot_dimension_numbers<[2], [2], [1], [1], [0, 0, 0, 1, 1, 1], [0], [0]>} : vector<2x8x8xbf16>, vector<2x8x8xbf16>, vector<2x8x8xf32> -> vector<2x8x8xf32>
    "tpu.trace_stop"() : () -> ()
    %cst_31 = arith.constant 0.353553385 : f32
    %114 = vector.broadcast %cst_31 : f32 to vector<2x8x8xf32>
    %115 = arith.mulf %113, %114 : vector<2x8x8xf32>
    %116 = vector.shape_cast %32 : vector<2x8xf32> to vector<2x1x8xf32>
    %117 = vector.broadcast %116 : vector<2x1x8xf32> to vector<2x8x8xf32>
    %118 = arith.mulf %115, %117 : vector<2x8x8xf32>
    %119 = tpu.iota {dimensions = array<i32: 1>} : vector<2x8x8xi32>
    %120 = tpu.iota {dimensions = array<i32: 2>} : vector<2x8x8xi32>
    %121 = arith.cmpi sge, %119, %120 : vector<2x8x8xi32>
    %cst_32 = arith.constant 0.000000e+00 : f32
    %122 = vector.broadcast %cst_32 : f32 to vector<2x8x8xf32>
    %123 = arith.select %121, %118, %122 : vector<2x8x8xi1>, vector<2x8x8xf32>
    %cst_33 = arith.constant 0.000000e+00 : f32
    %124 = vector.broadcast %cst_33 : f32 to vector<2x8x8xf32>
    %125 = arith.cmpf oeq, %123, %124 : vector<2x8x8xf32>
    %cst_34 = arith.constant 0xFF800000 : f32
    %126 = vector.broadcast %cst_34 : f32 to vector<2x8x8xf32>
    %127 = arith.select %125, %126, %123 : vector<2x8x8xi1>, vector<2x8x8xf32>
    %cst_35 = arith.constant dense<0xFF800000> : vector<2x8xf32>
    %128 = vector.multi_reduction <maximumf>, %127, %cst_35 [2] : vector<2x8x8xf32> to vector<2x8xf32>
    %129 = vector.shape_cast %128 : vector<2x8xf32> to vector<2x8x1xf32>
    %130 = vector.broadcast %129 : vector<2x8x1xf32> to vector<2x8x8xf32>
    %131 = arith.subf %127, %130 : vector<2x8x8xf32>
    %132 = math.exp %131 : vector<2x8x8xf32>
    %cst_36 = arith.constant dense<0.000000e+00> : vector<2x8xf32>
    %133 = vector.multi_reduction <add>, %132, %cst_36 [2] : vector<2x8x8xf32> to vector<2x8xf32>
    %134 = vector.shape_cast %133 : vector<2x8xf32> to vector<2x8x1xf32>
    %135 = tpu.reciprocal %134 {approx = true} : vector<2x8x1xf32> -> vector<2x8x1xf32>
    %136 = vector.broadcast %135 : vector<2x8x1xf32> to vector<2x8x8xf32>
    %137 = arith.mulf %132, %136 : vector<2x8x8xf32>
    %138 = arith.truncf %137 : vector<2x8x8xf32> to vector<2x8x8xbf16>
    %139 = arith.truncf %110 : vector<2x8x8xf32> to vector<2x8x8xbf16>
    "tpu.trace_start"() <{level = 10 : i32, message = "bqk,bkd->bqd"}> : () -> ()
    %cst_37 = arith.constant dense<0.000000e+00> : vector<2x8x8xf32>
    %140 = tpu.matmul %138, %139, %cst_37 {dimension_numbers = #tpu.dot_dimension_numbers<[2], [1], [1], [2], [0, 0, 0, 1, 1, 2], [0], [0]>} : vector<2x8x8xbf16>, vector<2x8x8xbf16>, vector<2x8x8xf32> -> vector<2x8x8xf32>
    "tpu.trace_stop"() : () -> ()
    %141 = vector.extract_strided_slice %29 {offsets = [0, 24], sizes = [16, 8], strides = [1, 1]} : vector<16x32xf32> to vector<16x8xf32>
    %142 = vector.shape_cast %141 : vector<16x8xf32> to vector<2x8x8xf32>
    %143 = vector.extract_strided_slice %30 {offsets = [0, 24], sizes = [16, 8], strides = [1, 1]} : vector<16x32xf32> to vector<16x8xf32>
    %144 = vector.shape_cast %143 : vector<16x8xf32> to vector<2x8x8xf32>
    %145 = vector.extract_strided_slice %31 {offsets = [0, 24], sizes = [16, 8], strides = [1, 1]} : vector<16x32xf32> to vector<16x8xf32>
    %146 = vector.shape_cast %145 : vector<16x8xf32> to vector<2x8x8xf32>
    %147 = arith.truncf %142 : vector<2x8x8xf32> to vector<2x8x8xbf16>
    %148 = arith.truncf %144 : vector<2x8x8xf32> to vector<2x8x8xbf16>
    "tpu.trace_start"() <{level = 10 : i32, message = "bqd,bkd->bqk"}> : () -> ()
    %cst_38 = arith.constant dense<0.000000e+00> : vector<2x8x8xf32>
    %149 = tpu.matmul %147, %148, %cst_38 {dimension_numbers = #tpu.dot_dimension_numbers<[2], [2], [1], [1], [0, 0, 0, 1, 1, 1], [0], [0]>} : vector<2x8x8xbf16>, vector<2x8x8xbf16>, vector<2x8x8xf32> -> vector<2x8x8xf32>
    "tpu.trace_stop"() : () -> ()
    %cst_39 = arith.constant 0.353553385 : f32
    %150 = vector.broadcast %cst_39 : f32 to vector<2x8x8xf32>
    %151 = arith.mulf %149, %150 : vector<2x8x8xf32>
    %152 = vector.shape_cast %32 : vector<2x8xf32> to vector<2x1x8xf32>
    %153 = vector.broadcast %152 : vector<2x1x8xf32> to vector<2x8x8xf32>
    %154 = arith.mulf %151, %153 : vector<2x8x8xf32>
    %155 = tpu.iota {dimensions = array<i32: 1>} : vector<2x8x8xi32>
    %156 = tpu.iota {dimensions = array<i32: 2>} : vector<2x8x8xi32>
    %157 = arith.cmpi sge, %155, %156 : vector<2x8x8xi32>
    %cst_40 = arith.constant 0.000000e+00 : f32
    %158 = vector.broadcast %cst_40 : f32 to vector<2x8x8xf32>
    %159 = arith.select %157, %154, %158 : vector<2x8x8xi1>, vector<2x8x8xf32>
    %cst_41 = arith.constant 0.000000e+00 : f32
    %160 = vector.broadcast %cst_41 : f32 to vector<2x8x8xf32>
    %161 = arith.cmpf oeq, %159, %160 : vector<2x8x8xf32>
    %cst_42 = arith.constant 0xFF800000 : f32
    %162 = vector.broadcast %cst_42 : f32 to vector<2x8x8xf32>
    %163 = arith.select %161, %162, %159 : vector<2x8x8xi1>, vector<2x8x8xf32>
    %cst_43 = arith.constant dense<0xFF800000> : vector<2x8xf32>
    %164 = vector.multi_reduction <maximumf>, %163, %cst_43 [2] : vector<2x8x8xf32> to vector<2x8xf32>
    %165 = vector.shape_cast %164 : vector<2x8xf32> to vector<2x8x1xf32>
    %166 = vector.broadcast %165 : vector<2x8x1xf32> to vector<2x8x8xf32>
    %167 = arith.subf %163, %166 : vector<2x8x8xf32>
    %168 = math.exp %167 : vector<2x8x8xf32>
    %cst_44 = arith.constant dense<0.000000e+00> : vector<2x8xf32>
    %169 = vector.multi_reduction <add>, %168, %cst_44 [2] : vector<2x8x8xf32> to vector<2x8xf32>
    %170 = vector.shape_cast %169 : vector<2x8xf32> to vector<2x8x1xf32>
    %171 = tpu.reciprocal %170 {approx = true} : vector<2x8x1xf32> -> vector<2x8x1xf32>
    %172 = vector.broadcast %171 : vector<2x8x1xf32> to vector<2x8x8xf32>
    %173 = arith.mulf %168, %172 : vector<2x8x8xf32>
    %174 = arith.truncf %173 : vector<2x8x8xf32> to vector<2x8x8xbf16>
    %175 = arith.truncf %146 : vector<2x8x8xf32> to vector<2x8x8xbf16>
    "tpu.trace_start"() <{level = 10 : i32, message = "bqk,bkd->bqd"}> : () -> ()
    %cst_45 = arith.constant dense<0.000000e+00> : vector<2x8x8xf32>
    %176 = tpu.matmul %174, %175, %cst_45 {dimension_numbers = #tpu.dot_dimension_numbers<[2], [1], [1], [2], [0, 0, 0, 1, 1, 2], [0], [0]>} : vector<2x8x8xbf16>, vector<2x8x8xbf16>, vector<2x8x8xf32> -> vector<2x8x8xf32>
    "tpu.trace_stop"() : () -> ()
    %177 = tpu.concatenate %68, %104, %140, %176 in 2 : vector<2x8x8xf32>, vector<2x8x8xf32>, vector<2x8x8xf32>, vector<2x8x8xf32> -> vector<2x8x32xf32>
    %178 = vector.shape_cast %177 : vector<2x8x32xf32> to vector<16x32xf32>
    %c0_46 = arith.constant 0 : index
    %c0_47 = arith.constant 0 : index
    %179 = vector.load %arg5[%c0_46, %c0_47] : memref<32x32xf32, #tpu.memory_space<vmem>>, vector<32x32xf32>
    %180 = arith.truncf %178 : vector<16x32xf32> to vector<16x32xbf16>
    %181 = arith.truncf %179 : vector<32x32xf32> to vector<32x32xbf16>
    %cst_48 = arith.constant dense<0.000000e+00> : vector<16x32xf32>
    %182 = tpu.matmul %180, %181, %cst_48 {dimension_numbers = #tpu.dot_dimension_numbers<[1], [0], [0], [1], [0, 0, 1, 1], [], []>} : vector<16x32xbf16>, vector<32x32xbf16>, vector<16x32xf32> -> vector<16x32xf32>
    %183 = arith.addf %0, %182 : vector<16x32xf32>
    %c0_49 = arith.constant 0 : index
    %c0_50 = arith.constant 0 : index
    %184 = vector.load %arg6[%c0_49, %c0_50] : memref<1x32xf32, #tpu.memory_space<vmem>>, vector<1x32xf32>
    %185 = vector.broadcast %184 : vector<1x32xf32> to vector<16x32xf32>
    %186 = arith.addf %183, %185 : vector<16x32xf32>
    %c0_51 = arith.constant 0 : index
    %c0_52 = arith.constant 0 : index
    %187 = vector.load %arg7[%c0_51, %c0_52] : memref<16x32xf32, #tpu.memory_space<vmem>>, vector<16x32xf32>
    tpu.vector_store %arg7[%c0_51, %c0_52], %186 {strides = array<i32>} : memref<16x32xf32, #tpu.memory_space<vmem>>, vector<16x32xf32>,
    return
  }
}

module attributes {stable_mosaic.version = 11 : i64} {
  func.func @mha_block_kernel(%arg0: memref<16x32xf32, #tpu.memory_space<vmem>>, %arg1: memref<2x8xf32, #tpu.memory_space<vmem>>, %arg2: memref<1x32xf32, #tpu.memory_space<vmem>>, %arg3: memref<1x32xf32, #tpu.memory_space<vmem>>, %arg4: memref<32x96xf32, #tpu.memory_space<vmem>>, %arg5: memref<32x32xf32, #tpu.memory_space<vmem>>, %arg6: memref<1x32xf32, #tpu.memory_space<vmem>>, %arg7: memref<16x32xf32, #tpu.memory_space<vmem>>) attributes {dimension_semantics = [], scalar_prefetch = 0 : i64, scratch_operands = 0 : i64, tpu.core_type = #tpu.core_type<tc>} {
    %c0 = arith.constant 0 : index
    %c0_0 = arith.constant 0 : index
    %0 = vector.load %arg0[%c0, %c0_0] : memref<16x32xf32, #tpu.memory_space<vmem>>, vector<16x32xf32>
    %c0_1 = arith.constant 0 : index
    %c0_2 = arith.constant 0 : index
    %1 = vector.load %arg2[%c0_1, %c0_2] : memref<1x32xf32, #tpu.memory_space<vmem>>, vector<1x32xf32>
    %c0_3 = arith.constant 0 : index
    %c0_4 = arith.constant 0 : index
    %2 = vector.load %arg3[%c0_3, %c0_4] : memref<1x32xf32, #tpu.memory_space<vmem>>, vector<1x32xf32>
    %cst = arith.constant dense<0.000000e+00> : vector<16xf32>
    %3 = vector.multi_reduction <add>, %0, %cst [1] : vector<16x32xf32> to vector<16xf32>
    %4 = vector.shape_cast %3 : vector<16xf32> to vector<16x1xf32>
    %cst_5 = arith.constant 3.200000e+01 : f32
    %5 = vector.broadcast %cst_5 : f32 to vector<16x1xf32>
    %6 = arith.divf %4, %5 : vector<16x1xf32>
    %7 = vector.broadcast %6 : vector<16x1xf32> to vector<16x32xf32>
    %8 = arith.subf %0, %7 : vector<16x32xf32>
    %9 = arith.mulf %8, %8 : vector<16x32xf32>
    %cst_6 = arith.constant dense<0.000000e+00> : vector<16xf32>
    %10 = vector.multi_reduction <add>, %9, %cst_6 [1] : vector<16x32xf32> to vector<16xf32>
    %11 = vector.shape_cast %10 : vector<16xf32> to vector<16x1xf32>
    %cst_7 = arith.constant 3.100000e+01 : f32
    %12 = vector.broadcast %cst_7 : f32 to vector<16x1xf32>
    %13 = arith.divf %11, %12 : vector<16x1xf32>
    %14 = math.sqrt %13 : vector<16x1xf32>
    %15 = vector.broadcast %6 : vector<16x1xf32> to vector<16x32xf32>
    %16 = arith.subf %0, %15 : vector<16x32xf32>
    %17 = vector.broadcast %1 : vector<1x32xf32> to vector<16x32xf32>
    %18 = arith.mulf %17, %16 : vector<16x32xf32>
    %cst_8 = arith.constant 9.99999997E-7 : f32
    %19 = vector.broadcast %cst_8 : f32 to vector<16x1xf32>
    %20 = arith.addf %14, %19 : vector<16x1xf32>
    %21 = vector.broadcast %20 : vector<16x1xf32> to vector<16x32xf32>
    %22 = arith.divf %18, %21 : vector<16x32xf32>
    %23 = vector.broadcast %2 : vector<1x32xf32> to vector<16x32xf32>
    %24 = arith.addf %22, %23 : vector<16x32xf32>
    %c0_9 = arith.constant 0 : index
    %c0_10 = arith.constant 0 : index
    %25 = vector.load %arg4[%c0_9, %c0_10] : memref<32x96xf32, #tpu.memory_space<vmem>>, vector<32x96xf32>
    %26 = arith.truncf %24 : vector<16x32xf32> to vector<16x32xbf16>
    %27 = arith.truncf %25 : vector<32x96xf32> to vector<32x96xbf16>
    %cst_11 = arith.constant dense<0.000000e+00> : vector<16x96xf32>
    %28 = tpu.matmul %26, %27, %cst_11 {dimension_numbers = #tpu.dot_dimension_numbers<[1], [0], [0], [1], [0, 0, 1, 1], [], []>} : vector<16x32xbf16>, vector<32x96xbf16>, vector<16x96xf32> -> vector<16x96xf32>
    %29 = vector.extract_strided_slice %28 {offsets = [0, 0], sizes = [16, 32], strides = [1, 1]} : vector<16x96xf32> to vector<16x32xf32>
    %30 = vector.extract_strided_slice %28 {offsets = [0, 32], sizes = [16, 32], strides = [1, 1]} : vector<16x96xf32> to vector<16x32xf32>
    %31 = vector.extract_strided_slice %28 {offsets = [0, 64], sizes = [16, 32], strides = [1, 1]} : vector<16x96xf32> to vector<16x32xf32>
    %c0_12 = arith.constant 0 : index
    %c0_13 = arith.constant 0 : index
    %32 = vector.load %arg1[%c0_12, %c0_13] : memref<2x8xf32, #tpu.memory_space<vmem>>, vector<2x8xf32>
    %33 = vector.extract_strided_slice %29 {offsets = [0, 0], sizes = [16, 8], strides = [1, 1]} : vector<16x32xf32> to vector<16x8xf32>
    %34 = vector.shape_cast %33 : vector<16x8xf32> to vector<2x8x8xf32>
    %35 = vector.extract_strided_slice %30 {offsets = [0, 0], sizes = [16, 8], strides = [1, 1]} : vector<16x32xf32> to vector<16x8xf32>
    %36 = vector.shape_cast %35 : vector<16x8xf32> to vector<2x8x8xf32>
    %37 = vector.extract_strided_slice %31 {offsets = [0, 0], sizes = [16, 8], strides = [1, 1]} : vector<16x32xf32> to vector<16x8xf32>
    %38 = vector.shape_cast %37 : vector<16x8xf32> to vector<2x8x8xf32>
    %39 = arith.truncf %34 : vector<2x8x8xf32> to vector<2x8x8xbf16>
    %40 = arith.truncf %36 : vector<2x8x8xf32> to vector<2x8x8xbf16>
    "tpu.trace_start"() <{level = 10 : i32, message = "bqd,bkd->bqk"}> : () -> ()
    %cst_14 = arith.constant dense<0.000000e+00> : vector<2x8x8xf32>
    %41 = tpu.matmul %39, %40, %cst_14 {dimension_numbers = #tpu.dot_dimension_numbers<[2], [2], [1], [1], [0, 0, 0, 1, 1, 1], [0], [0]>} : vector<2x8x8xbf16>, vector<2x8x8xbf16>, vector<2x8x8xf32> -> vector<2x8x8xf32>
    "tpu.trace_stop"() : () -> ()
    %cst_15 = arith.constant 0.353553385 : f32
    %42 = vector.broadcast %cst_15 : f32 to vector<2x8x8xf32>
    %43 = arith.mulf %41, %42 : vector<2x8x8xf32>
    %44 = vector.shape_cast %32 : vector<2x8xf32> to vector<2x1x8xf32>
    %45 = vector.broadcast %44 : vector<2x1x8xf32> to vector<2x8x8xf32>
    %46 = arith.mulf %43, %45 : vector<2x8x8xf32>
    %cst_16 = arith.constant 0.000000e+00 : f32
    %47 = vector.broadcast %cst_16 : f32 to vector<2x8x8xf32>
    %48 = arith.cmpf oeq, %46, %47 : vector<2x8x8xf32>
    %cst_17 = arith.constant 0xFF800000 : f32
    %49 = vector.broadcast %cst_17 : f32 to vector<2x8x8xf32>
    %50 = arith.select %48, %49, %46 : vector<2x8x8xi1>, vector<2x8x8xf32>
    %cst_18 = arith.constant dense<0xFF800000> : vector<2x8xf32>
    %51 = vector.multi_reduction <maximumf>, %50, %cst_18 [2] : vector<2x8x8xf32> to vector<2x8xf32>
    %52 = vector.shape_cast %51 : vector<2x8xf32> to vector<2x8x1xf32>
    %53 = vector.broadcast %52 : vector<2x8x1xf32> to vector<2x8x8xf32>
    %54 = arith.subf %50, %53 : vector<2x8x8xf32>
    %55 = math.exp %54 : vector<2x8x8xf32>
    %cst_19 = arith.constant dense<0.000000e+00> : vector<2x8xf32>
    %56 = vector.multi_reduction <add>, %55, %cst_19 [2] : vector<2x8x8xf32> to vector<2x8xf32>
    %57 = vector.shape_cast %56 : vector<2x8xf32> to vector<2x8x1xf32>
    %58 = tpu.reciprocal %57 {approx = true} : vector<2x8x1xf32> -> vector<2x8x1xf32>
    %59 = vector.broadcast %58 : vector<2x8x1xf32> to vector<2x8x8xf32>
    %60 = arith.mulf %55, %59 : vector<2x8x8xf32>
    %61 = arith.truncf %60 : vector<2x8x8xf32> to vector<2x8x8xbf16>
    %62 = arith.truncf %38 : vector<2x8x8xf32> to vector<2x8x8xbf16>
    "tpu.trace_start"() <{level = 10 : i32, message = "bqk,bkd->bqd"}> : () -> ()
    %cst_20 = arith.constant dense<0.000000e+00> : vector<2x8x8xf32>
    %63 = tpu.matmul %61, %62, %cst_20 {dimension_numbers = #tpu.dot_dimension_numbers<[2], [1], [1], [2], [0, 0, 0, 1, 1, 2], [0], [0]>} : vector<2x8x8xbf16>, vector<2x8x8xbf16>, vector<2x8x8xf32> -> vector<2x8x8xf32>
    "tpu.trace_stop"() : () -> ()
    %64 = vector.extract_strided_slice %29 {offsets = [0, 8], sizes = [16, 8], strides = [1, 1]} : vector<16x32xf32> to vector<16x8xf32>
    %65 = vector.shape_cast %64 : vector<16x8xf32> to vector<2x8x8xf32>
    %66 = vector.extract_strided_slice %30 {offsets = [0, 8], sizes = [16, 8], strides = [1, 1]} : vector<16x32xf32> to vector<16x8xf32>
    %67 = vector.shape_cast %66 : vector<16x8xf32> to vector<2x8x8xf32>
    %68 = vector.extract_strided_slice %31 {offsets = [0, 8], sizes = [16, 8], strides = [1, 1]} : vector<16x32xf32> to vector<16x8xf32>
    %69 = vector.shape_cast %68 : vector<16x8xf32> to vector<2x8x8xf32>
    %70 = arith.truncf %65 : vector<2x8x8xf32> to vector<2x8x8xbf16>
    %71 = arith.truncf %67 : vector<2x8x8xf32> to vector<2x8x8xbf16>
    "tpu.trace_start"() <{level = 10 : i32, message = "bqd,bkd->bqk"}> : () -> ()
    %cst_21 = arith.constant dense<0.000000e+00> : vector<2x8x8xf32>
    %72 = tpu.matmul %70, %71, %cst_21 {dimension_numbers = #tpu.dot_dimension_numbers<[2], [2], [1], [1], [0, 0, 0, 1, 1, 1], [0], [0]>} : vector<2x8x8xbf16>, vector<2x8x8xbf16>, vector<2x8x8xf32> -> vector<2x8x8xf32>
    "tpu.trace_stop"() : () -> ()
    %cst_22 = arith.constant 0.353553385 : f32
    %73 = vector.broadcast %cst_22 : f32 to vector<2x8x8xf32>
    %74 = arith.mulf %72, %73 : vector<2x8x8xf32>
    %75 = vector.shape_cast %32 : vector<2x8xf32> to vector<2x1x8xf32>
    %76 = vector.broadcast %75 : vector<2x1x8xf32> to vector<2x8x8xf32>
    %77 = arith.mulf %74, %76 : vector<2x8x8xf32>
    %cst_23 = arith.constant 0.000000e+00 : f32
    %78 = vector.broadcast %cst_23 : f32 to vector<2x8x8xf32>
    %79 = arith.cmpf oeq, %77, %78 : vector<2x8x8xf32>
    %cst_24 = arith.constant 0xFF800000 : f32
    %80 = vector.broadcast %cst_24 : f32 to vector<2x8x8xf32>
    %81 = arith.select %79, %80, %77 : vector<2x8x8xi1>, vector<2x8x8xf32>
    %cst_25 = arith.constant dense<0xFF800000> : vector<2x8xf32>
    %82 = vector.multi_reduction <maximumf>, %81, %cst_25 [2] : vector<2x8x8xf32> to vector<2x8xf32>
    %83 = vector.shape_cast %82 : vector<2x8xf32> to vector<2x8x1xf32>
    %84 = vector.broadcast %83 : vector<2x8x1xf32> to vector<2x8x8xf32>
    %85 = arith.subf %81, %84 : vector<2x8x8xf32>
    %86 = math.exp %85 : vector<2x8x8xf32>
    %cst_26 = arith.constant dense<0.000000e+00> : vector<2x8xf32>
    %87 = vector.multi_reduction <add>, %86, %cst_26 [2] : vector<2x8x8xf32> to vector<2x8xf32>
    %88 = vector.shape_cast %87 : vector<2x8xf32> to vector<2x8x1xf32>
    %89 = tpu.reciprocal %88 {approx = true} : vector<2x8x1xf32> -> vector<2x8x1xf32>
    %90 = vector.broadcast %89 : vector<2x8x1xf32> to vector<2x8x8xf32>
    %91 = arith.mulf %86, %90 : vector<2x8x8xf32>
    %92 = arith.truncf %91 : vector<2x8x8xf32> to vector<2x8x8xbf16>
    %93 = arith.truncf %69 : vector<2x8x8xf32> to vector<2x8x8xbf16>
    "tpu.trace_start"() <{level = 10 : i32, message = "bqk,bkd->bqd"}> : () -> ()
    %cst_27 = arith.constant dense<0.000000e+00> : vector<2x8x8xf32>
    %94 = tpu.matmul %92, %93, %cst_27 {dimension_numbers = #tpu.dot_dimension_numbers<[2], [1], [1], [2], [0, 0, 0, 1, 1, 2], [0], [0]>} : vector<2x8x8xbf16>, vector<2x8x8xbf16>, vector<2x8x8xf32> -> vector<2x8x8xf32>
    "tpu.trace_stop"() : () -> ()
    %95 = vector.extract_strided_slice %29 {offsets = [0, 16], sizes = [16, 8], strides = [1, 1]} : vector<16x32xf32> to vector<16x8xf32>
    %96 = vector.shape_cast %95 : vector<16x8xf32> to vector<2x8x8xf32>
    %97 = vector.extract_strided_slice %30 {offsets = [0, 16], sizes = [16, 8], strides = [1, 1]} : vector<16x32xf32> to vector<16x8xf32>
    %98 = vector.shape_cast %97 : vector<16x8xf32> to vector<2x8x8xf32>
    %99 = vector.extract_strided_slice %31 {offsets = [0, 16], sizes = [16, 8], strides = [1, 1]} : vector<16x32xf32> to vector<16x8xf32>
    %100 = vector.shape_cast %99 : vector<16x8xf32> to vector<2x8x8xf32>
    %101 = arith.truncf %96 : vector<2x8x8xf32> to vector<2x8x8xbf16>
    %102 = arith.truncf %98 : vector<2x8x8xf32> to vector<2x8x8xbf16>
    "tpu.trace_start"() <{level = 10 : i32, message = "bqd,bkd->bqk"}> : () -> ()
    %cst_28 = arith.constant dense<0.000000e+00> : vector<2x8x8xf32>
    %103 = tpu.matmul %101, %102, %cst_28 {dimension_numbers = #tpu.dot_dimension_numbers<[2], [2], [1], [1], [0, 0, 0, 1, 1, 1], [0], [0]>} : vector<2x8x8xbf16>, vector<2x8x8xbf16>, vector<2x8x8xf32> -> vector<2x8x8xf32>
    "tpu.trace_stop"() : () -> ()
    %cst_29 = arith.constant 0.353553385 : f32
    %104 = vector.broadcast %cst_29 : f32 to vector<2x8x8xf32>
    %105 = arith.mulf %103, %104 : vector<2x8x8xf32>
    %106 = vector.shape_cast %32 : vector<2x8xf32> to vector<2x1x8xf32>
    %107 = vector.broadcast %106 : vector<2x1x8xf32> to vector<2x8x8xf32>
    %108 = arith.mulf %105, %107 : vector<2x8x8xf32>
    %cst_30 = arith.constant 0.000000e+00 : f32
    %109 = vector.broadcast %cst_30 : f32 to vector<2x8x8xf32>
    %110 = arith.cmpf oeq, %108, %109 : vector<2x8x8xf32>
    %cst_31 = arith.constant 0xFF800000 : f32
    %111 = vector.broadcast %cst_31 : f32 to vector<2x8x8xf32>
    %112 = arith.select %110, %111, %108 : vector<2x8x8xi1>, vector<2x8x8xf32>
    %cst_32 = arith.constant dense<0xFF800000> : vector<2x8xf32>
    %113 = vector.multi_reduction <maximumf>, %112, %cst_32 [2] : vector<2x8x8xf32> to vector<2x8xf32>
    %114 = vector.shape_cast %113 : vector<2x8xf32> to vector<2x8x1xf32>
    %115 = vector.broadcast %114 : vector<2x8x1xf32> to vector<2x8x8xf32>
    %116 = arith.subf %112, %115 : vector<2x8x8xf32>
    %117 = math.exp %116 : vector<2x8x8xf32>
    %cst_33 = arith.constant dense<0.000000e+00> : vector<2x8xf32>
    %118 = vector.multi_reduction <add>, %117, %cst_33 [2] : vector<2x8x8xf32> to vector<2x8xf32>
    %119 = vector.shape_cast %118 : vector<2x8xf32> to vector<2x8x1xf32>
    %120 = tpu.reciprocal %119 {approx = true} : vector<2x8x1xf32> -> vector<2x8x1xf32>
    %121 = vector.broadcast %120 : vector<2x8x1xf32> to vector<2x8x8xf32>
    %122 = arith.mulf %117, %121 : vector<2x8x8xf32>
    %123 = arith.truncf %122 : vector<2x8x8xf32> to vector<2x8x8xbf16>
    %124 = arith.truncf %100 : vector<2x8x8xf32> to vector<2x8x8xbf16>
    "tpu.trace_start"() <{level = 10 : i32, message = "bqk,bkd->bqd"}> : () -> ()
    %cst_34 = arith.constant dense<0.000000e+00> : vector<2x8x8xf32>
    %125 = tpu.matmul %123, %124, %cst_34 {dimension_numbers = #tpu.dot_dimension_numbers<[2], [1], [1], [2], [0, 0, 0, 1, 1, 2], [0], [0]>} : vector<2x8x8xbf16>, vector<2x8x8xbf16>, vector<2x8x8xf32> -> vector<2x8x8xf32>
    "tpu.trace_stop"() : () -> ()
    %126 = vector.extract_strided_slice %29 {offsets = [0, 24], sizes = [16, 8], strides = [1, 1]} : vector<16x32xf32> to vector<16x8xf32>
    %127 = vector.shape_cast %126 : vector<16x8xf32> to vector<2x8x8xf32>
    %128 = vector.extract_strided_slice %30 {offsets = [0, 24], sizes = [16, 8], strides = [1, 1]} : vector<16x32xf32> to vector<16x8xf32>
    %129 = vector.shape_cast %128 : vector<16x8xf32> to vector<2x8x8xf32>
    %130 = vector.extract_strided_slice %31 {offsets = [0, 24], sizes = [16, 8], strides = [1, 1]} : vector<16x32xf32> to vector<16x8xf32>
    %131 = vector.shape_cast %130 : vector<16x8xf32> to vector<2x8x8xf32>
    %132 = arith.truncf %127 : vector<2x8x8xf32> to vector<2x8x8xbf16>
    %133 = arith.truncf %129 : vector<2x8x8xf32> to vector<2x8x8xbf16>
    "tpu.trace_start"() <{level = 10 : i32, message = "bqd,bkd->bqk"}> : () -> ()
    %cst_35 = arith.constant dense<0.000000e+00> : vector<2x8x8xf32>
    %134 = tpu.matmul %132, %133, %cst_35 {dimension_numbers = #tpu.dot_dimension_numbers<[2], [2], [1], [1], [0, 0, 0, 1, 1, 1], [0], [0]>} : vector<2x8x8xbf16>, vector<2x8x8xbf16>, vector<2x8x8xf32> -> vector<2x8x8xf32>
    "tpu.trace_stop"() : () -> ()
    %cst_36 = arith.constant 0.353553385 : f32
    %135 = vector.broadcast %cst_36 : f32 to vector<2x8x8xf32>
    %136 = arith.mulf %134, %135 : vector<2x8x8xf32>
    %137 = vector.shape_cast %32 : vector<2x8xf32> to vector<2x1x8xf32>
    %138 = vector.broadcast %137 : vector<2x1x8xf32> to vector<2x8x8xf32>
    %139 = arith.mulf %136, %138 : vector<2x8x8xf32>
    %cst_37 = arith.constant 0.000000e+00 : f32
    %140 = vector.broadcast %cst_37 : f32 to vector<2x8x8xf32>
    %141 = arith.cmpf oeq, %139, %140 : vector<2x8x8xf32>
    %cst_38 = arith.constant 0xFF800000 : f32
    %142 = vector.broadcast %cst_38 : f32 to vector<2x8x8xf32>
    %143 = arith.select %141, %142, %139 : vector<2x8x8xi1>, vector<2x8x8xf32>
    %cst_39 = arith.constant dense<0xFF800000> : vector<2x8xf32>
    %144 = vector.multi_reduction <maximumf>, %143, %cst_39 [2] : vector<2x8x8xf32> to vector<2x8xf32>
    %145 = vector.shape_cast %144 : vector<2x8xf32> to vector<2x8x1xf32>
    %146 = vector.broadcast %145 : vector<2x8x1xf32> to vector<2x8x8xf32>
    %147 = arith.subf %143, %146 : vector<2x8x8xf32>
    %148 = math.exp %147 : vector<2x8x8xf32>
    %cst_40 = arith.constant dense<0.000000e+00> : vector<2x8xf32>
    %149 = vector.multi_reduction <add>, %148, %cst_40 [2] : vector<2x8x8xf32> to vector<2x8xf32>
    %150 = vector.shape_cast %149 : vector<2x8xf32> to vector<2x8x1xf32>
    %151 = tpu.reciprocal %150 {approx = true} : vector<2x8x1xf32> -> vector<2x8x1xf32>
    %152 = vector.broadcast %151 : vector<2x8x1xf32> to vector<2x8x8xf32>
    %153 = arith.mulf %148, %152 : vector<2x8x8xf32>
    %154 = arith.truncf %153 : vector<2x8x8xf32> to vector<2x8x8xbf16>
    %155 = arith.truncf %131 : vector<2x8x8xf32> to vector<2x8x8xbf16>
    "tpu.trace_start"() <{level = 10 : i32, message = "bqk,bkd->bqd"}> : () -> ()
    %cst_41 = arith.constant dense<0.000000e+00> : vector<2x8x8xf32>
    %156 = tpu.matmul %154, %155, %cst_41 {dimension_numbers = #tpu.dot_dimension_numbers<[2], [1], [1], [2], [0, 0, 0, 1, 1, 2], [0], [0]>} : vector<2x8x8xbf16>, vector<2x8x8xbf16>, vector<2x8x8xf32> -> vector<2x8x8xf32>
    "tpu.trace_stop"() : () -> ()
    %157 = tpu.concatenate %63, %94, %125, %156 in 2 : vector<2x8x8xf32>, vector<2x8x8xf32>, vector<2x8x8xf32>, vector<2x8x8xf32> -> vector<2x8x32xf32>
    %158 = vector.shape_cast %157 : vector<2x8x32xf32> to vector<16x32xf32>
    %c0_42 = arith.constant 0 : index
    %c0_43 = arith.constant 0 : index
    %159 = vector.load %arg5[%c0_42, %c0_43] : memref<32x32xf32, #tpu.memory_space<vmem>>, vector<32x32xf32>
    %160 = arith.truncf %158 : vector<16x32xf32> to vector<16x32xbf16>
    %161 = arith.truncf %159 : vector<32x32xf32> to vector<32x32xbf16>
    %cst_44 = arith.constant dense<0.000000e+00> : vector<16x32xf32>
    %162 = tpu.matmul %160, %161, %cst_44 {dimension_numbers = #tpu.dot_dimension_numbers<[1], [0], [0], [1], [0, 0, 1, 1], [], []>} : vector<16x32xbf16>, vector<32x32xbf16>, vector<16x32xf32> -> vector<16x32xf32>
    %163 = arith.addf %0, %162 : vector<16x32xf32>
    %c0_45 = arith.constant 0 : index
    %c0_46 = arith.constant 0 : index
    %164 = vector.load %arg6[%c0_45, %c0_46] : memref<1x32xf32, #tpu.memory_space<vmem>>, vector<1x32xf32>
    %165 = vector.broadcast %164 : vector<1x32xf32> to vector<16x32xf32>
    %166 = arith.addf %163, %165 : vector<16x32xf32>
    %c0_47 = arith.constant 0 : index
    %c0_48 = arith.constant 0 : index
    %167 = vector.load %arg7[%c0_47, %c0_48] : memref<16x32xf32, #tpu.memory_space<vmem>>, vector<16x32xf32>
    tpu.vector_store %arg7[%c0_47, %c0_48], %166 {strides = array<i32>} : memref<16x32xf32, #tpu.memory_space<vmem>>, vector<16x32xf32>,
    return
  }
}

module attributes {stable_mosaic.version = 11 : i64} {
  func.func @layernorm_kernel(%arg0: memref<16x32xf32, #tpu.memory_space<vmem>>, %arg1: memref<1x32xf32, #tpu.memory_space<vmem>>, %arg2: memref<1x32xf32, #tpu.memory_space<vmem>>, %arg3: memref<16x32xf32, #tpu.memory_space<vmem>>) attributes {dimension_semantics = [], scalar_prefetch = 0 : i64, scratch_operands = 0 : i64, tpu.core_type = #tpu.core_type<tc>} {
    %c0 = arith.constant 0 : index
    %c0_0 = arith.constant 0 : index
    %0 = vector.load %arg0[%c0, %c0_0] : memref<16x32xf32, #tpu.memory_space<vmem>>, vector<16x32xf32>
    %c0_1 = arith.constant 0 : index
    %c0_2 = arith.constant 0 : index
    %1 = vector.load %arg1[%c0_1, %c0_2] : memref<1x32xf32, #tpu.memory_space<vmem>>, vector<1x32xf32>
    %c0_3 = arith.constant 0 : index
    %c0_4 = arith.constant 0 : index
    %2 = vector.load %arg2[%c0_3, %c0_4] : memref<1x32xf32, #tpu.memory_space<vmem>>, vector<1x32xf32>
    %cst = arith.constant dense<0.000000e+00> : vector<16xf32>
    %3 = vector.multi_reduction <add>, %0, %cst [1] : vector<16x32xf32> to vector<16xf32>
    %4 = vector.shape_cast %3 : vector<16xf32> to vector<16x1xf32>
    %cst_5 = arith.constant 3.200000e+01 : f32
    %5 = vector.broadcast %cst_5 : f32 to vector<16x1xf32>
    %6 = arith.divf %4, %5 : vector<16x1xf32>
    %7 = vector.broadcast %6 : vector<16x1xf32> to vector<16x32xf32>
    %8 = arith.subf %0, %7 : vector<16x32xf32>
    %9 = arith.mulf %8, %8 : vector<16x32xf32>
    %cst_6 = arith.constant dense<0.000000e+00> : vector<16xf32>
    %10 = vector.multi_reduction <add>, %9, %cst_6 [1] : vector<16x32xf32> to vector<16xf32>
    %11 = vector.shape_cast %10 : vector<16xf32> to vector<16x1xf32>
    %cst_7 = arith.constant 3.100000e+01 : f32
    %12 = vector.broadcast %cst_7 : f32 to vector<16x1xf32>
    %13 = arith.divf %11, %12 : vector<16x1xf32>
    %14 = math.sqrt %13 : vector<16x1xf32>
    %15 = vector.broadcast %6 : vector<16x1xf32> to vector<16x32xf32>
    %16 = arith.subf %0, %15 : vector<16x32xf32>
    %17 = vector.broadcast %1 : vector<1x32xf32> to vector<16x32xf32>
    %18 = arith.mulf %17, %16 : vector<16x32xf32>
    %cst_8 = arith.constant 9.99999997E-7 : f32
    %19 = vector.broadcast %cst_8 : f32 to vector<16x1xf32>
    %20 = arith.addf %14, %19 : vector<16x1xf32>
    %21 = vector.broadcast %20 : vector<16x1xf32> to vector<16x32xf32>
    %22 = arith.divf %18, %21 : vector<16x32xf32>
    %23 = vector.broadcast %2 : vector<1x32xf32> to vector<16x32xf32>
    %24 = arith.addf %22, %23 : vector<16x32xf32>
    %c0_9 = arith.constant 0 : index
    %c0_10 = arith.constant 0 : index
    %25 = vector.load %arg3[%c0_9, %c0_10] : memref<16x32xf32, #tpu.memory_space<vmem>>, vector<16x32xf32>
    tpu.vector_store %arg3[%c0_9, %c0_10], %24 {strides = array<i32>} : memref<16x32xf32, #tpu.memory_space<vmem>>, vector<16x32xf32>,
    return
  }
}

module attributes {stable_mosaic.version = 11 : i64} {
  func.func @ffn_block_kernel(%arg0: i32, %arg1: memref<16x32xf32, #tpu.memory_space<vmem>>, %arg2: memref<1x32xf32, #tpu.memory_space<vmem>>, %arg3: memref<1x32xf32, #tpu.memory_space<vmem>>, %arg4: memref<32x2048xf32, #tpu.memory_space<vmem>>, %arg5: memref<1x2048xf32, #tpu.memory_space<vmem>>, %arg6: memref<2048x32xf32, #tpu.memory_space<vmem>>, %arg7: memref<1x32xf32, #tpu.memory_space<vmem>>, %arg8: memref<16x32xf32, #tpu.memory_space<vmem>>) attributes {dimension_semantics = [#tpu.dimension_semantics<parallel>], iteration_bounds = array<i64: 1>, scalar_prefetch = 0 : i64, scratch_operands = 0 : i64, tpu.core_type = #tpu.core_type<tc>, window_params = [{transform_indices = @transform_0, window_bounds = array<i64: 16, 32>}, {pipeline_mode = #tpu.pipeline_mode<synchronous>, transform_indices = @transform_1, window_bounds = array<i64: 1, 32>}, {pipeline_mode = #tpu.pipeline_mode<synchronous>, transform_indices = @transform_2, window_bounds = array<i64: 1, 32>}, {pipeline_mode = #tpu.pipeline_mode<synchronous>, transform_indices = @transform_3, window_bounds = array<i64: 32, 2048>}, {pipeline_mode = #tpu.pipeline_mode<synchronous>, transform_indices = @transform_4, window_bounds = array<i64: 1, 2048>}, {pipeline_mode = #tpu.pipeline_mode<synchronous>, transform_indices = @transform_5, window_bounds = array<i64: 2048, 32>}, {pipeline_mode = #tpu.pipeline_mode<synchronous>, transform_indices = @transform_6, window_bounds = array<i64: 1, 32>}, {transform_indices = @transform_7, window_bounds = array<i64: 16, 32>}]} {
    %c0 = arith.constant 0 : index
    %c0_0 = arith.constant 0 : index
    %0 = vector.load %arg1[%c0, %c0_0] : memref<16x32xf32, #tpu.memory_space<vmem>>, vector<16x32xf32>
    %c0_1 = arith.constant 0 : index
    %c0_2 = arith.constant 0 : index
    %1 = vector.load %arg2[%c0_1, %c0_2] : memref<1x32xf32, #tpu.memory_space<vmem>>, vector<1x32xf32>
    %c0_3 = arith.constant 0 : index
    %c0_4 = arith.constant 0 : index
    %2 = vector.load %arg3[%c0_3, %c0_4] : memref<1x32xf32, #tpu.memory_space<vmem>>, vector<1x32xf32>
    %cst = arith.constant dense<0.000000e+00> : vector<16xf32>
    %3 = vector.multi_reduction <add>, %0, %cst [1] : vector<16x32xf32> to vector<16xf32>
    %4 = vector.shape_cast %3 : vector<16xf32> to vector<16x1xf32>
    %cst_5 = arith.constant 3.200000e+01 : f32
    %5 = vector.broadcast %cst_5 : f32 to vector<16x1xf32>
    %6 = arith.divf %4, %5 : vector<16x1xf32>
    %7 = vector.broadcast %6 : vector<16x1xf32> to vector<16x32xf32>
    %8 = arith.subf %0, %7 : vector<16x32xf32>
    %9 = arith.mulf %8, %8 : vector<16x32xf32>
    %cst_6 = arith.constant dense<0.000000e+00> : vector<16xf32>
    %10 = vector.multi_reduction <add>, %9, %cst_6 [1] : vector<16x32xf32> to vector<16xf32>
    %11 = vector.shape_cast %10 : vector<16xf32> to vector<16x1xf32>
    %cst_7 = arith.constant 3.100000e+01 : f32
    %12 = vector.broadcast %cst_7 : f32 to vector<16x1xf32>
    %13 = arith.divf %11, %12 : vector<16x1xf32>
    %14 = math.sqrt %13 : vector<16x1xf32>
    %15 = vector.broadcast %6 : vector<16x1xf32> to vector<16x32xf32>
    %16 = arith.subf %0, %15 : vector<16x32xf32>
    %17 = vector.broadcast %1 : vector<1x32xf32> to vector<16x32xf32>
    %18 = arith.mulf %17, %16 : vector<16x32xf32>
    %cst_8 = arith.constant 9.99999997E-7 : f32
    %19 = vector.broadcast %cst_8 : f32 to vector<16x1xf32>
    %20 = arith.addf %14, %19 : vector<16x1xf32>
    %21 = vector.broadcast %20 : vector<16x1xf32> to vector<16x32xf32>
    %22 = arith.divf %18, %21 : vector<16x32xf32>
    %23 = vector.broadcast %2 : vector<1x32xf32> to vector<16x32xf32>
    %24 = arith.addf %22, %23 : vector<16x32xf32>
    %c0_9 = arith.constant 0 : index
    %c0_10 = arith.constant 0 : index
    %25 = vector.load %arg4[%c0_9, %c0_10] : memref<32x2048xf32, #tpu.memory_space<vmem>>, vector<32x2048xf32>
    %26 = arith.truncf %24 : vector<16x32xf32> to vector<16x32xbf16>
    %27 = arith.truncf %25 : vector<32x2048xf32> to vector<32x2048xbf16>
    %cst_11 = arith.constant dense<0.000000e+00> : vector<16x2048xf32>
    %28 = tpu.matmul %26, %27, %cst_11 {dimension_numbers = #tpu.dot_dimension_numbers<[1], [0], [0], [1], [0, 0, 1, 1], [], []>} : vector<16x32xbf16>, vector<32x2048xbf16>, vector<16x2048xf32> -> vector<16x2048xf32>
    %c0_12 = arith.constant 0 : index
    %c0_13 = arith.constant 0 : index
    %29 = vector.load %arg5[%c0_12, %c0_13] : memref<1x2048xf32, #tpu.memory_space<vmem>>, vector<1x2048xf32>
    %30 = vector.broadcast %29 : vector<1x2048xf32> to vector<16x2048xf32>
    %31 = arith.addf %28, %30 : vector<16x2048xf32>
    %cst_14 = arith.constant 0.000000e+00 : f32
    %32 = vector.broadcast %cst_14 : f32 to vector<16x2048xf32>
    %33 = arith.maximumf %31, %32 : vector<16x2048xf32>
    %c0_15 = arith.constant 0 : index
    %c0_16 = arith.constant 0 : index
    %34 = vector.load %arg6[%c0_15, %c0_16] : memref<2048x32xf32, #tpu.memory_space<vmem>>, vector<2048x32xf32>
    %35 = arith.truncf %33 : vector<16x2048xf32> to vector<16x2048xbf16>
    %36 = arith.truncf %34 : vector<2048x32xf32> to vector<2048x32xbf16>
    %cst_17 = arith.constant dense<0.000000e+00> : vector<16x32xf32>
    %37 = tpu.matmul %35, %36, %cst_17 {dimension_numbers = #tpu.dot_dimension_numbers<[1], [0], [0], [1], [0, 0, 1, 1], [], []>} : vector<16x2048xbf16>, vector<2048x32xbf16>, vector<16x32xf32> -> vector<16x32xf32>
    %c0_18 = arith.constant 0 : index
    %c0_19 = arith.constant 0 : index
    %38 = vector.load %arg7[%c0_18, %c0_19] : memref<1x32xf32, #tpu.memory_space<vmem>>, vector<1x32xf32>
    %39 = vector.broadcast %38 : vector<1x32xf32> to vector<16x32xf32>
    %40 = arith.addf %37, %39 : vector<16x32xf32>
    %41 = arith.addf %0, %40 : vector<16x32xf32>
    %c0_20 = arith.constant 0 : index
    %c0_21 = arith.constant 0 : index
    %42 = vector.load %arg8[%c0_20, %c0_21] : memref<16x32xf32, #tpu.memory_space<vmem>>, vector<16x32xf32>
    tpu.vector_store %arg8[%c0_20, %c0_21], %41 {strides = array<i32>} : memref<16x32xf32, #tpu.memory_space<vmem>>, vector<16x32xf32>,
    return
  }
  func.func @transform_0(%arg0: i32) -> (i32, i32) {
    %c0_i32 = arith.constant 0 : i32
    %c0_i32_0 = arith.constant 0 : i32
    return %arg0, %c0_i32 : i32, i32
  }
  func.func @transform_1(%arg0: i32) -> (i32, i32) {
    %c0_i32 = arith.constant 0 : i32
    %c0_i32_0 = arith.constant 0 : i32
    %c0_i32_1 = arith.constant 0 : i32
    return %c0_i32, %c0_i32_0 : i32, i32
  }
  func.func @transform_2(%arg0: i32) -> (i32, i32) {
    %c0_i32 = arith.constant 0 : i32
    %c0_i32_0 = arith.constant 0 : i32
    %c0_i32_1 = arith.constant 0 : i32
    return %c0_i32, %c0_i32_0 : i32, i32
  }
  func.func @transform_3(%arg0: i32) -> (i32, i32) {
    %c0_i32 = arith.constant 0 : i32
    %c0_i32_0 = arith.constant 0 : i32
    %c0_i32_1 = arith.constant 0 : i32
    return %c0_i32, %c0_i32_0 : i32, i32
  }
  func.func @transform_4(%arg0: i32) -> (i32, i32) {
    %c0_i32 = arith.constant 0 : i32
    %c0_i32_0 = arith.constant 0 : i32
    %c0_i32_1 = arith.constant 0 : i32
    return %c0_i32, %c0_i32_0 : i32, i32
  }
  func.func @transform_5(%arg0: i32) -> (i32, i32) {
    %c0_i32 = arith.constant 0 : i32
    %c0_i32_0 = arith.constant 0 : i32
    %c0_i32_1 = arith.constant 0 : i32
    return %c0_i32, %c0_i32_0 : i32, i32
  }
  func.func @transform_6(%arg0: i32) -> (i32, i32) {
    %c0_i32 = arith.constant 0 : i32
    %c0_i32_0 = arith.constant 0 : i32
    %c0_i32_1 = arith.constant 0 : i32
    return %c0_i32, %c0_i32_0 : i32, i32
  }
  func.func @transform_7(%arg0: i32) -> (i32, i32) {
    %c0_i32 = arith.constant 0 : i32
    %c0_i32_0 = arith.constant 0 : i32
    return %arg0, %c0_i32 : i32, i32
  }
}

module attributes {stable_mosaic.version = 11 : i64} {
  func.func @mha_block_kernel(%arg0: memref<16x32xf32, #tpu.memory_space<vmem>>, %arg1: memref<16x32xf32, #tpu.memory_space<vmem>>, %arg2: memref<2x8xf32, #tpu.memory_space<vmem>>, %arg3: memref<1x32xf32, #tpu.memory_space<vmem>>, %arg4: memref<1x32xf32, #tpu.memory_space<vmem>>, %arg5: memref<32x96xf32, #tpu.memory_space<vmem>>, %arg6: memref<32x32xf32, #tpu.memory_space<vmem>>, %arg7: memref<1x32xf32, #tpu.memory_space<vmem>>, %arg8: memref<16x32xf32, #tpu.memory_space<vmem>>) attributes {dimension_semantics = [], scalar_prefetch = 0 : i64, scratch_operands = 0 : i64, tpu.core_type = #tpu.core_type<tc>} {
    %c0 = arith.constant 0 : index
    %c0_0 = arith.constant 0 : index
    %0 = vector.load %arg0[%c0, %c0_0] : memref<16x32xf32, #tpu.memory_space<vmem>>, vector<16x32xf32>
    %c0_1 = arith.constant 0 : index
    %c0_2 = arith.constant 0 : index
    %1 = vector.load %arg3[%c0_1, %c0_2] : memref<1x32xf32, #tpu.memory_space<vmem>>, vector<1x32xf32>
    %c0_3 = arith.constant 0 : index
    %c0_4 = arith.constant 0 : index
    %2 = vector.load %arg4[%c0_3, %c0_4] : memref<1x32xf32, #tpu.memory_space<vmem>>, vector<1x32xf32>
    %cst = arith.constant dense<0.000000e+00> : vector<16xf32>
    %3 = vector.multi_reduction <add>, %0, %cst [1] : vector<16x32xf32> to vector<16xf32>
    %4 = vector.shape_cast %3 : vector<16xf32> to vector<16x1xf32>
    %cst_5 = arith.constant 3.200000e+01 : f32
    %5 = vector.broadcast %cst_5 : f32 to vector<16x1xf32>
    %6 = arith.divf %4, %5 : vector<16x1xf32>
    %7 = vector.broadcast %6 : vector<16x1xf32> to vector<16x32xf32>
    %8 = arith.subf %0, %7 : vector<16x32xf32>
    %9 = arith.mulf %8, %8 : vector<16x32xf32>
    %cst_6 = arith.constant dense<0.000000e+00> : vector<16xf32>
    %10 = vector.multi_reduction <add>, %9, %cst_6 [1] : vector<16x32xf32> to vector<16xf32>
    %11 = vector.shape_cast %10 : vector<16xf32> to vector<16x1xf32>
    %cst_7 = arith.constant 3.100000e+01 : f32
    %12 = vector.broadcast %cst_7 : f32 to vector<16x1xf32>
    %13 = arith.divf %11, %12 : vector<16x1xf32>
    %14 = math.sqrt %13 : vector<16x1xf32>
    %15 = vector.broadcast %6 : vector<16x1xf32> to vector<16x32xf32>
    %16 = arith.subf %0, %15 : vector<16x32xf32>
    %17 = vector.broadcast %1 : vector<1x32xf32> to vector<16x32xf32>
    %18 = arith.mulf %17, %16 : vector<16x32xf32>
    %cst_8 = arith.constant 9.99999997E-7 : f32
    %19 = vector.broadcast %cst_8 : f32 to vector<16x1xf32>
    %20 = arith.addf %14, %19 : vector<16x1xf32>
    %21 = vector.broadcast %20 : vector<16x1xf32> to vector<16x32xf32>
    %22 = arith.divf %18, %21 : vector<16x32xf32>
    %23 = vector.broadcast %2 : vector<1x32xf32> to vector<16x32xf32>
    %24 = arith.addf %22, %23 : vector<16x32xf32>
    %c0_9 = arith.constant 0 : index
    %c0_10 = arith.constant 0 : index
    %25 = vector.load %arg5[%c0_9, %c0_10] : memref<32x96xf32, #tpu.memory_space<vmem>>, vector<32x96xf32>
    %26 = vector.extract_strided_slice %25 {offsets = [0, 0], sizes = [32, 32], strides = [1, 1]} : vector<32x96xf32> to vector<32x32xf32>
    %27 = arith.truncf %24 : vector<16x32xf32> to vector<16x32xbf16>
    %28 = arith.truncf %26 : vector<32x32xf32> to vector<32x32xbf16>
    %cst_11 = arith.constant dense<0.000000e+00> : vector<16x32xf32>
    %29 = tpu.matmul %27, %28, %cst_11 {dimension_numbers = #tpu.dot_dimension_numbers<[1], [0], [0], [1], [0, 0, 1, 1], [], []>} : vector<16x32xbf16>, vector<32x32xbf16>, vector<16x32xf32> -> vector<16x32xf32>
    %c0_12 = arith.constant 0 : index
    %c0_13 = arith.constant 0 : index
    %30 = vector.load %arg1[%c0_12, %c0_13] : memref<16x32xf32, #tpu.memory_space<vmem>>, vector<16x32xf32>
    %31 = vector.extract_strided_slice %25 {offsets = [0, 32], sizes = [32, 64], strides = [1, 1]} : vector<32x96xf32> to vector<32x64xf32>
    %32 = arith.truncf %30 : vector<16x32xf32> to vector<16x32xbf16>
    %33 = arith.truncf %31 : vector<32x64xf32> to vector<32x64xbf16>
    %cst_14 = arith.constant dense<0.000000e+00> : vector<16x64xf32>
    %34 = tpu.matmul %32, %33, %cst_14 {dimension_numbers = #tpu.dot_dimension_numbers<[1], [0], [0], [1], [0, 0, 1, 1], [], []>} : vector<16x32xbf16>, vector<32x64xbf16>, vector<16x64xf32> -> vector<16x64xf32>
    %35 = vector.extract_strided_slice %34 {offsets = [0, 0], sizes = [16, 32], strides = [1, 1]} : vector<16x64xf32> to vector<16x32xf32>
    %36 = vector.extract_strided_slice %34 {offsets = [0, 32], sizes = [16, 32], strides = [1, 1]} : vector<16x64xf32> to vector<16x32xf32>
    %c0_15 = arith.constant 0 : index
    %c0_16 = arith.constant 0 : index
    %37 = vector.load %arg2[%c0_15, %c0_16] : memref<2x8xf32, #tpu.memory_space<vmem>>, vector<2x8xf32>
    %38 = vector.extract_strided_slice %29 {offsets = [0, 0], sizes = [16, 8], strides = [1, 1]} : vector<16x32xf32> to vector<16x8xf32>
    %39 = vector.shape_cast %38 : vector<16x8xf32> to vector<2x8x8xf32>
    %40 = vector.extract_strided_slice %35 {offsets = [0, 0], sizes = [16, 8], strides = [1, 1]} : vector<16x32xf32> to vector<16x8xf32>
    %41 = vector.shape_cast %40 : vector<16x8xf32> to vector<2x8x8xf32>
    %42 = vector.extract_strided_slice %36 {offsets = [0, 0], sizes = [16, 8], strides = [1, 1]} : vector<16x32xf32> to vector<16x8xf32>
    %43 = vector.shape_cast %42 : vector<16x8xf32> to vector<2x8x8xf32>
    %44 = arith.truncf %39 : vector<2x8x8xf32> to vector<2x8x8xbf16>
    %45 = arith.truncf %41 : vector<2x8x8xf32> to vector<2x8x8xbf16>
    "tpu.trace_start"() <{level = 10 : i32, message = "bqd,bkd->bqk"}> : () -> ()
    %cst_17 = arith.constant dense<0.000000e+00> : vector<2x8x8xf32>
    %46 = tpu.matmul %44, %45, %cst_17 {dimension_numbers = #tpu.dot_dimension_numbers<[2], [2], [1], [1], [0, 0, 0, 1, 1, 1], [0], [0]>} : vector<2x8x8xbf16>, vector<2x8x8xbf16>, vector<2x8x8xf32> -> vector<2x8x8xf32>
    "tpu.trace_stop"() : () -> ()
    %cst_18 = arith.constant 0.353553385 : f32
    %47 = vector.broadcast %cst_18 : f32 to vector<2x8x8xf32>
    %48 = arith.mulf %46, %47 : vector<2x8x8xf32>
    %49 = vector.shape_cast %37 : vector<2x8xf32> to vector<2x1x8xf32>
    %50 = vector.broadcast %49 : vector<2x1x8xf32> to vector<2x8x8xf32>
    %51 = arith.mulf %48, %50 : vector<2x8x8xf32>
    %cst_19 = arith.constant 0.000000e+00 : f32
    %52 = vector.broadcast %cst_19 : f32 to vector<2x8x8xf32>
    %53 = arith.cmpf oeq, %51, %52 : vector<2x8x8xf32>
    %cst_20 = arith.constant 0xFF800000 : f32
    %54 = vector.broadcast %cst_20 : f32 to vector<2x8x8xf32>
    %55 = arith.select %53, %54, %51 : vector<2x8x8xi1>, vector<2x8x8xf32>
    %cst_21 = arith.constant dense<0xFF800000> : vector<2x8xf32>
    %56 = vector.multi_reduction <maximumf>, %55, %cst_21 [2] : vector<2x8x8xf32> to vector<2x8xf32>
    %57 = vector.shape_cast %56 : vector<2x8xf32> to vector<2x8x1xf32>
    %58 = vector.broadcast %57 : vector<2x8x1xf32> to vector<2x8x8xf32>
    %59 = arith.subf %55, %58 : vector<2x8x8xf32>
    %60 = math.exp %59 : vector<2x8x8xf32>
    %cst_22 = arith.constant dense<0.000000e+00> : vector<2x8xf32>
    %61 = vector.multi_reduction <add>, %60, %cst_22 [2] : vector<2x8x8xf32> to vector<2x8xf32>
    %62 = vector.shape_cast %61 : vector<2x8xf32> to vector<2x8x1xf32>
    %63 = tpu.reciprocal %62 {approx = true} : vector<2x8x1xf32> -> vector<2x8x1xf32>
    %64 = vector.broadcast %63 : vector<2x8x1xf32> to vector<2x8x8xf32>
    %65 = arith.mulf %60, %64 : vector<2x8x8xf32>
    %66 = arith.truncf %65 : vector<2x8x8xf32> to vector<2x8x8xbf16>
    %67 = arith.truncf %43 : vector<2x8x8xf32> to vector<2x8x8xbf16>
    "tpu.trace_start"() <{level = 10 : i32, message = "bqk,bkd->bqd"}> : () -> ()
    %cst_23 = arith.constant dense<0.000000e+00> : vector<2x8x8xf32>
    %68 = tpu.matmul %66, %67, %cst_23 {dimension_numbers = #tpu.dot_dimension_numbers<[2], [1], [1], [2], [0, 0, 0, 1, 1, 2], [0], [0]>} : vector<2x8x8xbf16>, vector<2x8x8xbf16>, vector<2x8x8xf32> -> vector<2x8x8xf32>
    "tpu.trace_stop"() : () -> ()
    %69 = vector.extract_strided_slice %29 {offsets = [0, 8], sizes = [16, 8], strides = [1, 1]} : vector<16x32xf32> to vector<16x8xf32>
    %70 = vector.shape_cast %69 : vector<16x8xf32> to vector<2x8x8xf32>
    %71 = vector.extract_strided_slice %35 {offsets = [0, 8], sizes = [16, 8], strides = [1, 1]} : vector<16x32xf32> to vector<16x8xf32>
    %72 = vector.shape_cast %71 : vector<16x8xf32> to vector<2x8x8xf32>
    %73 = vector.extract_strided_slice %36 {offsets = [0, 8], sizes = [16, 8], strides = [1, 1]} : vector<16x32xf32> to vector<16x8xf32>
    %74 = vector.shape_cast %73 : vector<16x8xf32> to vector<2x8x8xf32>
    %75 = arith.truncf %70 : vector<2x8x8xf32> to vector<2x8x8xbf16>
    %76 = arith.truncf %72 : vector<2x8x8xf32> to vector<2x8x8xbf16>
    "tpu.trace_start"() <{level = 10 : i32, message = "bqd,bkd->bqk"}> : () -> ()
    %cst_24 = arith.constant dense<0.000000e+00> : vector<2x8x8xf32>
    %77 = tpu.matmul %75, %76, %cst_24 {dimension_numbers = #tpu.dot_dimension_numbers<[2], [2], [1], [1], [0, 0, 0, 1, 1, 1], [0], [0]>} : vector<2x8x8xbf16>, vector<2x8x8xbf16>, vector<2x8x8xf32> -> vector<2x8x8xf32>
    "tpu.trace_stop"() : () -> ()
    %cst_25 = arith.constant 0.353553385 : f32
    %78 = vector.broadcast %cst_25 : f32 to vector<2x8x8xf32>
    %79 = arith.mulf %77, %78 : vector<2x8x8xf32>
    %80 = vector.shape_cast %37 : vector<2x8xf32> to vector<2x1x8xf32>
    %81 = vector.broadcast %80 : vector<2x1x8xf32> to vector<2x8x8xf32>
    %82 = arith.mulf %79, %81 : vector<2x8x8xf32>
    %cst_26 = arith.constant 0.000000e+00 : f32
    %83 = vector.broadcast %cst_26 : f32 to vector<2x8x8xf32>
    %84 = arith.cmpf oeq, %82, %83 : vector<2x8x8xf32>
    %cst_27 = arith.constant 0xFF800000 : f32
    %85 = vector.broadcast %cst_27 : f32 to vector<2x8x8xf32>
    %86 = arith.select %84, %85, %82 : vector<2x8x8xi1>, vector<2x8x8xf32>
    %cst_28 = arith.constant dense<0xFF800000> : vector<2x8xf32>
    %87 = vector.multi_reduction <maximumf>, %86, %cst_28 [2] : vector<2x8x8xf32> to vector<2x8xf32>
    %88 = vector.shape_cast %87 : vector<2x8xf32> to vector<2x8x1xf32>
    %89 = vector.broadcast %88 : vector<2x8x1xf32> to vector<2x8x8xf32>
    %90 = arith.subf %86, %89 : vector<2x8x8xf32>
    %91 = math.exp %90 : vector<2x8x8xf32>
    %cst_29 = arith.constant dense<0.000000e+00> : vector<2x8xf32>
    %92 = vector.multi_reduction <add>, %91, %cst_29 [2] : vector<2x8x8xf32> to vector<2x8xf32>
    %93 = vector.shape_cast %92 : vector<2x8xf32> to vector<2x8x1xf32>
    %94 = tpu.reciprocal %93 {approx = true} : vector<2x8x1xf32> -> vector<2x8x1xf32>
    %95 = vector.broadcast %94 : vector<2x8x1xf32> to vector<2x8x8xf32>
    %96 = arith.mulf %91, %95 : vector<2x8x8xf32>
    %97 = arith.truncf %96 : vector<2x8x8xf32> to vector<2x8x8xbf16>
    %98 = arith.truncf %74 : vector<2x8x8xf32> to vector<2x8x8xbf16>
    "tpu.trace_start"() <{level = 10 : i32, message = "bqk,bkd->bqd"}> : () -> ()
    %cst_30 = arith.constant dense<0.000000e+00> : vector<2x8x8xf32>
    %99 = tpu.matmul %97, %98, %cst_30 {dimension_numbers = #tpu.dot_dimension_numbers<[2], [1], [1], [2], [0, 0, 0, 1, 1, 2], [0], [0]>} : vector<2x8x8xbf16>, vector<2x8x8xbf16>, vector<2x8x8xf32> -> vector<2x8x8xf32>
    "tpu.trace_stop"() : () -> ()
    %100 = vector.extract_strided_slice %29 {offsets = [0, 16], sizes = [16, 8], strides = [1, 1]} : vector<16x32xf32> to vector<16x8xf32>
    %101 = vector.shape_cast %100 : vector<16x8xf32> to vector<2x8x8xf32>
    %102 = vector.extract_strided_slice %35 {offsets = [0, 16], sizes = [16, 8], strides = [1, 1]} : vector<16x32xf32> to vector<16x8xf32>
    %103 = vector.shape_cast %102 : vector<16x8xf32> to vector<2x8x8xf32>
    %104 = vector.extract_strided_slice %36 {offsets = [0, 16], sizes = [16, 8], strides = [1, 1]} : vector<16x32xf32> to vector<16x8xf32>
    %105 = vector.shape_cast %104 : vector<16x8xf32> to vector<2x8x8xf32>
    %106 = arith.truncf %101 : vector<2x8x8xf32> to vector<2x8x8xbf16>
    %107 = arith.truncf %103 : vector<2x8x8xf32> to vector<2x8x8xbf16>
    "tpu.trace_start"() <{level = 10 : i32, message = "bqd,bkd->bqk"}> : () -> ()
    %cst_31 = arith.constant dense<0.000000e+00> : vector<2x8x8xf32>
    %108 = tpu.matmul %106, %107, %cst_31 {dimension_numbers = #tpu.dot_dimension_numbers<[2], [2], [1], [1], [0, 0, 0, 1, 1, 1], [0], [0]>} : vector<2x8x8xbf16>, vector<2x8x8xbf16>, vector<2x8x8xf32> -> vector<2x8x8xf32>
    "tpu.trace_stop"() : () -> ()
    %cst_32 = arith.constant 0.353553385 : f32
    %109 = vector.broadcast %cst_32 : f32 to vector<2x8x8xf32>
    %110 = arith.mulf %108, %109 : vector<2x8x8xf32>
    %111 = vector.shape_cast %37 : vector<2x8xf32> to vector<2x1x8xf32>
    %112 = vector.broadcast %111 : vector<2x1x8xf32> to vector<2x8x8xf32>
    %113 = arith.mulf %110, %112 : vector<2x8x8xf32>
    %cst_33 = arith.constant 0.000000e+00 : f32
    %114 = vector.broadcast %cst_33 : f32 to vector<2x8x8xf32>
    %115 = arith.cmpf oeq, %113, %114 : vector<2x8x8xf32>
    %cst_34 = arith.constant 0xFF800000 : f32
    %116 = vector.broadcast %cst_34 : f32 to vector<2x8x8xf32>
    %117 = arith.select %115, %116, %113 : vector<2x8x8xi1>, vector<2x8x8xf32>
    %cst_35 = arith.constant dense<0xFF800000> : vector<2x8xf32>
    %118 = vector.multi_reduction <maximumf>, %117, %cst_35 [2] : vector<2x8x8xf32> to vector<2x8xf32>
    %119 = vector.shape_cast %118 : vector<2x8xf32> to vector<2x8x1xf32>
    %120 = vector.broadcast %119 : vector<2x8x1xf32> to vector<2x8x8xf32>
    %121 = arith.subf %117, %120 : vector<2x8x8xf32>
    %122 = math.exp %121 : vector<2x8x8xf32>
    %cst_36 = arith.constant dense<0.000000e+00> : vector<2x8xf32>
    %123 = vector.multi_reduction <add>, %122, %cst_36 [2] : vector<2x8x8xf32> to vector<2x8xf32>
    %124 = vector.shape_cast %123 : vector<2x8xf32> to vector<2x8x1xf32>
    %125 = tpu.reciprocal %124 {approx = true} : vector<2x8x1xf32> -> vector<2x8x1xf32>
    %126 = vector.broadcast %125 : vector<2x8x1xf32> to vector<2x8x8xf32>
    %127 = arith.mulf %122, %126 : vector<2x8x8xf32>
    %128 = arith.truncf %127 : vector<2x8x8xf32> to vector<2x8x8xbf16>
    %129 = arith.truncf %105 : vector<2x8x8xf32> to vector<2x8x8xbf16>
    "tpu.trace_start"() <{level = 10 : i32, message = "bqk,bkd->bqd"}> : () -> ()
    %cst_37 = arith.constant dense<0.000000e+00> : vector<2x8x8xf32>
    %130 = tpu.matmul %128, %129, %cst_37 {dimension_numbers = #tpu.dot_dimension_numbers<[2], [1], [1], [2], [0, 0, 0, 1, 1, 2], [0], [0]>} : vector<2x8x8xbf16>, vector<2x8x8xbf16>, vector<2x8x8xf32> -> vector<2x8x8xf32>
    "tpu.trace_stop"() : () -> ()
    %131 = vector.extract_strided_slice %29 {offsets = [0, 24], sizes = [16, 8], strides = [1, 1]} : vector<16x32xf32> to vector<16x8xf32>
    %132 = vector.shape_cast %131 : vector<16x8xf32> to vector<2x8x8xf32>
    %133 = vector.extract_strided_slice %35 {offsets = [0, 24], sizes = [16, 8], strides = [1, 1]} : vector<16x32xf32> to vector<16x8xf32>
    %134 = vector.shape_cast %133 : vector<16x8xf32> to vector<2x8x8xf32>
    %135 = vector.extract_strided_slice %36 {offsets = [0, 24], sizes = [16, 8], strides = [1, 1]} : vector<16x32xf32> to vector<16x8xf32>
    %136 = vector.shape_cast %135 : vector<16x8xf32> to vector<2x8x8xf32>
    %137 = arith.truncf %132 : vector<2x8x8xf32> to vector<2x8x8xbf16>
    %138 = arith.truncf %134 : vector<2x8x8xf32> to vector<2x8x8xbf16>
    "tpu.trace_start"() <{level = 10 : i32, message = "bqd,bkd->bqk"}> : () -> ()
    %cst_38 = arith.constant dense<0.000000e+00> : vector<2x8x8xf32>
    %139 = tpu.matmul %137, %138, %cst_38 {dimension_numbers = #tpu.dot_dimension_numbers<[2], [2], [1], [1], [0, 0, 0, 1, 1, 1], [0], [0]>} : vector<2x8x8xbf16>, vector<2x8x8xbf16>, vector<2x8x8xf32> -> vector<2x8x8xf32>
    "tpu.trace_stop"() : () -> ()
    %cst_39 = arith.constant 0.353553385 : f32
    %140 = vector.broadcast %cst_39 : f32 to vector<2x8x8xf32>
    %141 = arith.mulf %139, %140 : vector<2x8x8xf32>
    %142 = vector.shape_cast %37 : vector<2x8xf32> to vector<2x1x8xf32>
    %143 = vector.broadcast %142 : vector<2x1x8xf32> to vector<2x8x8xf32>
    %144 = arith.mulf %141, %143 : vector<2x8x8xf32>
    %cst_40 = arith.constant 0.000000e+00 : f32
    %145 = vector.broadcast %cst_40 : f32 to vector<2x8x8xf32>
    %146 = arith.cmpf oeq, %144, %145 : vector<2x8x8xf32>
    %cst_41 = arith.constant 0xFF800000 : f32
    %147 = vector.broadcast %cst_41 : f32 to vector<2x8x8xf32>
    %148 = arith.select %146, %147, %144 : vector<2x8x8xi1>, vector<2x8x8xf32>
    %cst_42 = arith.constant dense<0xFF800000> : vector<2x8xf32>
    %149 = vector.multi_reduction <maximumf>, %148, %cst_42 [2] : vector<2x8x8xf32> to vector<2x8xf32>
    %150 = vector.shape_cast %149 : vector<2x8xf32> to vector<2x8x1xf32>
    %151 = vector.broadcast %150 : vector<2x8x1xf32> to vector<2x8x8xf32>
    %152 = arith.subf %148, %151 : vector<2x8x8xf32>
    %153 = math.exp %152 : vector<2x8x8xf32>
    %cst_43 = arith.constant dense<0.000000e+00> : vector<2x8xf32>
    %154 = vector.multi_reduction <add>, %153, %cst_43 [2] : vector<2x8x8xf32> to vector<2x8xf32>
    %155 = vector.shape_cast %154 : vector<2x8xf32> to vector<2x8x1xf32>
    %156 = tpu.reciprocal %155 {approx = true} : vector<2x8x1xf32> -> vector<2x8x1xf32>
    %157 = vector.broadcast %156 : vector<2x8x1xf32> to vector<2x8x8xf32>
    %158 = arith.mulf %153, %157 : vector<2x8x8xf32>
    %159 = arith.truncf %158 : vector<2x8x8xf32> to vector<2x8x8xbf16>
    %160 = arith.truncf %136 : vector<2x8x8xf32> to vector<2x8x8xbf16>
    "tpu.trace_start"() <{level = 10 : i32, message = "bqk,bkd->bqd"}> : () -> ()
    %cst_44 = arith.constant dense<0.000000e+00> : vector<2x8x8xf32>
    %161 = tpu.matmul %159, %160, %cst_44 {dimension_numbers = #tpu.dot_dimension_numbers<[2], [1], [1], [2], [0, 0, 0, 1, 1, 2], [0], [0]>} : vector<2x8x8xbf16>, vector<2x8x8xbf16>, vector<2x8x8xf32> -> vector<2x8x8xf32>
    "tpu.trace_stop"() : () -> ()
    %162 = tpu.concatenate %68, %99, %130, %161 in 2 : vector<2x8x8xf32>, vector<2x8x8xf32>, vector<2x8x8xf32>, vector<2x8x8xf32> -> vector<2x8x32xf32>
    %163 = vector.shape_cast %162 : vector<2x8x32xf32> to vector<16x32xf32>
    %c0_45 = arith.constant 0 : index
    %c0_46 = arith.constant 0 : index
    %164 = vector.load %arg6[%c0_45, %c0_46] : memref<32x32xf32, #tpu.memory_space<vmem>>, vector<32x32xf32>
    %165 = arith.truncf %163 : vector<16x32xf32> to vector<16x32xbf16>
    %166 = arith.truncf %164 : vector<32x32xf32> to vector<32x32xbf16>
    %cst_47 = arith.constant dense<0.000000e+00> : vector<16x32xf32>
    %167 = tpu.matmul %165, %166, %cst_47 {dimension_numbers = #tpu.dot_dimension_numbers<[1], [0], [0], [1], [0, 0, 1, 1], [], []>} : vector<16x32xbf16>, vector<32x32xbf16>, vector<16x32xf32> -> vector<16x32xf32>
    %168 = arith.addf %0, %167 : vector<16x32xf32>
    %c0_48 = arith.constant 0 : index
    %c0_49 = arith.constant 0 : index
    %169 = vector.load %arg7[%c0_48, %c0_49] : memref<1x32xf32, #tpu.memory_space<vmem>>, vector<1x32xf32>
    %170 = vector.broadcast %169 : vector<1x32xf32> to vector<16x32xf32>
    %171 = arith.addf %168, %170 : vector<16x32xf32>
    %c0_50 = arith.constant 0 : index
    %c0_51 = arith.constant 0 : index
    %172 = vector.load %arg8[%c0_50, %c0_51] : memref<16x32xf32, #tpu.memory_space<vmem>>, vector<16x32xf32>
    tpu.vector_store %arg8[%c0_50, %c0_51], %171 {strides = array<i32>} : memref<16x32xf32, #tpu.memory_space<vmem>>, vector<16x32xf32>,
    return
  }
}

module attributes {stable_mosaic.version = 11 : i64} {
  func.func @ln_linear_kernel(%arg0: memref<16x32xf32, #tpu.memory_space<vmem>>, %arg1: memref<1x32xf32, #tpu.memory_space<vmem>>, %arg2: memref<1x32xf32, #tpu.memory_space<vmem>>, %arg3: memref<32x13xf32, #tpu.memory_space<vmem>>, %arg4: memref<1x13xf32, #tpu.memory_space<vmem>>, %arg5: memref<16x13xf32, #tpu.memory_space<vmem>>) attributes {dimension_semantics = [], scalar_prefetch = 0 : i64, scratch_operands = 0 : i64, tpu.core_type = #tpu.core_type<tc>} {
    %c0 = arith.constant 0 : index
    %c0_0 = arith.constant 0 : index
    %0 = vector.load %arg0[%c0, %c0_0] : memref<16x32xf32, #tpu.memory_space<vmem>>, vector<16x32xf32>
    %c0_1 = arith.constant 0 : index
    %c0_2 = arith.constant 0 : index
    %1 = vector.load %arg1[%c0_1, %c0_2] : memref<1x32xf32, #tpu.memory_space<vmem>>, vector<1x32xf32>
    %c0_3 = arith.constant 0 : index
    %c0_4 = arith.constant 0 : index
    %2 = vector.load %arg2[%c0_3, %c0_4] : memref<1x32xf32, #tpu.memory_space<vmem>>, vector<1x32xf32>
    %cst = arith.constant dense<0.000000e+00> : vector<16xf32>
    %3 = vector.multi_reduction <add>, %0, %cst [1] : vector<16x32xf32> to vector<16xf32>
    %4 = vector.shape_cast %3 : vector<16xf32> to vector<16x1xf32>
    %cst_5 = arith.constant 3.200000e+01 : f32
    %5 = vector.broadcast %cst_5 : f32 to vector<16x1xf32>
    %6 = arith.divf %4, %5 : vector<16x1xf32>
    %7 = vector.broadcast %6 : vector<16x1xf32> to vector<16x32xf32>
    %8 = arith.subf %0, %7 : vector<16x32xf32>
    %9 = arith.mulf %8, %8 : vector<16x32xf32>
    %cst_6 = arith.constant dense<0.000000e+00> : vector<16xf32>
    %10 = vector.multi_reduction <add>, %9, %cst_6 [1] : vector<16x32xf32> to vector<16xf32>
    %11 = vector.shape_cast %10 : vector<16xf32> to vector<16x1xf32>
    %cst_7 = arith.constant 3.100000e+01 : f32
    %12 = vector.broadcast %cst_7 : f32 to vector<16x1xf32>
    %13 = arith.divf %11, %12 : vector<16x1xf32>
    %14 = math.sqrt %13 : vector<16x1xf32>
    %15 = vector.broadcast %6 : vector<16x1xf32> to vector<16x32xf32>
    %16 = arith.subf %0, %15 : vector<16x32xf32>
    %17 = vector.broadcast %1 : vector<1x32xf32> to vector<16x32xf32>
    %18 = arith.mulf %17, %16 : vector<16x32xf32>
    %cst_8 = arith.constant 9.99999997E-7 : f32
    %19 = vector.broadcast %cst_8 : f32 to vector<16x1xf32>
    %20 = arith.addf %14, %19 : vector<16x1xf32>
    %21 = vector.broadcast %20 : vector<16x1xf32> to vector<16x32xf32>
    %22 = arith.divf %18, %21 : vector<16x32xf32>
    %23 = vector.broadcast %2 : vector<1x32xf32> to vector<16x32xf32>
    %24 = arith.addf %22, %23 : vector<16x32xf32>
    %c0_9 = arith.constant 0 : index
    %c0_10 = arith.constant 0 : index
    %25 = vector.load %arg3[%c0_9, %c0_10] : memref<32x13xf32, #tpu.memory_space<vmem>>, vector<32x13xf32>
    %26 = arith.truncf %24 : vector<16x32xf32> to vector<16x32xbf16>
    %27 = arith.truncf %25 : vector<32x13xf32> to vector<32x13xbf16>
    %cst_11 = arith.constant dense<0.000000e+00> : vector<16x13xf32>
    %28 = tpu.matmul %26, %27, %cst_11 {dimension_numbers = #tpu.dot_dimension_numbers<[1], [0], [0], [1], [0, 0, 1, 1], [], []>} : vector<16x32xbf16>, vector<32x13xbf16>, vector<16x13xf32> -> vector<16x13xf32>
    %c0_12 = arith.constant 0 : index
    %c0_13 = arith.constant 0 : index
    %29 = vector.load %arg4[%c0_12, %c0_13] : memref<1x13xf32, #tpu.memory_space<vmem>>, vector<1x13xf32>
    %30 = vector.broadcast %29 : vector<1x13xf32> to vector<16x13xf32>
    %31 = arith.addf %28, %30 : vector<16x13xf32>
    %c0_14 = arith.constant 0 : index
    %c0_15 = arith.constant 0 : index
    %32 = vector.load %arg5[%c0_14, %c0_15] : memref<16x13xf32, #tpu.memory_space<vmem>>, vector<16x13xf32>
    tpu.vector_store %arg5[%c0_14, %c0_15], %31 {strides = array<i32>} : memref<16x13xf32, #tpu.memory_space<vmem>>, vector<16x13xf32>,
    return
  }
}

</mosaic_0001>

<bundles_post_ra>
// kernel: transformer_forward.15
= control target key start
LH: loop header
LB: loop body
LE: loop exit
PB: predicated region body
PF: predicated region fallthrough
CT: control target
= control target key end

     0   :  { %vm18_vm0 = vcmask 261120   ;;  %s55_s0 = inlined_call_operand.vmem [shape: f32[2,8,32], index: 0, kind: input, shape index: {}]   ;;  %s56_s1 = inlined_call_operand.vmem [shape: f32[1,8,32], index: 1, kind: input, shape index: {}]   ;;  %s57_s2 = inlined_call_operand.vmem [shape: f32[2,8,32], index: 2, kind: output, shape index: {}]  }
   0x1   :  { %v11_v0 = vld [vmem:[%s55_s0] sm:$0xff]  ;;  %v12_v2 = vld [vmem:[%s55_s0 + $0x8] sm:$0xff] }
   0x2   :  { %v15_v1 = vld [vmem:[%s56_s1] sm:$0xff]  ;;  %v13_v3 = vmul.f32 5.656854, %v11_v0  ;;  %v14_v4 = vmul.f32 5.656854, %v12_v2 }
   0x4   :  { %v16_v5 = vadd.f32 %v15_v1, %v13_v3  ;;  %v17_v6 = vadd.f32 %v15_v1, %v14_v4 }
   0x6   :  { %19 = vst.msk [vmem:[%s57_s2] sm:$0xff] %vm18_vm0, %v16_v5  ;;  %20 = vst.msk [vmem:[%s57_s2 + $0x8] sm:$0xff] %vm18_vm0, %v17_v6 }

// kernel: transformer_forward.20
= control target key start
LH: loop header
LB: loop body
LE: loop exit
PB: predicated region body
PF: predicated region fallthrough
CT: control target
= control target key end

     0   :  { %vm18_vm0 = vcmask 261120   ;;  %s137_s0 = inlined_call_operand.vmem [shape: f32[16,32], index: 0, kind: input, shape index: {}]   ;;  %s138_s1 = inlined_call_operand.vmem [shape: f32[1,32], index: 1, kind: input, shape index: {}]   ;;  %s139_s2 = inlined_call_operand.vmem [shape: f32[1,32], index: 2, kind: input, shape index: {}]   ;;  %s140_s3 = inlined_call_operand.vmem [shape: f32[16,32], index: 3, kind: output, shape index: {}]  }
   0x1   :  { %v14_v0 = vld [vmem:[%s137_s0] sm:$0xff]  ;;  %v15_v1 = vld [vmem:[%s137_s0 + $0x8] sm:$0xff] }
   0x2   :  { %v19_v2 = vsel %vm18_vm0, %v14_v0, 0.0  ;;  %v22_v3 = vsel %vm18_vm0, %v15_v1, 0.0  ;;  %v83_v30 = vld [vmem:[%s138_s1] ss:$0 sm:$0xff] }
   0x3   :  { %20 = vadd.xlane.f32.xlu0 %v19_v2  ;;  %v84_v33 = vld [vmem:[%s139_s2] ss:$0 sm:$0xff] }
   0x7   :  { %23 = vadd.xlane.f32.xlu0 %v22_v3 }
  0x90   :  { %v21_v4 = vpop.xlane.xlu0 %20 }
  0x91   :  { %v26_v5 = vmul.f32 0.03125, %v21_v4 }
  0x93   :  { %v28_v6 = vsub.f32 %v14_v0, %v26_v5 }
  0x94   :  { %v24_v7 = vpop.xlane.xlu0 %23 }
  0x95   :  { %v27_v8 = vmul.f32 0.03125, %v24_v7  ;;  %v30_v9 = vmul.f32 %v28_v6, %v28_v6  ;;  %v61_v31 = vmul.f32 %v83_v30, %v28_v6 }
  0x97   :  { %v29_v10 = vsub.f32 %v15_v1, %v27_v8  ;;  %v32_v11 = vsel %vm18_vm0, %v30_v9, 0.0 }
  0x98   :  { %33 = vadd.xlane.f32.xlu1 %v32_v11 }
  0x99   :  { %v31_v12 = vmul.f32 %v29_v10, %v29_v10  ;;  %v62_v35 = vmul.f32 %v83_v30, %v29_v10 }
  0x9b   :  { %v35_v13 = vsel %vm18_vm0, %v31_v12, 0.0 }
  0x9c   :  { %36 = vadd.xlane.f32.xlu1 %v35_v13 }
 0x125   :  { %v34_v14 = vpop.xlane.xlu1 %33 }
 0x126   :  { %v39_v15 = vmul.f32 0.032258064, %v34_v14 }
 0x128   :  { %85 = vrsqrt.f32 %v39_v15  ;;  %vm43_vm1 = vcmp.eq.f32.partialorder %v39_v15, inf  ;;  %v46_v20 = vand.u32 2147483648, %v39_v15  ;;  %vm45_vm2 = vcmp.eq.f32.partialorder %v39_v15, 0.0 }
 0x129   :  { %v37_v16 = vpop.xlane.xlu1 %36 }
 0x12a   :  { %v40_v17 = vmul.f32 0.032258064, %v37_v16 }
 0x12c   :  { %87 = vrsqrt.f32 %v40_v17  ;;  %vm50_vm3 = vcmp.eq.f32.partialorder %v40_v17, inf  ;;  %v53_v26 = vand.u32 2147483648, %v40_v17  ;;  %vm52_vm4 = vcmp.eq.f32.partialorder %v40_v17, 0.0 }
 0x132   :  { %v86_v18 = vpop.eup %85 }
 0x133   :  { %v42_v19 = vmul.f32 %v86_v18, %v39_v15 }
 0x135   :  { %v44_v21 = vsel %vm43_vm1, %v39_v15, %v42_v19 }
 0x136   :  { %v88_v22 = vpop.eup %87  ;;  %v47_v23 = vsel %vm45_vm2, %v46_v20, %v44_v21 }
 0x137   :  { %v63_v24 = vadd.f32 1e-06, %v47_v23  ;;  %v49_v25 = vmul.f32 %v88_v22, %v40_v17 }
 0x139   :  { %89 = vrcp.f32 %v63_v24  ;;  %v51_v27 = vsel %vm50_vm3, %v40_v17, %v49_v25 }
 0x13a   :  { %v54_v28 = vsel %vm52_vm4, %v53_v26, %v51_v27 }
 0x13b   :  { %v64_v29 = vadd.f32 1e-06, %v54_v28 }
 0x13d   :  { %91 = vrcp.f32 %v64_v29 }
 0x143   :  { %v90_v32 = vpop.eup %89 }
 0x144   :  { %v66_v34 = vmul.f32 %v90_v32, %v61_v31 }
 0x146   :  { %v75_v36 = vadd.f32 %v84_v33, %v66_v34 }
 0x147   :  { %v92_v37 = vpop.eup %91 }
 0x148   :  { %77 = vst.msk [vmem:[%s140_s3] sm:$0xff] %vm18_vm0, %v75_v36  ;;  %v68_v38 = vmul.f32 %v92_v37, %v62_v35 }
 0x14a   :  { %v76_v39 = vadd.f32 %v84_v33, %v68_v38 }
 0x14c   :  { %78 = vst.msk [vmem:[%s140_s3 + $0x8] sm:$0xff] %vm18_vm0, %v76_v39 }

// kernel: transformer_forward.16
= control target key start
LH: loop header
LB: loop body
LE: loop exit
PB: predicated region body
PF: predicated region fallthrough
CT: control target
= control target key end

     0   :  { %vm31_vm0 = vcmask 261120   ;;  %v1433_v14 = vmov 0.0   ;;  %vm1434_vm1 = vmmov 0   ;;  %vm147_vm6 = vcmask 64512   ;;  %s1438_s16 = smov 88   ;;  %s1439_s17 = smov 120   ;;  %s1717_s0 = inlined_call_operand.vmem [shape: f32[16,32], index: 0, kind: input, shape index: {}]   ;;  %s1718_s4 = inlined_call_operand.vmem [shape: f32[32,96], index: 4, kind: input, shape index: {}]   ;;  %s1719_s2 = inlined_call_operand.vmem [shape: f32[1,32], index: 2, kind: input, shape index: {}]   ;;  %s1720_s3 = inlined_call_operand.vmem [shape: f32[1,32], index: 3, kind: input, shape index: {}]   ;;  %s1721_s1 = inlined_call_operand.vmem [shape: f32[2,8], index: 1, kind: input, shape index: {}]   ;;  %s1722_s5 = inlined_call_operand.vmem [shape: f32[32,32], index: 5, kind: input, shape index: {}]   ;;  %s1723_s6 = inlined_call_operand.vmem [shape: f32[1,32], index: 6, kind: input, shape index: {}]   ;;  %s1724_s7 = inlined_call_operand.vmem [shape: f32[16,32], index: 7, kind: output, shape index: {}]  }
   0x1   :  { %v1493_v0 = vld [vmem:[%s1717_s0] sm:$0xff]  ;;  %v1498_v1 = vld [vmem:[%s1717_s0 + $0x8] sm:$0xff]  ;;  %1249 = vmatprep.subr.bf16.mxu0 %v1433_v14  ;;  %v92_v17 = vld [vmem:[%s1718_s4 + $0x10] sm:$0xff]  ;;  %1253 = vmatprep.mubr.msk.bf16.mxu0 %vm1434_vm1, %v1433_v14  ;;  %v1436_v58 = vmov 1966171168   ;;  %v257_v60 = vlaneseq  ;;  %vm313_vm9 = vcmask 1043456  }
   0x2   :  { %v32_v2 = vsel %vm31_vm0, %v1493_v0, 0.0  ;;  %v35_v3 = vsel %vm31_vm0, %v1498_v1, 0.0  ;;  %v90_v15 = vld [vmem:[%s1718_s4] sm:$0xff]  ;;  %v91_v16 = vld [vmem:[%s1718_s4 + $0x8] sm:$0xff]  ;;  %v93_v19 = vld [vmem:[%s1718_s4 + $0x18] sm:$0xff]  ;;  %1257 = vmatprep.subr.bf16.mxu1 %v1433_v14  ;;  %1259 = vmatprep.mubr.msk.bf16.mxu1 %vm1434_vm1, %v1433_v14  ;;  %v255_v59 = vunpack.c.l.s4 %v1436_v58  ;;  %s1440_s18 = smov 56  }
   0x3   :  { %33 = vadd.xlane.f32.xlu0 %v32_v2  ;;  %v95_v18 = vpack.c.bf16 %v91_v16, %v90_v15  ;;  %v96_v20 = vpack.c.bf16 %v93_v19, %v92_v17  ;;  %v1189_v37 = vld [vmem:[%s1719_s2] ss:$0 sm:$0xff]  ;;  %s1435_s2 = smov 96   ;;  %v258_v62 = vshrl.u32 %v257_v60, 7  ;;  %s1441_s19 = smov 80  }
   0x4   :  { %v1190_v43 = vld [vmem:[%s1720_s3] ss:$0 sm:$0xff]  ;;  %v256_v61 = vunpack.c.0.s8 %v255_v59  ;;  %s1442_s20 = smov 112   ;;  %s1443_s21 = smov 48  }
   0x5   :  { %1250 = vmatpush3.bf16.msra.mxu0 %v95_v18  ;;  %v1194_v63 = vld.sshfl [vmem:[%s1721_s1] sm:$0x11 pattern:$0x75316420]  ;;  %s1437_s1 = smov 64   ;;  %s1444_s22 = smov 72  }
   0x6   :  { %1251 = vmatprep.subr.bf16.mxu0 %v1433_v14  ;;  %v259_v2 = vsub.s32 %v256_v61, %v258_v62  ;;  %s1445_s23 = smov 104   ;;  %s1446_s24 = smov 40  }
   0x7   :  { %36 = vadd.xlane.f32.xlu0 %v35_v3  ;;  %v253_v3 = vcombine.high %v1194_v63, %v1194_v63  ;;  %s1447_s25 = smov 8   ;;  %s1448_s26 = smov 16  }
   0x8   :  { %s1449_s11 = smov 24  }
   0x9   :  { %1252 = vmatpush3.bf16.msra.mxu0 %v96_v20 }
   0xa   :  { %1263 = vmatprep.subr.bf16.mxu0 %v1433_v14 }
  0x90   :  { %v34_v4 = vpop.xlane.xlu0 %33 }
  0x91   :  { %v39_v5 = vmul.f32 0.03125, %v34_v4  ;;  %v260_v4 = vrot.slane %v1194_v63, %v259_v2 }
  0x93   :  { %v41_v6 = vsub.f32 %v1493_v0, %v39_v5  ;;  %v270_v5 = vsub.s32 0, %v258_v62 }
  0x94   :  { %v37_v7 = vpop.xlane.xlu0 %36 }
  0x95   :  { %v40_v8 = vmul.f32 0.03125, %v37_v7  ;;  %v43_v9 = vmul.f32 %v41_v6, %v41_v6  ;;  %v74_v39 = vmul.f32 %v1189_v37, %v41_v6  ;;  %v267_v6 = vrot.slane %v253_v3, %v259_v2 }
  0x96   :  { %v1558_v7 = vrot.slane %v260_v4, %v270_v5 }
  0x97   :  { %v42_v10 = vsub.f32 %v1498_v1, %v40_v8  ;;  %v45_v11 = vsel %vm31_vm0, %v43_v9, 0.0 }
  0x98   :  { %46 = vadd.xlane.f32.xlu1 %v45_v11  ;;  %v1560_v11 = vrot.slane %v267_v6, %v270_v5 }
  0x99   :  { %v44_v12 = vmul.f32 %v42_v10, %v42_v10  ;;  %v75_v40 = vmul.f32 %v1189_v37, %v42_v10 }
  0x9b   :  { %v48_v13 = vsel %vm31_vm0, %v44_v12, 0.0 }
  0x9c   :  { %49 = vadd.xlane.f32.xlu1 %v48_v13 }
 0x125   :  { %v47_v21 = vpop.xlane.xlu1 %46 }
 0x126   :  { %v52_v22 = vmul.f32 0.032258064, %v47_v21 }
 0x128   :  { %1393 = vrsqrt.f32 %v52_v22  ;;  %vm56_vm2 = vcmp.eq.f32.partialorder %v52_v22, inf  ;;  %v59_v27 = vand.u32 2147483648, %v52_v22  ;;  %vm58_vm3 = vcmp.eq.f32.partialorder %v52_v22, 0.0 }
 0x129   :  { %v50_v23 = vpop.xlane.xlu1 %49 }
 0x12a   :  { %v53_v24 = vmul.f32 0.032258064, %v50_v23 }
 0x12c   :  { %1395 = vrsqrt.f32 %v53_v24  ;;  %vm63_vm4 = vcmp.eq.f32.partialorder %v53_v24, inf  ;;  %v66_v33 = vand.u32 2147483648, %v53_v24  ;;  %vm65_vm5 = vcmp.eq.f32.partialorder %v53_v24, 0.0 }
 0x132   :  { %v1394_v25 = vpop.eup %1393 }
 0x133   :  { %v55_v26 = vmul.f32 %v1394_v25, %v52_v22 }
 0x135   :  { %v57_v28 = vsel %vm56_vm2, %v52_v22, %v55_v26  ;;  %vm1118_vm2 = vcmask 195584  }
 0x136   :  { %v1396_v29 = vpop.eup %1395  ;;  %v60_v30 = vsel %vm58_vm3, %v59_v27, %v57_v28 }
 0x137   :  { %v76_v31 = vadd.f32 1e-06, %v60_v30  ;;  %v62_v32 = vmul.f32 %v1396_v29, %v53_v24 }
 0x139   :  { %1397 = vrcp.f32 %v76_v31  ;;  %v64_v34 = vsel %vm63_vm4, %v53_v24, %v62_v32 }
 0x13a   :  { %v67_v35 = vsel %vm65_vm5, %v66_v33, %v64_v34 }
 0x13b   :  { %v77_v36 = vadd.f32 1e-06, %v67_v35 }
 0x13d   :  { %1399 = vrcp.f32 %v77_v36 }
 0x143   :  { %v1398_v38 = vpop.eup %1397 }
 0x144   :  { %v79_v41 = vmul.f32 %v1398_v38, %v74_v39 }
 0x146   :  { %v88_v45 = vadd.f32 %v1190_v43, %v79_v41 }
 0x147   :  { %v1400_v42 = vpop.eup %1399 }
 0x148   :  { %v81_v44 = vmul.f32 %v1400_v42, %v75_v40 }
 0x14a   :  { %v89_v46 = vadd.f32 %v1190_v43, %v81_v44 }
 0x14c   :  { %v94_v47 = vpack.c.bf16 %v89_v46, %v88_v45 }
 0x14e   :  { %1254 = vmatmul.mubr.msk.bf16.vlgmr.msra.gmra.mrb[0].mxu0 %vm31_vm0, %v94_v47 }
 0x14f   :  { %1265 = vmatprep.mubr.msk.bf16.mxu0 %vm1434_vm1, %v1433_v14 }
 0x221   :  { %v134_v48 = vpop.f32.mrb[0].mxu0 }
 0x222   :  { %v1537_v49 = vpack.c.bf16 %v134_v48, %v134_v48  ;;  %v1255_v50 = vpop.f32.mrb[1].mxu0 }
 0x223   :  { %v137_v51 = vpop.f32.mrb[2].mxu0 }
 0x224   :  { %v1539_v52 = vpack.c.bf16 %v137_v51, %v137_v51  ;;  %145 = vrot.lane.b32.xlu0 %v1537_v49, %s1435_s2  ;;  %v1256_v53 = vpop.f32.mrb[3].mxu0 }
 0x226   :  { %195 = vrot.lane.b32.xlu1 %v1539_v52, %s1435_s2 }
 0x296   :  { %v146_v54 = vpop.permute.xlu0 %145 }
 0x297   :  { %v152_v55 = vsel %vm147_vm6, %v146_v54, 0 }
 0x298   :  { %1258 = vmatpush3.bf16.xpose.msra.mxu1 %v152_v55  ;;  %v196_v56 = vpop.permute.xlu1 %195 }
 0x299   :  { %v201_v57 = vsel %vm147_vm6, %v196_v56, 0  ;;  %1269 = vmatprep.subr.bf16.mxu1 %v1433_v14 }
 0x29a   :  { %1264 = vmatpush3.bf16.xpose.msra.mxu0 %v201_v57 }
 0x29b   :  { %1275 = vmatprep.subr.bf16.mxu0 %v1433_v14 }
 0x29f   :  { %1260 = vmatmul.mubr.msk.bf16.vlgmr.msra.gmra.mrb[0].mxu1 %vm147_vm6, %v1537_v49 }
 0x2a0   :  { %1271 = vmatprep.mubr.msk.bf16.mxu1 %vm1434_vm1, %v1433_v14 }
 0x2a1   :  { %1266 = vmatmul.mubr.msk.bf16.vlgmr.msra.gmra.mrb[4].mxu0 %vm147_vm6, %v1539_v52 }
 0x2a2   :  { %1277 = vmatprep.mubr.msk.bf16.mxu0 %vm1434_vm1, %v1433_v14 }
 0x372   :  { %v188_v8 = vpop.f32.mrb[0].mxu1 }
 0x373   :  { %v243_v9 = vmul.f32 0.35355338, %v188_v8  ;;  %v1261_v10 = vpop.f32.mrb[1].mxu1 }
 0x374   :  { %v191_v12 = vpop.f32.mrb[2].mxu1  ;;  %v237_v13 = vpop.f32.mrb[4].mxu0 }
 0x375   :  { %v278_v15 = vmul.f32 %v1558_v7, %v243_v9  ;;  %v244_v16 = vmul.f32 0.35355338, %v237_v13  ;;  %v1262_v17 = vpop.f32.mrb[3].mxu1  ;;  %v1267_v18 = vpop.f32.mrb[5].mxu0 }
 0x376   :  { %v240_v19 = vpop.f32.mrb[6].mxu0 }
 0x377   :  { %v279_v20 = vmul.f32 %v1560_v11, %v244_v16  ;;  %v1268_v21 = vpop.f32.mrb[7].mxu0  ;;  %vm280_vm7 = vcmp.eq.f32.partialorder %v278_v15, 0.0 }
 0x378   :  { %v282_v22 = vsel %vm280_vm7, -inf, %v278_v15 }
 0x379   :  { %v284_v23 = vsel %vm147_vm6, %v282_v22, -inf  ;;  %vm281_vm8 = vcmp.eq.f32.partialorder %v279_v20, 0.0 }
 0x37a   :  { %285 = vmax.xlane.f32.xlu1 %v284_v23  ;;  %v283_v24 = vsel %vm281_vm8, -inf, %v279_v20 }
 0x37b   :  { %v287_v25 = vsel %vm147_vm6, %v283_v24, -inf }
 0x37c   :  { %288 = vmax.xlane.f32.xlu0 %v287_v25 }
 0x38b   :  { %357 = vrot.lane.b32.xlu1 %v1539_v52, %s1437_s1 }
 0x38f   :  { %407 = vrot.lane.b32.xlu1 %v1537_v49, %s1438_s16 }
 0x407   :  { %v286_v26 = vpop.xlane.xlu1 %285 }
 0x408   :  { %v290_v27 = vsub.f32 %v282_v22, %v286_v26 }
 0x409   :  { %v289_v28 = vpop.xlane.xlu0 %288 }
 0x40a   :  { %v292_v29 = vmul.f32 1.442695, %v290_v27  ;;  %v291_v30 = vsub.f32 %v283_v24, %v289_v28 }
 0x40b   :  { %v358_v31 = vpop.permute.xlu1 %357 }
 0x40c   :  { %1401 = vpow2.f32 %v292_v29  ;;  %v294_v32 = vmul.f32 1.442695, %v291_v30  ;;  %v363_v33 = vsel %vm313_vm9, %v358_v31, 0 }
 0x40d   :  { %1276 = vmatpush3.bf16.msra.mxu0 %v363_v33 }
 0x40e   :  { %1403 = vpow2.f32 %v294_v32  ;;  %1287 = vmatprep.subr.bf16.mxu0 %v1433_v14 }
 0x40f   :  { %v408_v38 = vpop.permute.xlu1 %407 }
 0x410   :  { %v413_v50 = vsel %vm147_vm6, %v408_v38, 0 }
 0x416   :  { %v1402_v34 = vpop.eup %1401 }
 0x417   :  { %v296_v35 = vsel %vm147_vm6, %v1402_v34, 0.0 }
 0x418   :  { %v1404_v36 = vpop.eup %1403  ;;  %297 = vadd.xlane.f32.xlu0 %v296_v35 }
 0x419   :  { %v299_v37 = vsel %vm147_vm6, %v1404_v36, 0.0 }
 0x41a   :  { %300 = vadd.xlane.f32.xlu1 %v299_v37 }
 0x42b   :  { %457 = vrot.lane.b32.xlu1 %v1539_v52, %s1438_s16 }
 0x42e   :  { %308 = vrot.lane.b32.xlu0 %v1537_v49, %s1437_s1 }
 0x42f   :  { %455 = vrot.lane.b32.xlu1 %v1539_v52, %s1439_s17 }
 0x432   :  { %405 = vrot.lane.b32.xlu0 %v1537_v49, %s1439_s17 }
 0x4a5   :  { %v298_v39 = vpop.xlane.xlu0 %297 }
 0x4a6   :  { %1405 = vrcp.f32 %v298_v39 }
 0x4a7   :  { %v301_v40 = vpop.xlane.xlu1 %300 }
 0x4a8   :  { %1407 = vrcp.f32 %v301_v40 }
 0x4a9   :  { %v309_v41 = vpop.permute.xlu0 %308 }
 0x4aa   :  { %v315_v42 = vsel %vm313_vm9, %v309_v41, 0 }
 0x4ab   :  { %1270 = vmatpush3.bf16.msra.mxu1 %v315_v42  ;;  %v458_v48 = vpop.permute.xlu1 %457 }
 0x4ac   :  { %1281 = vmatprep.subr.bf16.mxu1 %v1433_v14  ;;  %v463_v53 = vsel %vm147_vm6, %v458_v48, 0 }
 0x4ad   :  { %v406_v54 = vpop.permute.xlu0 %405 }
 0x4af   :  { %v456_v55 = vpop.permute.xlu1 %455 }
 0x4b0   :  { %v1406_v43 = vpop.eup %1405 }
 0x4b1   :  { %v304_v44 = vmul.f32 %v1406_v43, %v1402_v34 }
 0x4b2   :  { %v1408_v45 = vpop.eup %1407 }
 0x4b3   :  { %v305_v46 = vmul.f32 %v1408_v45, %v1404_v36  ;;  %v306_v47 = vpack.c.bf16 %v304_v44, %v304_v44 }
 0x4b5   :  { %1272 = vmatmul.mubr.msk.bf16.vlgmr.msra.gmra.mrb[4].mxu1 %vm147_vm6, %v306_v47  ;;  %v307_v51 = vpack.c.bf16 %v305_v46, %v305_v46 }
 0x4b6   :  { %1282 = vmatpush3.bf16.xpose.msra.mxu1 %v413_v50  ;;  %1283 = vmatprep.mubr.msk.bf16.mxu1 %vm1434_vm1, %v1433_v14 }
 0x4b7   :  { %1278 = vmatmul.mubr.msk.bf16.vlgmr.msra.gmra.mrb[8].mxu0 %vm147_vm6, %v307_v51  ;;  %1293 = vmatprep.subr.bf16.mxu1 %v1433_v14 }
 0x4b8   :  { %1288 = vmatpush3.bf16.xpose.msra.mxu0 %v463_v53  ;;  %1289 = vmatprep.mubr.msk.bf16.mxu0 %vm1434_vm1, %v1433_v14 }
 0x4b9   :  { %1299 = vmatprep.subr.bf16.mxu0 %v1433_v14 }
 0x4bd   :  { %1284 = vmatmul.mubr.msk.bf16.vlgmr.msra.gmra.mrb[8].mxu1 %vm147_vm6, %v406_v54 }
 0x4be   :  { %1295 = vmatprep.mubr.msk.bf16.mxu1 %vm1434_vm1, %v1433_v14 }
 0x4bf   :  { %1290 = vmatmul.mubr.msk.bf16.vlgmr.msra.gmra.mrb[12].mxu0 %vm147_vm6, %v456_v55 }
 0x4c0   :  { %1301 = vmatprep.mubr.msk.bf16.mxu0 %vm1434_vm1, %v1433_v14 }
 0x588   :  { %v1594_v56 = vpop.f32.mrb[4].mxu1 }
 0x589   :  { %v1273_v57 = vpop.f32.mrb[5].mxu1 }
 0x58a   :  { %v354_v58 = vpop.f32.mrb[6].mxu1  ;;  %v1596_v59 = vpop.f32.mrb[8].mxu0 }
 0x58b   :  { %v1274_v60 = vpop.f32.mrb[7].mxu1  ;;  %v1279_v61 = vpop.f32.mrb[9].mxu0 }
 0x58c   :  { %v402_v62 = vpop.f32.mrb[10].mxu0 }
 0x58d   :  { %v1280_v63 = vpop.f32.mrb[11].mxu0 }
 0x590   :  { %v449_v2 = vpop.f32.mrb[8].mxu1 }
 0x591   :  { %v505_v3 = vmul.f32 0.35355338, %v449_v2  ;;  %v1285_v4 = vpop.f32.mrb[9].mxu1 }
 0x592   :  { %v452_v5 = vpop.f32.mrb[10].mxu1  ;;  %v499_v6 = vpop.f32.mrb[12].mxu0 }
 0x593   :  { %v507_v8 = vmul.f32 %v505_v3, %v1558_v7  ;;  %v506_v9 = vmul.f32 0.35355338, %v499_v6  ;;  %v1286_v10 = vpop.f32.mrb[11].mxu1  ;;  %v1291_v12 = vpop.f32.mrb[13].mxu0 }
 0x594   :  { %v502_v13 = vpop.f32.mrb[14].mxu0 }
 0x595   :  { %v508_v15 = vmul.f32 %v506_v9, %v1560_v11  ;;  %v1292_v16 = vpop.f32.mrb[15].mxu0  ;;  %vm509_vm10 = vcmp.eq.f32.partialorder %v507_v8, 0.0 }
 0x596   :  { %v511_v17 = vsel %vm509_vm10, -inf, %v507_v8 }
 0x597   :  { %v513_v18 = vsel %vm147_vm6, %v511_v17, -inf  ;;  %vm510_vm11 = vcmp.eq.f32.partialorder %v508_v15, 0.0 }
 0x598   :  { %514 = vmax.xlane.f32.xlu0 %v513_v18  ;;  %v512_v19 = vsel %vm510_vm11, -inf, %v508_v15 }
 0x599   :  { %v516_v20 = vsel %vm147_vm6, %v512_v19, -inf }
 0x59a   :  { %517 = vmax.xlane.f32.xlu1 %v516_v20 }
 0x5ab   :  { %585 = vrot.lane.b32.xlu1 %v1539_v52, %s1440_s18 }
 0x5af   :  { %635 = vrot.lane.b32.xlu1 %v1537_v49, %s1441_s19 }
 0x5b3   :  { %685 = vrot.lane.b32.xlu1 %v1539_v52, %s1441_s19 }
 0x5b7   :  { %683 = vrot.lane.b32.xlu1 %v1539_v52, %s1442_s20 }
 0x625   :  { %v515_v21 = vpop.xlane.xlu0 %514 }
 0x626   :  { %v519_v22 = vsub.f32 %v511_v17, %v515_v21 }
 0x627   :  { %v518_v23 = vpop.xlane.xlu1 %517 }
 0x628   :  { %v521_v24 = vmul.f32 1.442695, %v519_v22  ;;  %v520_v25 = vsub.f32 %v512_v19, %v518_v23 }
 0x62a   :  { %1409 = vpow2.f32 %v521_v24  ;;  %v523_v26 = vmul.f32 1.442695, %v520_v25 }
 0x62b   :  { %v586_v27 = vpop.permute.xlu1 %585 }
 0x62c   :  { %1411 = vpow2.f32 %v523_v26  ;;  %v591_v28 = vsel %vm313_vm9, %v586_v27, 0 }
 0x62d   :  { %1300 = vmatpush3.bf16.msra.mxu0 %v591_v28 }
 0x62e   :  { %1311 = vmatprep.subr.bf16.mxu0 %v1433_v14 }
 0x62f   :  { %v636_v38 = vpop.permute.xlu1 %635 }
 0x630   :  { %v641_v44 = vsel %vm147_vm6, %v636_v38, 0 }
 0x633   :  { %v686_v43 = vpop.permute.xlu1 %685 }
 0x634   :  { %v1410_v29 = vpop.eup %1409  ;;  %v691_v46 = vsel %vm147_vm6, %v686_v43, 0 }
 0x635   :  { %v525_v30 = vsel %vm147_vm6, %v1410_v29, 0.0 }
 0x636   :  { %v1412_v31 = vpop.eup %1411  ;;  %526 = vadd.xlane.f32.xlu0 %v525_v30 }
 0x637   :  { %v528_v32 = vsel %vm147_vm6, %v1412_v31, 0.0  ;;  %v684_v48 = vpop.permute.xlu1 %683 }
 0x63a   :  { %529 = vadd.xlane.f32.xlu0 %v528_v32 }
 0x650   :  { %537 = vrot.lane.b32.xlu0 %v1537_v49, %s1440_s18 }
 0x654   :  { %633 = vrot.lane.b32.xlu0 %v1537_v49, %s1442_s20 }
 0x6c3   :  { %v527_v33 = vpop.xlane.xlu0 %526 }
 0x6c4   :  { %1413 = vrcp.f32 %v527_v33 }
 0x6c7   :  { %v530_v34 = vpop.xlane.xlu0 %529 }
 0x6c8   :  { %1415 = vrcp.f32 %v530_v34 }
 0x6cb   :  { %v538_v35 = vpop.permute.xlu0 %537 }
 0x6cc   :  { %v543_v36 = vsel %vm313_vm9, %v538_v35, 0 }
 0x6cd   :  { %1294 = vmatpush3.bf16.msra.mxu1 %v543_v36 }
 0x6ce   :  { %v1414_v37 = vpop.eup %1413  ;;  %1305 = vmatprep.subr.bf16.mxu1 %v1433_v14 }
 0x6cf   :  { %v533_v39 = vmul.f32 %v1414_v37, %v1410_v29  ;;  %v634_v47 = vpop.permute.xlu0 %633 }
 0x6d1   :  { %v535_v40 = vpack.c.bf16 %v533_v39, %v533_v39 }
 0x6d2   :  { %v1416_v41 = vpop.eup %1415 }
 0x6d3   :  { %v534_v42 = vmul.f32 %v1416_v41, %v1412_v31  ;;  %1296 = vmatmul.mubr.msk.bf16.vlgmr.msra.gmra.mrb[12].mxu1 %vm147_vm6, %v535_v40 }
 0x6d4   :  { %1307 = vmatprep.mubr.msk.bf16.mxu1 %vm1434_vm1, %v1433_v14 }
 0x6d5   :  { %v536_v45 = vpack.c.bf16 %v534_v42, %v534_v42 }
 0x6d6   :  { %1306 = vmatpush3.bf16.xpose.msra.mxu1 %v641_v44 }
 0x6d7   :  { %1302 = vmatmul.mubr.msk.bf16.vlgmr.msra.gmra.mrb[16].mxu0 %vm147_vm6, %v536_v45  ;;  %1317 = vmatprep.subr.bf16.mxu1 %v1433_v14 }
 0x6d8   :  { %1312 = vmatpush3.bf16.xpose.msra.mxu0 %v691_v46  ;;  %1313 = vmatprep.mubr.msk.bf16.mxu0 %vm1434_vm1, %v1433_v14 }
 0x6d9   :  { %1323 = vmatprep.subr.bf16.mxu0 %v1433_v14 }
 0x6dd   :  { %1308 = vmatmul.mubr.msk.bf16.vlgmr.msra.gmra.mrb[16].mxu1 %vm147_vm6, %v634_v47 }
 0x6de   :  { %1319 = vmatprep.mubr.msk.bf16.mxu1 %vm1434_vm1, %v1433_v14 }
 0x6df   :  { %1314 = vmatmul.mubr.msk.bf16.vlgmr.msra.gmra.mrb[20].mxu0 %vm147_vm6, %v684_v48 }
 0x6e0   :  { %1325 = vmatprep.mubr.msk.bf16.mxu0 %vm1434_vm1, %v1433_v14 }
 0x7a6   :  { %v1630_v50 = vpop.f32.mrb[12].mxu1 }
 0x7a7   :  { %v1297_v51 = vpop.f32.mrb[13].mxu1 }
 0x7a8   :  { %v582_v53 = vpop.f32.mrb[14].mxu1 }
 0x7a9   :  { %v1298_v54 = vpop.f32.mrb[15].mxu1 }
 0x7aa   :  { %v1632_v55 = vpop.f32.mrb[16].mxu0 }
 0x7ab   :  { %v1378_v57 = vpack.i.bf16 %v1632_v55, %v1630_v50  ;;  %v1303_v58 = vpop.f32.mrb[17].mxu0 }
 0x7ac   :  { %v630_v60 = vpop.f32.mrb[18].mxu0 }
 0x7ad   :  { %v1304_v61 = vpop.f32.mrb[19].mxu0 }
 0x7b0   :  { %v677_v62 = vpop.f32.mrb[16].mxu1 }
 0x7b1   :  { %v733_v63 = vmul.f32 0.35355338, %v677_v62  ;;  %v1309_v2 = vpop.f32.mrb[17].mxu1 }
 0x7b2   :  { %v680_v3 = vpop.f32.mrb[18].mxu1  ;;  %v727_v4 = vpop.f32.mrb[20].mxu0 }
 0x7b3   :  { %v735_v5 = vmul.f32 %v733_v63, %v1558_v7  ;;  %v734_v6 = vmul.f32 0.35355338, %v727_v4  ;;  %v1310_v8 = vpop.f32.mrb[19].mxu1  ;;  %v1315_v9 = vpop.f32.mrb[21].mxu0 }
 0x7b4   :  { %v730_v10 = vpop.f32.mrb[22].mxu0 }
 0x7b5   :  { %v736_v12 = vmul.f32 %v734_v6, %v1560_v11  ;;  %v1316_v13 = vpop.f32.mrb[23].mxu0  ;;  %vm737_vm12 = vcmp.eq.f32.partialorder %v735_v5, 0.0 }
 0x7b6   :  { %v739_v15 = vsel %vm737_vm12, -inf, %v735_v5 }
 0x7b7   :  { %v741_v16 = vsel %vm147_vm6, %v739_v15, -inf  ;;  %vm738_vm13 = vcmp.eq.f32.partialorder %v736_v12, 0.0 }
 0x7b8   :  { %742 = vmax.xlane.f32.xlu0 %v741_v16  ;;  %v740_v17 = vsel %vm738_vm13, -inf, %v736_v12 }
 0x7b9   :  { %v744_v18 = vsel %vm147_vm6, %v740_v17, -inf }
 0x7ba   :  { %745 = vmax.xlane.f32.xlu1 %v744_v18 }
 0x7cb   :  { %813 = vrot.lane.b32.xlu1 %v1539_v52, %s1443_s21 }
 0x7cf   :  { %863 = vrot.lane.b32.xlu1 %v1537_v49, %s1444_s22 }
 0x7d3   :  { %913 = vrot.lane.b32.xlu1 %v1539_v52, %s1444_s22 }
 0x7d7   :  { %911 = vrot.lane.b32.xlu1 %v1539_v52, %s1445_s23 }
 0x845   :  { %v743_v19 = vpop.xlane.xlu0 %742 }
 0x846   :  { %v747_v20 = vsub.f32 %v739_v15, %v743_v19 }
 0x847   :  { %v746_v21 = vpop.xlane.xlu1 %745 }
 0x848   :  { %v749_v22 = vmul.f32 1.442695, %v747_v20  ;;  %v748_v23 = vsub.f32 %v740_v17, %v746_v21 }
 0x84a   :  { %1417 = vpow2.f32 %v749_v22  ;;  %v751_v24 = vmul.f32 1.442695, %v748_v23 }
 0x84b   :  { %v814_v25 = vpop.permute.xlu1 %813 }
 0x84c   :  { %1419 = vpow2.f32 %v751_v24  ;;  %v819_v26 = vsel %vm313_vm9, %v814_v25, 0 }
 0x84d   :  { %1324 = vmatpush3.bf16.msra.mxu0 %v819_v26 }
 0x84e   :  { %1335 = vmatprep.subr.bf16.mxu0 %v1433_v14 }
 0x84f   :  { %v864_v36 = vpop.permute.xlu1 %863 }
 0x850   :  { %v869_v42 = vsel %vm147_vm6, %v864_v36, 0  ;;  %v1122_v36 = vld [vmem:[%s1722_s5 + $0x8] sm:$0xff] }
 0x853   :  { %v914_v41 = vpop.permute.xlu1 %913 }
 0x854   :  { %v1418_v27 = vpop.eup %1417  ;;  %v919_v44 = vsel %vm147_vm6, %v914_v41, 0 }
 0x855   :  { %v753_v28 = vsel %vm147_vm6, %v1418_v27, 0.0 }
 0x856   :  { %v1420_v29 = vpop.eup %1419  ;;  %754 = vadd.xlane.f32.xlu0 %v753_v28 }
 0x857   :  { %v756_v30 = vsel %vm147_vm6, %v1420_v29, 0.0  ;;  %v912_v46 = vpop.permute.xlu1 %911 }
 0x85a   :  { %757 = vadd.xlane.f32.xlu0 %v756_v30 }
 0x870   :  { %765 = vrot.lane.b32.xlu0 %v1537_v49, %s1443_s21 }
 0x874   :  { %861 = vrot.lane.b32.xlu0 %v1537_v49, %s1445_s23 }
 0x8e3   :  { %v755_v31 = vpop.xlane.xlu0 %754 }
 0x8e4   :  { %1421 = vrcp.f32 %v755_v31 }
 0x8e7   :  { %v758_v32 = vpop.xlane.xlu0 %757 }
 0x8e8   :  { %1423 = vrcp.f32 %v758_v32 }
 0x8eb   :  { %v766_v33 = vpop.permute.xlu0 %765 }
 0x8ec   :  { %v771_v34 = vsel %vm313_vm9, %v766_v33, 0 }
 0x8ed   :  { %1318 = vmatpush3.bf16.msra.mxu1 %v771_v34 }
 0x8ee   :  { %v1422_v35 = vpop.eup %1421  ;;  %1329 = vmatprep.subr.bf16.mxu1 %v1433_v14 }
 0x8ef   :  { %v761_v37 = vmul.f32 %v1422_v35, %v1418_v27  ;;  %v862_v45 = vpop.permute.xlu0 %861  ;;  %v1121_v35 = vld [vmem:[%s1722_s5] sm:$0xff] }
 0x8f1   :  { %v763_v38 = vpack.c.bf16 %v761_v37, %v761_v37  ;;  %v1126_v37 = vpack.c.bf16 %v1122_v36, %v1121_v35 }
 0x8f2   :  { %v1424_v39 = vpop.eup %1423 }
 0x8f3   :  { %v762_v40 = vmul.f32 %v1424_v39, %v1420_v29  ;;  %1320 = vmatmul.mubr.msk.bf16.vlgmr.msra.gmra.mrb[20].mxu1 %vm147_vm6, %v763_v38  ;;  %v1123_v38 = vld [vmem:[%s1722_s5 + $0x10] sm:$0xff]  ;;  %v1124_v39 = vld [vmem:[%s1722_s5 + $0x18] sm:$0xff] }
 0x8f4   :  { %1331 = vmatprep.mubr.msk.bf16.mxu1 %vm1434_vm1, %v1433_v14 }
 0x8f5   :  { %v764_v43 = vpack.c.bf16 %v762_v40, %v762_v40  ;;  %v1127_v40 = vpack.c.bf16 %v1124_v39, %v1123_v38 }
 0x8f6   :  { %1330 = vmatpush3.bf16.xpose.msra.mxu1 %v869_v42 }
 0x8f7   :  { %1326 = vmatmul.mubr.msk.bf16.vlgmr.msra.gmra.mrb[24].mxu0 %vm147_vm6, %v764_v43  ;;  %1341 = vmatprep.subr.bf16.mxu1 %v1433_v14 }
 0x8f8   :  { %1336 = vmatpush3.bf16.xpose.msra.mxu0 %v919_v44  ;;  %1337 = vmatprep.mubr.msk.bf16.mxu0 %vm1434_vm1, %v1433_v14 }
 0x8f9   :  { %1347 = vmatprep.subr.bf16.mxu0 %v1433_v14 }
 0x8fd   :  { %1332 = vmatmul.mubr.msk.bf16.vlgmr.msra.gmra.mrb[24].mxu1 %vm147_vm6, %v862_v45 }
 0x8fe   :  { %1343 = vmatprep.mubr.msk.bf16.mxu1 %vm1434_vm1, %v1433_v14 }
 0x8ff   :  { %1338 = vmatmul.mubr.msk.bf16.vlgmr.msra.gmra.mrb[28].mxu0 %vm147_vm6, %v912_v46 }
 0x900   :  { %1349 = vmatprep.mubr.msk.bf16.mxu0 %vm1434_vm1, %v1433_v14 }
 0x9c6   :  { %v807_v47 = vpop.f32.mrb[20].mxu1 }
 0x9c7   :  { %v1321_v48 = vpop.f32.mrb[21].mxu1 }
 0x9c8   :  { %v810_v51 = vpop.f32.mrb[22].mxu1 }
 0x9c9   :  { %v1322_v53 = vpop.f32.mrb[23].mxu1 }
 0x9ca   :  { %v855_v54 = vpop.f32.mrb[24].mxu0 }
 0x9cb   :  { %v1383_v58 = vpack.i.bf16 %v855_v54, %v807_v47  ;;  %v1327_v60 = vpop.f32.mrb[25].mxu0 }
 0x9cc   :  { %v858_v61 = vpop.f32.mrb[26].mxu0 }
 0x9cd   :  { %v1328_v62 = vpop.f32.mrb[27].mxu0 }
 0x9d0   :  { %v905_v63 = vpop.f32.mrb[24].mxu1 }
 0x9d1   :  { %v961_v2 = vmul.f32 0.35355338, %v905_v63  ;;  %v1333_v3 = vpop.f32.mrb[25].mxu1 }
 0x9d2   :  { %v908_v4 = vpop.f32.mrb[26].mxu1  ;;  %v955_v5 = vpop.f32.mrb[28].mxu0 }
 0x9d3   :  { %v963_v6 = vmul.f32 %v961_v2, %v1558_v7  ;;  %v962_v8 = vmul.f32 0.35355338, %v955_v5  ;;  %v1334_v9 = vpop.f32.mrb[27].mxu1  ;;  %v1339_v10 = vpop.f32.mrb[29].mxu0 }
 0x9d4   :  { %v958_v12 = vpop.f32.mrb[30].mxu0 }
 0x9d5   :  { %v964_v13 = vmul.f32 %v962_v8, %v1560_v11  ;;  %v1340_v15 = vpop.f32.mrb[31].mxu0  ;;  %vm965_vm14 = vcmp.eq.f32.partialorder %v963_v6, 0.0 }
 0x9d6   :  { %v967_v16 = vsel %vm965_vm14, -inf, %v963_v6 }
 0x9d7   :  { %v969_v17 = vsel %vm147_vm6, %v967_v16, -inf  ;;  %vm966_vm15 = vcmp.eq.f32.partialorder %v964_v13, 0.0 }
 0x9d8   :  { %970 = vmax.xlane.f32.xlu0 %v969_v17  ;;  %v968_v18 = vsel %vm966_vm15, -inf, %v964_v13  ;;  %v1210_v13 = vld [vmem:[%s1723_s6] ss:$0 sm:$0xff] }
 0x9d9   :  { %v972_v19 = vsel %vm147_vm6, %v968_v18, -inf }
 0x9da   :  { %973 = vmax.xlane.f32.xlu1 %v972_v19 }
 0x9eb   :  { %1041 = vrot.lane.b32.xlu1 %v1539_v52, %s1446_s24 }
 0x9ef   :  { %1379 = vrot.lane.b32.xlu1 %v1378_v57, %s1447_s25 }
 0x9f3   :  { %1384 = vrot.lane.b32.xlu1 %v1383_v58, %s1448_s26 }
 0xa65   :  { %v971_v7 = vpop.xlane.xlu0 %970 }
 0xa66   :  { %v975_v11 = vsub.f32 %v967_v16, %v971_v7 }
 0xa67   :  { %v974_v20 = vpop.xlane.xlu1 %973 }
 0xa68   :  { %v977_v21 = vmul.f32 1.442695, %v975_v11  ;;  %v976_v22 = vsub.f32 %v968_v18, %v974_v20 }
 0xa6a   :  { %1425 = vpow2.f32 %v977_v21  ;;  %v979_v23 = vmul.f32 1.442695, %v976_v22 }
 0xa6b   :  { %v1042_v24 = vpop.permute.xlu1 %1041 }
 0xa6c   :  { %1427 = vpow2.f32 %v979_v23  ;;  %v1047_v25 = vsel %vm313_vm9, %v1042_v24, 0 }
 0xa6d   :  { %1348 = vmatpush3.bf16.msra.mxu0 %v1047_v25 }
 0xa6f   :  { %v1380_v51 = vpop.permute.xlu1 %1379 }
 0xa70   :  { %v1382_v54 = vunpack.i.h.bf16 %v1380_v51  ;;  %v1381_v58 = vunpack.i.l.bf16 %v1380_v51 }
 0xa72   :  { %v1114_v63 = vsel %vm147_vm6, %v1596_v59, %v1382_v54  ;;  %v1113_v2 = vsel %vm147_vm6, %v1594_v56, %v1381_v58 }
 0xa73   :  { %v1385_v53 = vpop.permute.xlu1 %1384 }
 0xa74   :  { %v1426_v52 = vpop.eup %1425  ;;  %v1387_v60 = vunpack.i.h.bf16 %v1385_v53  ;;  %v1386_v61 = vunpack.i.l.bf16 %v1385_v53 }
 0xa75   :  { %v981_v26 = vsel %vm147_vm6, %v1426_v52, 0.0 }
 0xa76   :  { %v1428_v27 = vpop.eup %1427  ;;  %982 = vadd.xlane.f32.xlu0 %v981_v26 }
 0xa77   :  { %v984_v50 = vsel %vm147_vm6, %v1428_v27, 0.0 }
 0xa7a   :  { %985 = vadd.xlane.f32.xlu0 %v984_v50 }
 0xa90   :  { %993 = vrot.lane.b32.xlu0 %v1537_v49, %s1446_s24 }
 0xb03   :  { %v983_v55 = vpop.xlane.xlu0 %982 }
 0xb04   :  { %1429 = vrcp.f32 %v983_v55 }
 0xb07   :  { %v986_v57 = vpop.xlane.xlu0 %985 }
 0xb08   :  { %1431 = vrcp.f32 %v986_v57 }
 0xb0b   :  { %v994_v28 = vpop.permute.xlu0 %993 }
 0xb0c   :  { %v999_v29 = vsel %vm313_vm9, %v994_v28, 0 }
 0xb0d   :  { %1342 = vmatpush3.bf16.msra.mxu1 %v999_v29 }
 0xb0e   :  { %v1430_v30 = vpop.eup %1429  ;;  %1353 = vmatprep.subr.bf16.mxu1 %v1433_v14 }
 0xb0f   :  { %v989_v31 = vmul.f32 %v1430_v30, %v1426_v52 }
 0xb11   :  { %v991_v32 = vpack.c.bf16 %v989_v31, %v989_v31 }
 0xb12   :  { %v1432_v33 = vpop.eup %1431 }
 0xb13   :  { %v990_v34 = vmul.f32 %v1432_v33, %v1428_v27  ;;  %1344 = vmatmul.mubr.msk.bf16.vlgmr.msra.gmra.mrb[28].mxu1 %vm147_vm6, %v991_v32 }
 0xb14   :  { %1357 = vmatprep.mubr.msk.bf16.mxu1 %vm1434_vm1, %v1433_v14  ;;  %1354 = vmatpush3.bf16.msra.mxu1 %v1126_v37  ;;  %vm1115_vm1 = vcmask 130048  }
 0xb15   :  { %v992_v49 = vpack.c.bf16 %v990_v34, %v990_v34  ;;  %1355 = vmatprep.subr.bf16.mxu1 %v1433_v14  ;;  %v1116_v5 = vsel %vm1115_vm1, %v1113_v2, %v1386_v61  ;;  %v1117_v6 = vsel %vm1115_vm1, %v1114_v63, %v1387_v60 }
 0xb17   :  { %1350 = vmatmul.mubr.msk.bf16.vlgmr.msra.gmra.mrb[32].mxu0 %vm147_vm6, %v992_v49 }
 0xb18   :  { %1356 = vmatpush3.bf16.msra.mxu1 %v1127_v40 }
 0xbe6   :  { %v1035_v41 = vpop.f32.mrb[28].mxu1 }
 0xbe7   :  { %v1345_v42 = vpop.f32.mrb[29].mxu1 }
 0xbe8   :  { %v1038_v43 = vpop.f32.mrb[30].mxu1 }
 0xbe9   :  { %v1346_v44 = vpop.f32.mrb[31].mxu1 }
 0xbea   :  { %v1083_v45 = vpop.f32.mrb[32].mxu0 }
 0xbeb   :  { %v1388_v46 = vpack.i.bf16 %v1083_v45, %v1035_v41  ;;  %v1351_v47 = vpop.f32.mrb[33].mxu0 }
 0xbec   :  { %v1086_v48 = vpop.f32.mrb[34].mxu0 }
 0xbed   :  { %1389 = vrot.lane.b32.xlu0 %v1388_v46, %s1449_s11  ;;  %v1352_v14 = vpop.f32.mrb[35].mxu0 }
 0xc5f   :  { %v1390_v62 = vpop.permute.xlu0 %1389 }
 0xc60   :  { %v1392_v3 = vunpack.i.h.bf16 %v1390_v62  ;;  %v1391_v4 = vunpack.i.l.bf16 %v1390_v62 }
 0xc62   :  { %v1120_v8 = vsel %vm1118_vm2, %v1117_v6, %v1392_v3  ;;  %v1119_v9 = vsel %vm1118_vm2, %v1116_v5, %v1391_v4 }
 0xc63   :  { %v1125_v10 = vpack.c.bf16 %v1120_v8, %v1119_v9 }
 0xc65   :  { %1358 = vmatmul.mubr.msk.bf16.vlgmr.msra.gmra.mrb[32].mxu1 %vm31_vm0, %v1125_v10 }
 0xd38   :  { %v1165_v12 = vpop.f32.mrb[32].mxu1 }
 0xd39   :  { %v1172_v15 = vadd.f32 %v1165_v12, %v1493_v0  ;;  %v1359_v59 = vpop.f32.mrb[33].mxu1 }
 0xd3a   :  { %v1168_v16 = vpop.f32.mrb[34].mxu1 }
 0xd3b   :  { %v1181_v17 = vadd.f32 %v1210_v13, %v1172_v15  ;;  %v1173_v56 = vadd.f32 %v1168_v16, %v1498_v1  ;;  %v1360_v18 = vpop.f32.mrb[35].mxu1 }
 0xd3d   :  { %1183 = vst.msk [vmem:[%s1724_s7] sm:$0xff] %vm31_vm0, %v1181_v17  ;;  %v1182_v19 = vadd.f32 %v1210_v13, %v1173_v56 }
 0xd3f   :  { %1184 = vst.msk [vmem:[%s1724_s7 + $0x8] sm:$0xff] %vm31_vm0, %v1182_v19 }

// kernel: transformer_forward.21
= control target key start
LH: loop header
LB: loop body
LE: loop exit
PB: predicated region body
PF: predicated region fallthrough
CT: control target
= control target key end

     0   :  { %vm31_vm0 = vcmask 261120   ;;  %v1446_v14 = vmov 0.0   ;;  %vm1447_vm1 = vmmov 0   ;;  %vm147_vm6 = vcmask 64512   ;;  %s1451_s16 = smov 88   ;;  %s1452_s17 = smov 120   ;;  %s1750_s0 = inlined_call_operand.vmem [shape: f32[16,32], index: 0, kind: input, shape index: {}]   ;;  %s1751_s4 = inlined_call_operand.vmem [shape: f32[32,96], index: 4, kind: input, shape index: {}]   ;;  %s1752_s2 = inlined_call_operand.vmem [shape: f32[1,32], index: 2, kind: input, shape index: {}]   ;;  %s1753_s3 = inlined_call_operand.vmem [shape: f32[1,32], index: 3, kind: input, shape index: {}]   ;;  %s1754_s1 = inlined_call_operand.vmem [shape: f32[2,8], index: 1, kind: input, shape index: {}]   ;;  %s1755_s5 = inlined_call_operand.vmem [shape: f32[32,32], index: 5, kind: input, shape index: {}]   ;;  %s1756_s6 = inlined_call_operand.vmem [shape: f32[1,32], index: 6, kind: input, shape index: {}]   ;;  %s1757_s7 = inlined_call_operand.vmem [shape: f32[16,32], index: 7, kind: output, shape index: {}]  }
   0x1   :  { %v1506_v0 = vld [vmem:[%s1750_s0] sm:$0xff]  ;;  %v1511_v1 = vld [vmem:[%s1750_s0 + $0x8] sm:$0xff]  ;;  %1262 = vmatprep.subr.bf16.mxu0 %v1446_v14  ;;  %v92_v17 = vld [vmem:[%s1751_s4 + $0x10] sm:$0xff]  ;;  %1266 = vmatprep.mubr.msk.bf16.mxu0 %vm1447_vm1, %v1446_v14  ;;  %v1449_v58 = vmov 1966171168   ;;  %v257_v60 = vlaneseq  ;;  %vm320_vm10 = vcmask 1043456  }
   0x2   :  { %v32_v2 = vsel %vm31_vm0, %v1506_v0, 0.0  ;;  %v35_v3 = vsel %vm31_vm0, %v1511_v1, 0.0  ;;  %v90_v15 = vld [vmem:[%s1751_s4] sm:$0xff]  ;;  %v91_v16 = vld [vmem:[%s1751_s4 + $0x8] sm:$0xff]  ;;  %v93_v19 = vld [vmem:[%s1751_s4 + $0x18] sm:$0xff]  ;;  %1270 = vmatprep.subr.bf16.mxu1 %v1446_v14  ;;  %1272 = vmatprep.mubr.msk.bf16.mxu1 %vm1447_vm1, %v1446_v14  ;;  %v255_v59 = vunpack.c.l.s4 %v1449_v58  ;;  %s1453_s18 = smov 56  }
   0x3   :  { %33 = vadd.xlane.f32.xlu0 %v32_v2  ;;  %v95_v18 = vpack.c.bf16 %v91_v16, %v90_v15  ;;  %v96_v20 = vpack.c.bf16 %v93_v19, %v92_v17  ;;  %v1202_v37 = vld [vmem:[%s1752_s2] ss:$0 sm:$0xff]  ;;  %s1448_s2 = smov 96   ;;  %v258_v62 = vshrl.u32 %v257_v60, 7  ;;  %s1454_s19 = smov 80  }
   0x4   :  { %v1203_v43 = vld [vmem:[%s1753_s3] ss:$0 sm:$0xff]  ;;  %v256_v61 = vunpack.c.0.s8 %v255_v59  ;;  %s1455_s20 = smov 112   ;;  %s1456_s21 = smov 48  }
   0x5   :  { %1263 = vmatpush3.bf16.msra.mxu0 %v95_v18  ;;  %v1207_v63 = vld.sshfl [vmem:[%s1754_s1] sm:$0x11 pattern:$0x75316420]  ;;  %s1450_s1 = smov 64   ;;  %s1457_s22 = smov 72  }
   0x6   :  { %1264 = vmatprep.subr.bf16.mxu0 %v1446_v14  ;;  %v259_v2 = vsub.s32 %v256_v61, %v258_v62  ;;  %s1458_s23 = smov 104   ;;  %s1459_s24 = smov 40  }
   0x7   :  { %36 = vadd.xlane.f32.xlu0 %v35_v3  ;;  %v253_v3 = vcombine.high %v1207_v63, %v1207_v63  ;;  %s1460_s25 = smov 8   ;;  %s1461_s26 = smov 16  }
   0x8   :  { %s1462_s11 = smov 24  }
   0x9   :  { %1265 = vmatpush3.bf16.msra.mxu0 %v96_v20 }
   0xa   :  { %1276 = vmatprep.subr.bf16.mxu0 %v1446_v14 }
  0x90   :  { %v34_v4 = vpop.xlane.xlu0 %33 }
  0x91   :  { %v39_v5 = vmul.f32 0.03125, %v34_v4  ;;  %v260_v4 = vrot.slane %v1207_v63, %v259_v2 }
  0x93   :  { %v41_v6 = vsub.f32 %v1506_v0, %v39_v5  ;;  %v270_v5 = vsub.s32 0, %v258_v62 }
  0x94   :  { %v37_v7 = vpop.xlane.xlu0 %36 }
  0x95   :  { %v40_v8 = vmul.f32 0.03125, %v37_v7  ;;  %v43_v9 = vmul.f32 %v41_v6, %v41_v6  ;;  %v74_v39 = vmul.f32 %v1202_v37, %v41_v6  ;;  %v267_v6 = vrot.slane %v253_v3, %v259_v2 }
  0x96   :  { %v283_v7 = vand.u32 127, %v257_v60 }
  0x97   :  { %v42_v10 = vsub.f32 %v1511_v1, %v40_v8  ;;  %v45_v11 = vsel %vm31_vm0, %v43_v9, 0.0  ;;  %v1571_v8 = vrot.slane %v260_v4, %v270_v5 }
  0x98   :  { %46 = vadd.xlane.f32.xlu1 %v45_v11  ;;  %vm1575_vm7 = vcmp.ge.s32.totalorder %v258_v62, %v283_v7 }
  0x99   :  { %v44_v12 = vmul.f32 %v42_v10, %v42_v10  ;;  %v75_v40 = vmul.f32 %v1202_v37, %v42_v10 }
  0x9b   :  { %v48_v13 = vsel %vm31_vm0, %v44_v12, 0.0  ;;  %v1573_v12 = vrot.slane %v267_v6, %v270_v5 }
  0x9c   :  { %49 = vadd.xlane.f32.xlu1 %v48_v13 }
 0x125   :  { %v47_v21 = vpop.xlane.xlu1 %46 }
 0x126   :  { %v52_v22 = vmul.f32 0.032258064, %v47_v21 }
 0x128   :  { %1406 = vrsqrt.f32 %v52_v22  ;;  %vm56_vm2 = vcmp.eq.f32.partialorder %v52_v22, inf  ;;  %v59_v27 = vand.u32 2147483648, %v52_v22  ;;  %vm58_vm3 = vcmp.eq.f32.partialorder %v52_v22, 0.0 }
 0x129   :  { %v50_v23 = vpop.xlane.xlu1 %49 }
 0x12a   :  { %v53_v24 = vmul.f32 0.032258064, %v50_v23 }
 0x12c   :  { %1408 = vrsqrt.f32 %v53_v24  ;;  %vm63_vm4 = vcmp.eq.f32.partialorder %v53_v24, inf  ;;  %v66_v33 = vand.u32 2147483648, %v53_v24  ;;  %vm65_vm5 = vcmp.eq.f32.partialorder %v53_v24, 0.0 }
 0x132   :  { %v1407_v25 = vpop.eup %1406 }
 0x133   :  { %v55_v26 = vmul.f32 %v1407_v25, %v52_v22 }
 0x135   :  { %v57_v28 = vsel %vm56_vm2, %v52_v22, %v55_v26 }
 0x136   :  { %v1409_v29 = vpop.eup %1408  ;;  %v60_v30 = vsel %vm58_vm3, %v59_v27, %v57_v28  ;;  %vm1131_vm3 = vcmask 195584  }
 0x137   :  { %v76_v31 = vadd.f32 1e-06, %v60_v30  ;;  %v62_v32 = vmul.f32 %v1409_v29, %v53_v24 }
 0x139   :  { %1410 = vrcp.f32 %v76_v31  ;;  %v64_v34 = vsel %vm63_vm4, %v53_v24, %v62_v32 }
 0x13a   :  { %v67_v35 = vsel %vm65_vm5, %v66_v33, %v64_v34 }
 0x13b   :  { %v77_v36 = vadd.f32 1e-06, %v67_v35 }
 0x13d   :  { %1412 = vrcp.f32 %v77_v36 }
 0x143   :  { %v1411_v38 = vpop.eup %1410 }
 0x144   :  { %v79_v41 = vmul.f32 %v1411_v38, %v74_v39 }
 0x146   :  { %v88_v45 = vadd.f32 %v1203_v43, %v79_v41 }
 0x147   :  { %v1413_v42 = vpop.eup %1412 }
 0x148   :  { %v81_v44 = vmul.f32 %v1413_v42, %v75_v40 }
 0x14a   :  { %v89_v46 = vadd.f32 %v1203_v43, %v81_v44 }
 0x14c   :  { %v94_v47 = vpack.c.bf16 %v89_v46, %v88_v45 }
 0x14e   :  { %1267 = vmatmul.mubr.msk.bf16.vlgmr.msra.gmra.mrb[0].mxu0 %vm31_vm0, %v94_v47 }
 0x14f   :  { %1278 = vmatprep.mubr.msk.bf16.mxu0 %vm1447_vm1, %v1446_v14 }
 0x221   :  { %v134_v48 = vpop.f32.mrb[0].mxu0 }
 0x222   :  { %v1550_v49 = vpack.c.bf16 %v134_v48, %v134_v48  ;;  %v1268_v50 = vpop.f32.mrb[1].mxu0 }
 0x223   :  { %v137_v51 = vpop.f32.mrb[2].mxu0 }
 0x224   :  { %v1552_v52 = vpack.c.bf16 %v137_v51, %v137_v51  ;;  %145 = vrot.lane.b32.xlu0 %v1550_v49, %s1448_s2  ;;  %v1269_v53 = vpop.f32.mrb[3].mxu0 }
 0x226   :  { %195 = vrot.lane.b32.xlu1 %v1552_v52, %s1448_s2 }
 0x296   :  { %v146_v54 = vpop.permute.xlu0 %145 }
 0x297   :  { %v152_v55 = vsel %vm147_vm6, %v146_v54, 0 }
 0x298   :  { %1271 = vmatpush3.bf16.xpose.msra.mxu1 %v152_v55  ;;  %v196_v56 = vpop.permute.xlu1 %195 }
 0x299   :  { %v201_v57 = vsel %vm147_vm6, %v196_v56, 0  ;;  %1282 = vmatprep.subr.bf16.mxu1 %v1446_v14 }
 0x29a   :  { %1277 = vmatpush3.bf16.xpose.msra.mxu0 %v201_v57 }
 0x29b   :  { %1288 = vmatprep.subr.bf16.mxu0 %v1446_v14 }
 0x29f   :  { %1273 = vmatmul.mubr.msk.bf16.vlgmr.msra.gmra.mrb[0].mxu1 %vm147_vm6, %v1550_v49 }
 0x2a0   :  { %1284 = vmatprep.mubr.msk.bf16.mxu1 %vm1447_vm1, %v1446_v14 }
 0x2a1   :  { %1279 = vmatmul.mubr.msk.bf16.vlgmr.msra.gmra.mrb[4].mxu0 %vm147_vm6, %v1552_v52 }
 0x2a2   :  { %1290 = vmatprep.mubr.msk.bf16.mxu0 %vm1447_vm1, %v1446_v14 }
 0x372   :  { %v188_v9 = vpop.f32.mrb[0].mxu1 }
 0x373   :  { %v243_v10 = vmul.f32 0.35355338, %v188_v9  ;;  %v1274_v11 = vpop.f32.mrb[1].mxu1 }
 0x374   :  { %v191_v13 = vpop.f32.mrb[2].mxu1  ;;  %v237_v15 = vpop.f32.mrb[4].mxu0 }
 0x375   :  { %v278_v17 = vmul.f32 %v1571_v8, %v243_v10  ;;  %v244_v18 = vmul.f32 0.35355338, %v237_v15  ;;  %v1275_v19 = vpop.f32.mrb[3].mxu1  ;;  %v1280_v20 = vpop.f32.mrb[5].mxu0 }
 0x376   :  { %v240_v21 = vpop.f32.mrb[6].mxu0 }
 0x377   :  { %v279_v22 = vmul.f32 %v1573_v12, %v244_v18  ;;  %v1281_v23 = vpop.f32.mrb[7].mxu0  ;;  %v285_v24 = vsel %vm1575_vm7, %v278_v17, 0.0 }
 0x378   :  { %vm287_vm8 = vcmp.eq.f32.partialorder %v285_v24, 0.0 }
 0x379   :  { %v289_v25 = vsel %vm287_vm8, -inf, %v285_v24  ;;  %v286_v26 = vsel %vm1575_vm7, %v279_v22, 0.0 }
 0x37a   :  { %v291_v27 = vsel %vm147_vm6, %v289_v25, -inf  ;;  %vm288_vm9 = vcmp.eq.f32.partialorder %v286_v26, 0.0 }
 0x37b   :  { %292 = vmax.xlane.f32.xlu1 %v291_v27  ;;  %v290_v28 = vsel %vm288_vm9, -inf, %v286_v26 }
 0x37c   :  { %v294_v29 = vsel %vm147_vm6, %v290_v28, -inf }
 0x37d   :  { %295 = vmax.xlane.f32.xlu0 %v294_v29 }
 0x38c   :  { %364 = vrot.lane.b32.xlu1 %v1552_v52, %s1450_s1 }
 0x390   :  { %414 = vrot.lane.b32.xlu1 %v1550_v49, %s1451_s16 }
 0x408   :  { %v293_v30 = vpop.xlane.xlu1 %292 }
 0x409   :  { %v297_v31 = vsub.f32 %v289_v25, %v293_v30 }
 0x40a   :  { %v296_v32 = vpop.xlane.xlu0 %295 }
 0x40b   :  { %v299_v33 = vmul.f32 1.442695, %v297_v31  ;;  %v298_v34 = vsub.f32 %v290_v28, %v296_v32 }
 0x40c   :  { %v365_v35 = vpop.permute.xlu1 %364 }
 0x40d   :  { %1414 = vpow2.f32 %v299_v33  ;;  %v301_v36 = vmul.f32 1.442695, %v298_v34  ;;  %v370_v37 = vsel %vm320_vm10, %v365_v35, 0 }
 0x40e   :  { %1289 = vmatpush3.bf16.msra.mxu0 %v370_v37 }
 0x40f   :  { %1416 = vpow2.f32 %v301_v36  ;;  %1300 = vmatprep.subr.bf16.mxu0 %v1446_v14 }
 0x410   :  { %v415_v42 = vpop.permute.xlu1 %414 }
 0x411   :  { %v420_v55 = vsel %vm147_vm6, %v415_v42, 0 }
 0x417   :  { %v1415_v38 = vpop.eup %1414 }
 0x418   :  { %v303_v39 = vsel %vm147_vm6, %v1415_v38, 0.0 }
 0x419   :  { %v1417_v40 = vpop.eup %1416  ;;  %304 = vadd.xlane.f32.xlu0 %v303_v39 }
 0x41a   :  { %v306_v41 = vsel %vm147_vm6, %v1417_v40, 0.0 }
 0x41b   :  { %307 = vadd.xlane.f32.xlu1 %v306_v41 }
 0x42c   :  { %464 = vrot.lane.b32.xlu1 %v1552_v52, %s1451_s16 }
 0x42f   :  { %315 = vrot.lane.b32.xlu0 %v1550_v49, %s1450_s1 }
 0x430   :  { %462 = vrot.lane.b32.xlu1 %v1552_v52, %s1452_s17 }
 0x433   :  { %412 = vrot.lane.b32.xlu0 %v1550_v49, %s1452_s17 }
 0x4a6   :  { %v305_v43 = vpop.xlane.xlu0 %304 }
 0x4a7   :  { %1418 = vrcp.f32 %v305_v43 }
 0x4a8   :  { %v308_v44 = vpop.xlane.xlu1 %307 }
 0x4a9   :  { %1420 = vrcp.f32 %v308_v44 }
 0x4aa   :  { %v316_v45 = vpop.permute.xlu0 %315 }
 0x4ab   :  { %v322_v46 = vsel %vm320_vm10, %v316_v45, 0 }
 0x4ac   :  { %1283 = vmatpush3.bf16.msra.mxu1 %v322_v46  ;;  %v465_v54 = vpop.permute.xlu1 %464 }
 0x4ad   :  { %1294 = vmatprep.subr.bf16.mxu1 %v1446_v14  ;;  %v470_v57 = vsel %vm147_vm6, %v465_v54, 0 }
 0x4ae   :  { %v413_v58 = vpop.permute.xlu0 %412 }
 0x4b0   :  { %v463_v59 = vpop.permute.xlu1 %462 }
 0x4b1   :  { %v1419_v47 = vpop.eup %1418 }
 0x4b2   :  { %v311_v48 = vmul.f32 %v1419_v47, %v1415_v38 }
 0x4b3   :  { %v1421_v50 = vpop.eup %1420 }
 0x4b4   :  { %v312_v51 = vmul.f32 %v1421_v50, %v1417_v40  ;;  %v313_v53 = vpack.c.bf16 %v311_v48, %v311_v48 }
 0x4b6   :  { %1285 = vmatmul.mubr.msk.bf16.vlgmr.msra.gmra.mrb[4].mxu1 %vm147_vm6, %v313_v53  ;;  %v314_v56 = vpack.c.bf16 %v312_v51, %v312_v51 }
 0x4b7   :  { %1295 = vmatpush3.bf16.xpose.msra.mxu1 %v420_v55  ;;  %1296 = vmatprep.mubr.msk.bf16.mxu1 %vm1447_vm1, %v1446_v14 }
 0x4b8   :  { %1291 = vmatmul.mubr.msk.bf16.vlgmr.msra.gmra.mrb[8].mxu0 %vm147_vm6, %v314_v56  ;;  %1306 = vmatprep.subr.bf16.mxu1 %v1446_v14 }
 0x4b9   :  { %1301 = vmatpush3.bf16.xpose.msra.mxu0 %v470_v57  ;;  %1302 = vmatprep.mubr.msk.bf16.mxu0 %vm1447_vm1, %v1446_v14 }
 0x4ba   :  { %1312 = vmatprep.subr.bf16.mxu0 %v1446_v14 }
 0x4be   :  { %1297 = vmatmul.mubr.msk.bf16.vlgmr.msra.gmra.mrb[8].mxu1 %vm147_vm6, %v413_v58 }
 0x4bf   :  { %1308 = vmatprep.mubr.msk.bf16.mxu1 %vm1447_vm1, %v1446_v14 }
 0x4c0   :  { %1303 = vmatmul.mubr.msk.bf16.vlgmr.msra.gmra.mrb[12].mxu0 %vm147_vm6, %v463_v59 }
 0x4c1   :  { %1314 = vmatprep.mubr.msk.bf16.mxu0 %vm1447_vm1, %v1446_v14 }
 0x589   :  { %v1615_v60 = vpop.f32.mrb[4].mxu1 }
 0x58a   :  { %v1286_v61 = vpop.f32.mrb[5].mxu1 }
 0x58b   :  { %v361_v62 = vpop.f32.mrb[6].mxu1  ;;  %v1617_v63 = vpop.f32.mrb[8].mxu0 }
 0x58c   :  { %v1287_v2 = vpop.f32.mrb[7].mxu1  ;;  %v1292_v3 = vpop.f32.mrb[9].mxu0 }
 0x58d   :  { %v409_v4 = vpop.f32.mrb[10].mxu0 }
 0x58e   :  { %v1293_v5 = vpop.f32.mrb[11].mxu0 }
 0x591   :  { %v456_v6 = vpop.f32.mrb[8].mxu1 }
 0x592   :  { %v512_v7 = vmul.f32 0.35355338, %v456_v6  ;;  %v1298_v9 = vpop.f32.mrb[9].mxu1 }
 0x593   :  { %v459_v10 = vpop.f32.mrb[10].mxu1  ;;  %v506_v11 = vpop.f32.mrb[12].mxu0 }
 0x594   :  { %v514_v13 = vmul.f32 %v512_v7, %v1571_v8  ;;  %v513_v15 = vmul.f32 0.35355338, %v506_v11  ;;  %v1299_v17 = vpop.f32.mrb[11].mxu1  ;;  %v1304_v18 = vpop.f32.mrb[13].mxu0 }
 0x595   :  { %v509_v19 = vpop.f32.mrb[14].mxu0 }
 0x596   :  { %v515_v20 = vmul.f32 %v513_v15, %v1573_v12  ;;  %v1305_v21 = vpop.f32.mrb[15].mxu0  ;;  %v516_v22 = vsel %vm1575_vm7, %v514_v13, 0.0 }
 0x597   :  { %vm518_vm11 = vcmp.eq.f32.partialorder %v516_v22, 0.0 }
 0x598   :  { %v520_v23 = vsel %vm518_vm11, -inf, %v516_v22  ;;  %v517_v24 = vsel %vm1575_vm7, %v515_v20, 0.0 }
 0x599   :  { %v522_v25 = vsel %vm147_vm6, %v520_v23, -inf  ;;  %vm519_vm12 = vcmp.eq.f32.partialorder %v517_v24, 0.0 }
 0x59a   :  { %523 = vmax.xlane.f32.xlu0 %v522_v25  ;;  %v521_v26 = vsel %vm519_vm12, -inf, %v517_v24 }
 0x59b   :  { %v525_v27 = vsel %vm147_vm6, %v521_v26, -inf }
 0x59c   :  { %526 = vmax.xlane.f32.xlu1 %v525_v27 }
 0x5ad   :  { %594 = vrot.lane.b32.xlu1 %v1552_v52, %s1453_s18 }
 0x5b1   :  { %644 = vrot.lane.b32.xlu1 %v1550_v49, %s1454_s19 }
 0x5b5   :  { %694 = vrot.lane.b32.xlu1 %v1552_v52, %s1454_s19 }
 0x5b9   :  { %692 = vrot.lane.b32.xlu1 %v1552_v52, %s1455_s20 }
 0x627   :  { %v524_v28 = vpop.xlane.xlu0 %523 }
 0x628   :  { %v528_v29 = vsub.f32 %v520_v23, %v524_v28 }
 0x629   :  { %v527_v30 = vpop.xlane.xlu1 %526 }
 0x62a   :  { %v530_v31 = vmul.f32 1.442695, %v528_v29  ;;  %v529_v32 = vsub.f32 %v521_v26, %v527_v30 }
 0x62c   :  { %1422 = vpow2.f32 %v530_v31  ;;  %v532_v33 = vmul.f32 1.442695, %v529_v32 }
 0x62d   :  { %v595_v34 = vpop.permute.xlu1 %594 }
 0x62e   :  { %1424 = vpow2.f32 %v532_v33  ;;  %v600_v35 = vsel %vm320_vm10, %v595_v34, 0 }
 0x62f   :  { %1313 = vmatpush3.bf16.msra.mxu0 %v600_v35 }
 0x630   :  { %1324 = vmatprep.subr.bf16.mxu0 %v1446_v14 }
 0x631   :  { %v645_v45 = vpop.permute.xlu1 %644 }
 0x632   :  { %v650_v53 = vsel %vm147_vm6, %v645_v45, 0 }
 0x635   :  { %v695_v51 = vpop.permute.xlu1 %694 }
 0x636   :  { %v1423_v36 = vpop.eup %1422  ;;  %v700_v55 = vsel %vm147_vm6, %v695_v51, 0 }
 0x637   :  { %v534_v37 = vsel %vm147_vm6, %v1423_v36, 0.0 }
 0x638   :  { %v1425_v38 = vpop.eup %1424  ;;  %535 = vadd.xlane.f32.xlu0 %v534_v37 }
 0x639   :  { %v537_v39 = vsel %vm147_vm6, %v1425_v38, 0.0  ;;  %v693_v57 = vpop.permute.xlu1 %692 }
 0x63c   :  { %538 = vadd.xlane.f32.xlu0 %v537_v39 }
 0x652   :  { %546 = vrot.lane.b32.xlu0 %v1550_v49, %s1453_s18 }
 0x656   :  { %642 = vrot.lane.b32.xlu0 %v1550_v49, %s1455_s20 }
 0x6c5   :  { %v536_v40 = vpop.xlane.xlu0 %535 }
 0x6c6   :  { %1426 = vrcp.f32 %v536_v40 }
 0x6c9   :  { %v539_v41 = vpop.xlane.xlu0 %538 }
 0x6ca   :  { %1428 = vrcp.f32 %v539_v41 }
 0x6cd   :  { %v547_v42 = vpop.permute.xlu0 %546 }
 0x6ce   :  { %v552_v43 = vsel %vm320_vm10, %v547_v42, 0 }
 0x6cf   :  { %1307 = vmatpush3.bf16.msra.mxu1 %v552_v43 }
 0x6d0   :  { %v1427_v44 = vpop.eup %1426  ;;  %1318 = vmatprep.subr.bf16.mxu1 %v1446_v14 }
 0x6d1   :  { %v542_v46 = vmul.f32 %v1427_v44, %v1423_v36  ;;  %v643_v56 = vpop.permute.xlu0 %642 }
 0x6d3   :  { %v544_v47 = vpack.c.bf16 %v542_v46, %v542_v46 }
 0x6d4   :  { %v1429_v48 = vpop.eup %1428 }
 0x6d5   :  { %v543_v50 = vmul.f32 %v1429_v48, %v1425_v38  ;;  %1309 = vmatmul.mubr.msk.bf16.vlgmr.msra.gmra.mrb[12].mxu1 %vm147_vm6, %v544_v47 }
 0x6d6   :  { %1320 = vmatprep.mubr.msk.bf16.mxu1 %vm1447_vm1, %v1446_v14 }
 0x6d7   :  { %v545_v54 = vpack.c.bf16 %v543_v50, %v543_v50 }
 0x6d8   :  { %1319 = vmatpush3.bf16.xpose.msra.mxu1 %v650_v53 }
 0x6d9   :  { %1315 = vmatmul.mubr.msk.bf16.vlgmr.msra.gmra.mrb[16].mxu0 %vm147_vm6, %v545_v54  ;;  %1330 = vmatprep.subr.bf16.mxu1 %v1446_v14 }
 0x6da   :  { %1325 = vmatpush3.bf16.xpose.msra.mxu0 %v700_v55  ;;  %1326 = vmatprep.mubr.msk.bf16.mxu0 %vm1447_vm1, %v1446_v14 }
 0x6db   :  { %1336 = vmatprep.subr.bf16.mxu0 %v1446_v14 }
 0x6df   :  { %1321 = vmatmul.mubr.msk.bf16.vlgmr.msra.gmra.mrb[16].mxu1 %vm147_vm6, %v643_v56 }
 0x6e0   :  { %1332 = vmatprep.mubr.msk.bf16.mxu1 %vm1447_vm1, %v1446_v14 }
 0x6e1   :  { %1327 = vmatmul.mubr.msk.bf16.vlgmr.msra.gmra.mrb[20].mxu0 %vm147_vm6, %v693_v57 }
 0x6e2   :  { %1338 = vmatprep.mubr.msk.bf16.mxu0 %vm1447_vm1, %v1446_v14 }
 0x7a8   :  { %v1655_v58 = vpop.f32.mrb[12].mxu1 }
 0x7a9   :  { %v1310_v59 = vpop.f32.mrb[13].mxu1 }
 0x7aa   :  { %v591_v61 = vpop.f32.mrb[14].mxu1 }
 0x7ab   :  { %v1311_v62 = vpop.f32.mrb[15].mxu1 }
 0x7ac   :  { %v1657_v2 = vpop.f32.mrb[16].mxu0 }
 0x7ad   :  { %v1391_v3 = vpack.i.bf16 %v1657_v2, %v1655_v58  ;;  %v1316_v4 = vpop.f32.mrb[17].mxu0 }
 0x7ae   :  { %v639_v5 = vpop.f32.mrb[18].mxu0 }
 0x7af   :  { %v1317_v6 = vpop.f32.mrb[19].mxu0 }
 0x7b2   :  { %v686_v7 = vpop.f32.mrb[16].mxu1 }
 0x7b3   :  { %v742_v9 = vmul.f32 0.35355338, %v686_v7  ;;  %v1322_v10 = vpop.f32.mrb[17].mxu1 }
 0x7b4   :  { %v689_v11 = vpop.f32.mrb[18].mxu1  ;;  %v736_v13 = vpop.f32.mrb[20].mxu0 }
 0x7b5   :  { %v744_v15 = vmul.f32 %v742_v9, %v1571_v8  ;;  %v743_v17 = vmul.f32 0.35355338, %v736_v13  ;;  %v1323_v18 = vpop.f32.mrb[19].mxu1  ;;  %v1328_v19 = vpop.f32.mrb[21].mxu0 }
 0x7b6   :  { %v739_v20 = vpop.f32.mrb[22].mxu0 }
 0x7b7   :  { %v745_v21 = vmul.f32 %v743_v17, %v1573_v12  ;;  %v1329_v22 = vpop.f32.mrb[23].mxu0  ;;  %v746_v23 = vsel %vm1575_vm7, %v744_v15, 0.0 }
 0x7b8   :  { %vm748_vm13 = vcmp.eq.f32.partialorder %v746_v23, 0.0 }
 0x7b9   :  { %v750_v24 = vsel %vm748_vm13, -inf, %v746_v23  ;;  %v747_v25 = vsel %vm1575_vm7, %v745_v21, 0.0 }
 0x7ba   :  { %v752_v26 = vsel %vm147_vm6, %v750_v24, -inf  ;;  %vm749_vm14 = vcmp.eq.f32.partialorder %v747_v25, 0.0 }
 0x7bb   :  { %753 = vmax.xlane.f32.xlu0 %v752_v26  ;;  %v751_v27 = vsel %vm749_vm14, -inf, %v747_v25 }
 0x7bc   :  { %v755_v28 = vsel %vm147_vm6, %v751_v27, -inf }
 0x7bd   :  { %756 = vmax.xlane.f32.xlu1 %v755_v28 }
 0x7ce   :  { %824 = vrot.lane.b32.xlu1 %v1552_v52, %s1456_s21 }
 0x7d2   :  { %874 = vrot.lane.b32.xlu1 %v1550_v49, %s1457_s22 }
 0x7d6   :  { %924 = vrot.lane.b32.xlu1 %v1552_v52, %s1457_s22 }
 0x7da   :  { %922 = vrot.lane.b32.xlu1 %v1552_v52, %s1458_s23 }
 0x848   :  { %v754_v29 = vpop.xlane.xlu0 %753 }
 0x849   :  { %v758_v30 = vsub.f32 %v750_v24, %v754_v29 }
 0x84a   :  { %v757_v31 = vpop.xlane.xlu1 %756 }
 0x84b   :  { %v760_v32 = vmul.f32 1.442695, %v758_v30  ;;  %v759_v33 = vsub.f32 %v751_v27, %v757_v31 }
 0x84d   :  { %1430 = vpow2.f32 %v760_v32  ;;  %v762_v34 = vmul.f32 1.442695, %v759_v33 }
 0x84e   :  { %v825_v35 = vpop.permute.xlu1 %824 }
 0x84f   :  { %1432 = vpow2.f32 %v762_v34  ;;  %v830_v36 = vsel %vm320_vm10, %v825_v35, 0 }
 0x850   :  { %1337 = vmatpush3.bf16.msra.mxu0 %v830_v36 }
 0x851   :  { %1348 = vmatprep.subr.bf16.mxu0 %v1446_v14 }
 0x852   :  { %v875_v46 = vpop.permute.xlu1 %874 }
 0x853   :  { %v880_v54 = vsel %vm147_vm6, %v875_v46, 0 }
 0x856   :  { %v925_v53 = vpop.permute.xlu1 %924 }
 0x857   :  { %v1431_v37 = vpop.eup %1430  ;;  %v930_v56 = vsel %vm147_vm6, %v925_v53, 0  ;;  %v1137_v53 = vld [vmem:[%s1755_s5 + $0x18] sm:$0xff] }
 0x858   :  { %v764_v38 = vsel %vm147_vm6, %v1431_v37, 0.0 }
 0x859   :  { %v1433_v39 = vpop.eup %1432  ;;  %765 = vadd.xlane.f32.xlu0 %v764_v38 }
 0x85a   :  { %v767_v40 = vsel %vm147_vm6, %v1433_v39, 0.0  ;;  %v923_v59 = vpop.permute.xlu1 %922 }
 0x85d   :  { %768 = vadd.xlane.f32.xlu0 %v767_v40 }
 0x873   :  { %776 = vrot.lane.b32.xlu0 %v1550_v49, %s1456_s21 }
 0x877   :  { %872 = vrot.lane.b32.xlu0 %v1550_v49, %s1458_s23 }
 0x8e6   :  { %v766_v41 = vpop.xlane.xlu0 %765 }
 0x8e7   :  { %1434 = vrcp.f32 %v766_v41 }
 0x8ea   :  { %v769_v42 = vpop.xlane.xlu0 %768 }
 0x8eb   :  { %1436 = vrcp.f32 %v769_v42 }
 0x8ee   :  { %v777_v43 = vpop.permute.xlu0 %776 }
 0x8ef   :  { %v782_v44 = vsel %vm320_vm10, %v777_v43, 0 }
 0x8f0   :  { %1331 = vmatpush3.bf16.msra.mxu1 %v782_v44 }
 0x8f1   :  { %v1435_v45 = vpop.eup %1434  ;;  %1342 = vmatprep.subr.bf16.mxu1 %v1446_v14 }
 0x8f2   :  { %v772_v47 = vmul.f32 %v1435_v45, %v1431_v37  ;;  %v873_v57 = vpop.permute.xlu0 %872 }
 0x8f4   :  { %v774_v48 = vpack.c.bf16 %v772_v47, %v772_v47  ;;  %v1134_v47 = vld [vmem:[%s1755_s5] sm:$0xff] }
 0x8f5   :  { %v1437_v50 = vpop.eup %1436 }
 0x8f6   :  { %v773_v51 = vmul.f32 %v1437_v50, %v1433_v39  ;;  %1333 = vmatmul.mubr.msk.bf16.vlgmr.msra.gmra.mrb[20].mxu1 %vm147_vm6, %v774_v48  ;;  %v1135_v48 = vld [vmem:[%s1755_s5 + $0x8] sm:$0xff] }
 0x8f7   :  { %1344 = vmatprep.mubr.msk.bf16.mxu1 %vm1447_vm1, %v1446_v14  ;;  %v1139_v50 = vpack.c.bf16 %v1135_v48, %v1134_v47 }
 0x8f8   :  { %v775_v55 = vpack.c.bf16 %v773_v51, %v773_v51  ;;  %v1136_v51 = vld [vmem:[%s1755_s5 + $0x10] sm:$0xff] }
 0x8f9   :  { %1343 = vmatpush3.bf16.xpose.msra.mxu1 %v880_v54  ;;  %v1140_v54 = vpack.c.bf16 %v1137_v53, %v1136_v51 }
 0x8fa   :  { %1339 = vmatmul.mubr.msk.bf16.vlgmr.msra.gmra.mrb[24].mxu0 %vm147_vm6, %v775_v55  ;;  %1354 = vmatprep.subr.bf16.mxu1 %v1446_v14 }
 0x8fb   :  { %1349 = vmatpush3.bf16.xpose.msra.mxu0 %v930_v56  ;;  %1350 = vmatprep.mubr.msk.bf16.mxu0 %vm1447_vm1, %v1446_v14 }
 0x8fc   :  { %1360 = vmatprep.subr.bf16.mxu0 %v1446_v14 }
 0x900   :  { %1345 = vmatmul.mubr.msk.bf16.vlgmr.msra.gmra.mrb[24].mxu1 %vm147_vm6, %v873_v57 }
 0x901   :  { %1356 = vmatprep.mubr.msk.bf16.mxu1 %vm1447_vm1, %v1446_v14 }
 0x902   :  { %1351 = vmatmul.mubr.msk.bf16.vlgmr.msra.gmra.mrb[28].mxu0 %vm147_vm6, %v923_v59 }
 0x903   :  { %1362 = vmatprep.mubr.msk.bf16.mxu0 %vm1447_vm1, %v1446_v14 }
 0x9c9   :  { %v818_v61 = vpop.f32.mrb[20].mxu1 }
 0x9ca   :  { %v1334_v62 = vpop.f32.mrb[21].mxu1 }
 0x9cb   :  { %v821_v4 = vpop.f32.mrb[22].mxu1 }
 0x9cc   :  { %v1335_v5 = vpop.f32.mrb[23].mxu1 }
 0x9cd   :  { %v866_v6 = vpop.f32.mrb[24].mxu0 }
 0x9ce   :  { %v1396_v7 = vpack.i.bf16 %v866_v6, %v818_v61  ;;  %v1340_v9 = vpop.f32.mrb[25].mxu0 }
 0x9cf   :  { %v869_v10 = vpop.f32.mrb[26].mxu0 }
 0x9d0   :  { %v1341_v11 = vpop.f32.mrb[27].mxu0 }
 0x9d3   :  { %v916_v13 = vpop.f32.mrb[24].mxu1 }
 0x9d4   :  { %v972_v15 = vmul.f32 0.35355338, %v916_v13  ;;  %v1346_v17 = vpop.f32.mrb[25].mxu1 }
 0x9d5   :  { %v919_v18 = vpop.f32.mrb[26].mxu1  ;;  %v966_v19 = vpop.f32.mrb[28].mxu0 }
 0x9d6   :  { %v974_v20 = vmul.f32 %v972_v15, %v1571_v8  ;;  %v973_v21 = vmul.f32 0.35355338, %v966_v19  ;;  %v1347_v22 = vpop.f32.mrb[27].mxu1  ;;  %v1352_v23 = vpop.f32.mrb[29].mxu0 }
 0x9d7   :  { %v969_v24 = vpop.f32.mrb[30].mxu0 }
 0x9d8   :  { %v975_v25 = vmul.f32 %v973_v21, %v1573_v12  ;;  %v1353_v26 = vpop.f32.mrb[31].mxu0  ;;  %v976_v27 = vsel %vm1575_vm7, %v974_v20, 0.0 }
 0x9d9   :  { %vm978_vm15 = vcmp.eq.f32.partialorder %v976_v27, 0.0 }
 0x9da   :  { %v980_v28 = vsel %vm978_vm15, -inf, %v976_v27  ;;  %v977_v29 = vsel %vm1575_vm7, %v975_v25, 0.0  ;;  %v1223_v27 = vld [vmem:[%s1756_s6] ss:$0 sm:$0xff] }
 0x9db   :  { %v982_v30 = vsel %vm147_vm6, %v980_v28, -inf  ;;  %vm979_vm2 = vcmp.eq.f32.partialorder %v977_v29, 0.0 }
 0x9dc   :  { %983 = vmax.xlane.f32.xlu0 %v982_v30  ;;  %v981_v8 = vsel %vm979_vm2, -inf, %v977_v29 }
 0x9dd   :  { %v985_v31 = vsel %vm147_vm6, %v981_v8, -inf }
 0x9de   :  { %986 = vmax.xlane.f32.xlu1 %v985_v31 }
 0x9ef   :  { %1054 = vrot.lane.b32.xlu1 %v1552_v52, %s1459_s24 }
 0x9f3   :  { %1392 = vrot.lane.b32.xlu1 %v1391_v3, %s1460_s25 }
 0x9f7   :  { %1397 = vrot.lane.b32.xlu1 %v1396_v7, %s1461_s26 }
 0xa69   :  { %v984_v12 = vpop.xlane.xlu0 %983 }
 0xa6a   :  { %v988_v16 = vsub.f32 %v980_v28, %v984_v12 }
 0xa6b   :  { %v987_v32 = vpop.xlane.xlu1 %986 }
 0xa6c   :  { %v990_v33 = vmul.f32 1.442695, %v988_v16  ;;  %v989_v34 = vsub.f32 %v981_v8, %v987_v32 }
 0xa6e   :  { %1438 = vpow2.f32 %v990_v33  ;;  %v992_v35 = vmul.f32 1.442695, %v989_v34 }
 0xa6f   :  { %v1055_v36 = vpop.permute.xlu1 %1054 }
 0xa70   :  { %1440 = vpow2.f32 %v992_v35  ;;  %v1060_v37 = vsel %vm320_vm10, %v1055_v36, 0 }
 0xa71   :  { %1361 = vmatpush3.bf16.msra.mxu0 %v1060_v37 }
 0xa73   :  { %v1393_v6 = vpop.permute.xlu1 %1392 }
 0xa74   :  { %v1395_v9 = vunpack.i.h.bf16 %v1393_v6  ;;  %v1394_v10 = vunpack.i.l.bf16 %v1393_v6 }
 0xa76   :  { %v1127_v17 = vsel %vm147_vm6, %v1617_v63, %v1395_v9  ;;  %v1126_v18 = vsel %vm147_vm6, %v1615_v60, %v1394_v10 }
 0xa77   :  { %v1398_v7 = vpop.permute.xlu1 %1397 }
 0xa78   :  { %v1439_v52 = vpop.eup %1438  ;;  %v1400_v11 = vunpack.i.h.bf16 %v1398_v7  ;;  %v1399_v13 = vunpack.i.l.bf16 %v1398_v7 }
 0xa79   :  { %v994_v38 = vsel %vm147_vm6, %v1439_v52, 0.0 }
 0xa7a   :  { %v1441_v39 = vpop.eup %1440  ;;  %995 = vadd.xlane.f32.xlu0 %v994_v38 }
 0xa7b   :  { %v997_v58 = vsel %vm147_vm6, %v1441_v39, 0.0 }
 0xa7e   :  { %998 = vadd.xlane.f32.xlu0 %v997_v58 }
 0xa94   :  { %1006 = vrot.lane.b32.xlu0 %v1550_v49, %s1459_s24 }
 0xb07   :  { %v996_v2 = vpop.xlane.xlu0 %995 }
 0xb08   :  { %1442 = vrcp.f32 %v996_v2 }
 0xb0b   :  { %v999_v3 = vpop.xlane.xlu0 %998 }
 0xb0c   :  { %1444 = vrcp.f32 %v999_v3 }
 0xb0f   :  { %v1007_v40 = vpop.permute.xlu0 %1006 }
 0xb10   :  { %v1012_v41 = vsel %vm320_vm10, %v1007_v40, 0 }
 0xb11   :  { %1355 = vmatpush3.bf16.msra.mxu1 %v1012_v41 }
 0xb12   :  { %v1443_v42 = vpop.eup %1442  ;;  %1366 = vmatprep.subr.bf16.mxu1 %v1446_v14 }
 0xb13   :  { %v1002_v43 = vmul.f32 %v1443_v42, %v1439_v52 }
 0xb15   :  { %v1004_v44 = vpack.c.bf16 %v1002_v43, %v1002_v43 }
 0xb16   :  { %v1445_v45 = vpop.eup %1444 }
 0xb17   :  { %v1003_v46 = vmul.f32 %v1445_v45, %v1441_v39  ;;  %1357 = vmatmul.mubr.msk.bf16.vlgmr.msra.gmra.mrb[28].mxu1 %vm147_vm6, %v1004_v44 }
 0xb18   :  { %1370 = vmatprep.mubr.msk.bf16.mxu1 %vm1447_vm1, %v1446_v14  ;;  %1367 = vmatpush3.bf16.msra.mxu1 %v1139_v50  ;;  %vm1128_vm1 = vcmask 130048  }
 0xb19   :  { %v1005_v49 = vpack.c.bf16 %v1003_v46, %v1003_v46  ;;  %1368 = vmatprep.subr.bf16.mxu1 %v1446_v14  ;;  %v1129_v21 = vsel %vm1128_vm1, %v1126_v18, %v1399_v13  ;;  %v1130_v22 = vsel %vm1128_vm1, %v1127_v17, %v1400_v11 }
 0xb1b   :  { %1363 = vmatmul.mubr.msk.bf16.vlgmr.msra.gmra.mrb[32].mxu0 %vm147_vm6, %v1005_v49 }
 0xb1c   :  { %1369 = vmatpush3.bf16.msra.mxu1 %v1140_v54 }
 0xbea   :  { %v1048_v55 = vpop.f32.mrb[28].mxu1 }
 0xbeb   :  { %v1358_v56 = vpop.f32.mrb[29].mxu1 }
 0xbec   :  { %v1051_v57 = vpop.f32.mrb[30].mxu1 }
 0xbed   :  { %v1359_v59 = vpop.f32.mrb[31].mxu1 }
 0xbee   :  { %v1096_v61 = vpop.f32.mrb[32].mxu0 }
 0xbef   :  { %v1401_v62 = vpack.i.bf16 %v1096_v61, %v1048_v55  ;;  %v1364_v4 = vpop.f32.mrb[33].mxu0 }
 0xbf0   :  { %v1099_v5 = vpop.f32.mrb[34].mxu0 }
 0xbf1   :  { %1402 = vrot.lane.b32.xlu0 %v1401_v62, %s1462_s11  ;;  %v1365_v14 = vpop.f32.mrb[35].mxu0 }
 0xc63   :  { %v1403_v15 = vpop.permute.xlu0 %1402 }
 0xc64   :  { %v1405_v19 = vunpack.i.h.bf16 %v1403_v15  ;;  %v1404_v20 = vunpack.i.l.bf16 %v1403_v15 }
 0xc66   :  { %v1133_v23 = vsel %vm1131_vm3, %v1130_v22, %v1405_v19  ;;  %v1132_v24 = vsel %vm1131_vm3, %v1129_v21, %v1404_v20 }
 0xc67   :  { %v1138_v25 = vpack.c.bf16 %v1133_v23, %v1132_v24 }
 0xc69   :  { %1371 = vmatmul.mubr.msk.bf16.vlgmr.msra.gmra.mrb[32].mxu1 %vm31_vm0, %v1138_v25 }
 0xd3c   :  { %v1178_v26 = vpop.f32.mrb[32].mxu1 }
 0xd3d   :  { %v1185_v28 = vadd.f32 %v1178_v26, %v1506_v0  ;;  %v1372_v63 = vpop.f32.mrb[33].mxu1 }
 0xd3e   :  { %v1181_v29 = vpop.f32.mrb[34].mxu1 }
 0xd3f   :  { %v1194_v30 = vadd.f32 %v1223_v27, %v1185_v28  ;;  %v1186_v60 = vadd.f32 %v1181_v29, %v1511_v1  ;;  %v1373_v8 = vpop.f32.mrb[35].mxu1 }
 0xd41   :  { %1196 = vst.msk [vmem:[%s1757_s7] sm:$0xff] %vm31_vm0, %v1194_v30  ;;  %v1195_v31 = vadd.f32 %v1223_v27, %v1186_v60 }
 0xd43   :  { %1197 = vst.msk [vmem:[%s1757_s7 + $0x8] sm:$0xff] %vm31_vm0, %v1195_v31 }

// kernel: transformer_forward.17
= control target key start
LH: loop header
LB: loop body
LE: loop exit
PB: predicated region body
PF: predicated region fallthrough
CT: control target
= control target key end

     0   :  { %vm31_vm0 = vcmask 261120   ;;  %v1591_v37 = vmov 0   ;;  %s2910_s0 = inlined_call_operand.vmem [shape: f32[16,32], index: 0, kind: input, shape index: {}]   ;;  %s2911_s3 = inlined_call_operand.vmem [shape: f32[32,2048], index: 3, kind: input, shape index: {}]   ;;  %s2912_s1 = inlined_call_operand.vmem [shape: f32[1,32], index: 1, kind: input, shape index: {}]   ;;  %s2913_s2 = inlined_call_operand.vmem [shape: f32[1,32], index: 2, kind: input, shape index: {}]   ;;  %s2914_s5 = inlined_call_operand.vmem [shape: f32[2048,32], index: 5, kind: input, shape index: {}]   ;;  %s2915_s4 = inlined_call_operand.vmem [shape: f32[1,2048], index: 4, kind: input, shape index: {}]   ;;  %s2916_s6 = inlined_call_operand.vmem [shape: f32[1,32], index: 6, kind: input, shape index: {}]   ;;  %s2917_s7 = inlined_call_operand.vmem [shape: f32[16,32], index: 7, kind: output, shape index: {}]  }
   0x1   :  { %v27_v0 = vld [vmem:[%s2910_s0] sm:$0xff]  ;;  %v28_v1 = vld [vmem:[%s2910_s0 + $0x8] sm:$0xff]  ;;  %v93_v16 = vld [vmem:[%s2911_s3 + $0x18] sm:$0xff]  ;;  %306 = vmatprep.mubr.bf16.mxu0 %v1591_v37  ;;  %349 = vmatprep.mubr.bf16.mxu1 %v1591_v37 }
   0x2   :  { %v32_v2 = vsel %vm31_vm0, %v27_v0, 0.0  ;;  %v35_v3 = vsel %vm31_vm0, %v28_v1, 0.0  ;;  %v91_v14 = vld [vmem:[%s2911_s3 + $0x8] sm:$0xff]  ;;  %v109_v18 = vld [vmem:[%s2911_s3 + $0x98] sm:$0xff]  ;;  %v90_v19 = vld [vmem:[%s2911_s3] sm:$0xff] }
   0x3   :  { %33 = vadd.xlane.f32.xlu0 %v32_v2  ;;  %v107_v15 = vld [vmem:[%s2911_s3 + $0x88] sm:$0xff]  ;;  %v106_v20 = vld [vmem:[%s2911_s3 + $0x80] sm:$0xff]  ;;  %v158_v21 = vpack.c.bf16 %v109_v18, %v93_v16  ;;  %v92_v23 = vld [vmem:[%s2911_s3 + $0x10] sm:$0xff] }
   0x4   :  { %v156_v17 = vpack.c.bf16 %v107_v15, %v91_v14  ;;  %v155_v22 = vpack.c.bf16 %v106_v20, %v90_v19  ;;  %v108_v24 = vld [vmem:[%s2911_s3 + $0x90] sm:$0xff]  ;;  %v123_v26 = vld [vmem:[%s2911_s3 + $0x108] sm:$0xff]  ;;  %v125_v28 = vld [vmem:[%s2911_s3 + $0x118] sm:$0xff] }
   0x5   :  { %v157_v25 = vpack.c.bf16 %v108_v24, %v92_v23  ;;  %317 = vmatprep.subr.bf16.mxu1 %v158_v21  ;;  %v139_v27 = vld [vmem:[%s2911_s3 + $0x188] sm:$0xff]  ;;  %v141_v30 = vld [vmem:[%s2911_s3 + $0x198] sm:$0xff]  ;;  %v122_v31 = vld [vmem:[%s2911_s3 + $0x100] sm:$0xff] }
   0x6   :  { %274 = vmatprep.subr.bf16.mxu0 %v156_v17  ;;  %v172_v29 = vpack.c.bf16 %v139_v27, %v123_v26  ;;  %v138_v32 = vld [vmem:[%s2911_s3 + $0x180] sm:$0xff]  ;;  %v174_v33 = vpack.c.bf16 %v141_v30, %v125_v28  ;;  %v124_v35 = vld [vmem:[%s2911_s3 + $0x110] sm:$0xff]  ;;  %v95_v39 = vld [vmem:[%s2911_s3 + $0x28] sm:$0xff] }
   0x7   :  { %36 = vadd.xlane.f32.xlu0 %v35_v3  ;;  %275 = vmatpush1.bf16.msra.mxu0 %v155_v22  ;;  %v171_v34 = vpack.c.bf16 %v138_v32, %v122_v31  ;;  %v140_v36 = vld [vmem:[%s2911_s3 + $0x190] sm:$0xff]  ;;  %v111_v40 = vld [vmem:[%s2911_s3 + $0xa8] sm:$0xff]  ;;  %v97_v41 = vld [vmem:[%s2911_s3 + $0x38] sm:$0xff] }
   0x8   :  { %318 = vmatpush1.bf16.msra.mxu1 %v157_v25  ;;  %276 = vmatprep.subr.bf16.mxu0 %v172_v29  ;;  %v173_v38 = vpack.c.bf16 %v140_v36, %v124_v35  ;;  %v160_v42 = vpack.c.bf16 %v111_v40, %v95_v39  ;;  %v113_v43 = vld [vmem:[%s2911_s3 + $0xb8] sm:$0xff]  ;;  %v1393_v61 = vld [vmem:[%s2912_s1] ss:$0 sm:$0xff]  ;;  %v128_v22 = vld [vmem:[%s2911_s3 + $0x130] sm:$0xff] }
   0x9   :  { %319 = vmatprep.subr.bf16.mxu1 %v174_v33  ;;  %v162_v44 = vpack.c.bf16 %v113_v43, %v97_v41  ;;  %v1394_v3 = vld [vmem:[%s2913_s2] ss:$0 sm:$0xff]  ;;  %v144_v23 = vld [vmem:[%s2911_s3 + $0x1b0] sm:$0xff]  ;;  %v99_v24 = vld [vmem:[%s2911_s3 + $0x48] sm:$0xff] }
   0xa   :  { %v126_v17 = vld [vmem:[%s2911_s3 + $0x120] sm:$0xff]  ;;  %v115_v25 = vld [vmem:[%s2911_s3 + $0xc8] sm:$0xff]  ;;  %v101_v26 = vld [vmem:[%s2911_s3 + $0x58] sm:$0xff]  ;;  %v177_v29 = vpack.c.bf16 %v144_v23, %v128_v22 }
   0xb   :  { %277 = vmatpush1.bf16.msra.mxu0 %v171_v34  ;;  %v142_v18 = vld [vmem:[%s2911_s3 + $0x1a0] sm:$0xff]  ;;  %v117_v27 = vld [vmem:[%s2911_s3 + $0xd8] sm:$0xff]  ;;  %v164_v32 = vpack.c.bf16 %v115_v25, %v99_v24  ;;  %v100_v34 = vld [vmem:[%s2911_s3 + $0x50] sm:$0xff] }
   0xc   :  { %320 = vmatpush1.bf16.msra.mxu1 %v173_v38  ;;  %360 = vmatprep.subr.bf16.mxu0 %v160_v42  ;;  %v175_v28 = vpack.c.bf16 %v142_v18, %v126_v17  ;;  %v98_v30 = vld [vmem:[%s2911_s3 + $0x40] sm:$0xff]  ;;  %v166_v33 = vpack.c.bf16 %v117_v27, %v101_v26  ;;  %v116_v35 = vld [vmem:[%s2911_s3 + $0xd0] sm:$0xff]  ;;  %v131_v36 = vld [vmem:[%s2911_s3 + $0x148] sm:$0xff] }
   0xd   :  { %403 = vmatprep.subr.bf16.mxu1 %v162_v44  ;;  %v114_v31 = vld [vmem:[%s2911_s3 + $0xc0] sm:$0xff]  ;;  %v147_v38 = vld [vmem:[%s2911_s3 + $0x1c8] sm:$0xff]  ;;  %v133_v39 = vld [vmem:[%s2911_s3 + $0x158] sm:$0xff]  ;;  %v165_v42 = vpack.c.bf16 %v116_v35, %v100_v34 }
   0xe   :  { %v149_v40 = vld [vmem:[%s2911_s3 + $0x1d8] sm:$0xff]  ;;  %v163_v41 = vpack.c.bf16 %v114_v31, %v98_v30  ;;  %v130_v43 = vld [vmem:[%s2911_s3 + $0x140] sm:$0xff]  ;;  %v668_v22 = vld [vmem:[%s2914_s5 + $0x90] sm:$0xff] }
   0xf   :  { %v146_v44 = vld [vmem:[%s2911_s3 + $0x1c0] sm:$0xff]  ;;  %v669_v23 = vld [vmem:[%s2914_s5 + $0x98] sm:$0xff]  ;;  %v700_v24 = vld [vmem:[%s2914_s5 + $0x190] sm:$0xff] }
  0x10   :  { %v701_v25 = vld [vmem:[%s2914_s5 + $0x198] sm:$0xff]  ;;  %v684_v31 = vld [vmem:[%s2914_s5 + $0x110] sm:$0xff]  ;;  %v671_v34 = vld [vmem:[%s2914_s5 + $0xa8] sm:$0xff] }
  0x11   :  { %v947_v30 = vpack.c.bf16 %v701_v25, %v700_v24  ;;  %v702_v35 = vld [vmem:[%s2914_s5 + $0x1a0] sm:$0xff]  ;;  %v711_v24 = vld [vmem:[%s2914_s5 + $0x1e8] sm:$0xff] }
  0x12   :  { %v662_v25 = vld [vmem:[%s2914_s5 + $0x60] sm:$0xff] }
  0x90   :  { %v34_v4 = vpop.xlane.xlu0 %33 }
  0x91   :  { %v39_v5 = vmul.f32 0.03125, %v34_v4  ;;  %v94_v4 = vld [vmem:[%s2911_s3 + $0x20] sm:$0xff] }
  0x93   :  { %v1640_v6 = vsub.f32 %v27_v0, %v39_v5  ;;  %v110_v5 = vld [vmem:[%s2911_s3 + $0xa0] sm:$0xff] }
  0x94   :  { %v37_v7 = vpop.xlane.xlu0 %36  ;;  %v159_v15 = vpack.c.bf16 %v110_v5, %v94_v4  ;;  %v150_v4 = vld [vmem:[%s2911_s3 + $0x1e0] sm:$0xff] }
  0x95   :  { %v40_v8 = vmul.f32 0.03125, %v37_v7  ;;  %v43_v9 = vmul.f32 %v1640_v6, %v1640_v6  ;;  %v74_v63 = vmul.f32 %v1393_v61, %v1640_v6  ;;  %v96_v6 = vld [vmem:[%s2911_s3 + $0x30] sm:$0xff] }
  0x97   :  { %v1644_v10 = vsub.f32 %v28_v1, %v40_v8  ;;  %v45_v11 = vsel %vm31_vm0, %v43_v9, 0.0  ;;  %v112_v8 = vld [vmem:[%s2911_s3 + $0xb0] sm:$0xff]  ;;  %v127_v9 = vld [vmem:[%s2911_s3 + $0x128] sm:$0xff] }
  0x98   :  { %46 = vadd.xlane.f32.xlu1 %v45_v11  ;;  %v129_v11 = vld [vmem:[%s2911_s3 + $0x138] sm:$0xff]  ;;  %v161_v16 = vpack.c.bf16 %v112_v8, %v96_v6  ;;  %v136_v6 = vld [vmem:[%s2911_s3 + $0x170] sm:$0xff] }
  0x99   :  { %v44_v12 = vmul.f32 %v1644_v10, %v1644_v10  ;;  %v75_v0 = vmul.f32 %v1393_v61, %v1644_v10  ;;  %v143_v10 = vld [vmem:[%s2911_s3 + $0x1a8] sm:$0xff]  ;;  %v152_v8 = vld [vmem:[%s2911_s3 + $0x1f0] sm:$0xff] }
  0x9a   :  { %v176_v20 = vpack.c.bf16 %v143_v10, %v127_v9  ;;  %v135_v61 = vld [vmem:[%s2911_s3 + $0x168] sm:$0xff]  ;;  %v666_v9 = vld [vmem:[%s2914_s5 + $0x80] sm:$0xff] }
  0x9b   :  { %v48_v13 = vsel %vm31_vm0, %v44_v12, 0.0  ;;  %v145_v12 = vld [vmem:[%s2911_s3 + $0x1b8] sm:$0xff]  ;;  %v667_v10 = vld [vmem:[%s2914_s5 + $0x88] sm:$0xff] }
  0x9c   :  { %49 = vadd.xlane.f32.xlu1 %v48_v13  ;;  %v178_v21 = vpack.c.bf16 %v145_v12, %v129_v11  ;;  %v698_v11 = vld [vmem:[%s2914_s5 + $0x180] sm:$0xff]  ;;  %v699_v12 = vld [vmem:[%s2914_s5 + $0x188] sm:$0xff]  ;;  %v930_v17 = vpack.c.bf16 %v667_v10, %v666_v9 }
  0x9d   :  { %v946_v18 = vpack.c.bf16 %v699_v12, %v698_v11  ;;  %v660_v11 = vld [vmem:[%s2914_s5 + $0x50] sm:$0xff] }
 0x125   :  { %v47_v45 = vpop.xlane.xlu1 %46 }
 0x126   :  { %v52_v46 = vmul.f32 0.032258064, %v47_v45  ;;  %v180_v45 = vpack.c.bf16 %v147_v38, %v131_v36  ;;  %v703_v36 = vld [vmem:[%s2914_s5 + $0x1a8] sm:$0xff] }
 0x128   :  { %1581 = vrsqrt.f32 %v52_v46  ;;  %vm56_vm1 = vcmp.eq.f32.partialorder %v52_v46, inf  ;;  %v59_v51 = vand.u32 2147483648, %v52_v46  ;;  %vm58_vm2 = vcmp.eq.f32.partialorder %v52_v46, 0.0 }
 0x129   :  { %v50_v47 = vpop.xlane.xlu1 %49 }
 0x12a   :  { %v53_v48 = vmul.f32 0.032258064, %v50_v47  ;;  %v132_v47 = vld [vmem:[%s2911_s3 + $0x150] sm:$0xff] }
 0x12c   :  { %1583 = vrsqrt.f32 %v53_v48  ;;  %vm63_vm3 = vcmp.eq.f32.partialorder %v53_v48, inf  ;;  %v66_v57 = vand.u32 2147483648, %v53_v48  ;;  %vm65_vm4 = vcmp.eq.f32.partialorder %v53_v48, 0.0 }
 0x132   :  { %v1582_v49 = vpop.eup %1581 }
 0x133   :  { %v55_v50 = vmul.f32 %v1582_v49, %v52_v46  ;;  %v103_v49 = vld [vmem:[%s2911_s3 + $0x68] sm:$0xff] }
 0x135   :  { %v57_v52 = vsel %vm56_vm1, %v52_v46, %v55_v50  ;;  %v182_v46 = vpack.c.bf16 %v149_v40, %v133_v39  ;;  %v119_v50 = vld [vmem:[%s2911_s3 + $0xe8] sm:$0xff]  ;;  %v654_v40 = vld [vmem:[%s2914_s5 + $0x20] sm:$0xff] }
 0x136   :  { %v1584_v53 = vpop.eup %1583  ;;  %v60_v54 = vsel %vm58_vm2, %v59_v51, %v57_v52  ;;  %v105_v51 = vld [vmem:[%s2911_s3 + $0x78] sm:$0xff] }
 0x137   :  { %v76_v55 = vadd.f32 1e-06, %v60_v54  ;;  %v62_v56 = vmul.f32 %v1584_v53, %v53_v48  ;;  %v121_v52 = vld [vmem:[%s2911_s3 + $0xf8] sm:$0xff]  ;;  %v179_v53 = vpack.c.bf16 %v146_v44, %v130_v43  ;;  %v948_v43 = vpack.c.bf16 %v703_v36, %v702_v35  ;;  %v687_v44 = vld [vmem:[%s2914_s5 + $0x128] sm:$0xff]  ;;  %v664_v36 = vld [vmem:[%s2914_s5 + $0x70] sm:$0xff] }
 0x138   :  { %v713_v35 = vld [vmem:[%s2914_s5 + $0x1f8] sm:$0xff] }
 0x139   :  { %1585 = vrcp.f32 %v76_v55  ;;  %v64_v58 = vsel %vm63_vm3, %v53_v48, %v62_v56  ;;  %v148_v48 = vld [vmem:[%s2911_s3 + $0x1d0] sm:$0xff]  ;;  %v102_v55 = vld [vmem:[%s2911_s3 + $0x60] sm:$0xff] }
 0x13a   :  { %v67_v59 = vsel %vm65_vm4, %v66_v57, %v64_v58  ;;  %v181_v54 = vpack.c.bf16 %v148_v48, %v132_v47  ;;  %v118_v56 = vld [vmem:[%s2911_s3 + $0xe0] sm:$0xff]  ;;  %v168_v57 = vpack.c.bf16 %v119_v50, %v103_v49  ;;  %v170_v58 = vpack.c.bf16 %v121_v52, %v105_v51  ;;  %v704_v47 = vld [vmem:[%s2914_s5 + $0x1b0] sm:$0xff]  ;;  %v705_v48 = vld [vmem:[%s2914_s5 + $0x1b8] sm:$0xff] }
 0x13b   :  { %v77_v60 = vadd.f32 1e-06, %v67_v59  ;;  %v104_v59 = vld [vmem:[%s2911_s3 + $0x70] sm:$0xff]  ;;  %v657_v52 = vld [vmem:[%s2914_s5 + $0x38] sm:$0xff] }
 0x13c   :  { %v656_v51 = vld [vmem:[%s2914_s5 + $0x30] sm:$0xff] }
 0x13d   :  { %1587 = vrcp.f32 %v77_v60  ;;  %v120_v60 = vld [vmem:[%s2911_s3 + $0xf0] sm:$0xff] }
 0x143   :  { %v1586_v62 = vpop.eup %1585 }
 0x144   :  { %v79_v1 = vmul.f32 %v1586_v62, %v74_v63  ;;  %v151_v62 = vld [vmem:[%s2911_s3 + $0x1e8] sm:$0xff]  ;;  %v137_v63 = vld [vmem:[%s2911_s3 + $0x178] sm:$0xff] }
 0x145   :  { %v184_v5 = vpack.c.bf16 %v151_v62, %v135_v61  ;;  %v925_v61 = vpack.c.bf16 %v657_v52, %v656_v51  ;;  %v2086_v52 = vld [vmem:[%s2915_s4 + $0x8] sm:$0xff] }
 0x146   :  { %v88_v13 = vadd.f32 %v1394_v3, %v79_v1  ;;  %v167_v1 = vpack.c.bf16 %v118_v56, %v102_v55  ;;  %v688_v55 = vld [vmem:[%s2914_s5 + $0x130] sm:$0xff]  ;;  %v689_v56 = vld [vmem:[%s2914_s5 + $0x138] sm:$0xff] }
 0x147   :  { %v1588_v2 = vpop.eup %1587  ;;  %v941_v62 = vpack.c.bf16 %v689_v56, %v688_v55  ;;  %v187_v56 = vld [vmem:[%s2915_s4] sm:$0xff] }
 0x148   :  { %v81_v7 = vmul.f32 %v1588_v2, %v75_v0  ;;  %v153_v0 = vld [vmem:[%s2911_s3 + $0x1f8] sm:$0xff]  ;;  %v169_v2 = vpack.c.bf16 %v120_v60, %v104_v59  ;;  %v706_v59 = vld [vmem:[%s2914_s5 + $0x1c0] sm:$0xff]  ;;  %v707_v60 = vld [vmem:[%s2914_s5 + $0x1c8] sm:$0xff] }
 0x14a   :  { %v89_v14 = vadd.f32 %v1394_v3, %v81_v7  ;;  %v134_v3 = vld [vmem:[%s2911_s3 + $0x160] sm:$0xff]  ;;  %v186_v7 = vpack.c.bf16 %v153_v0, %v137_v63  ;;  %v659_v0 = vld [vmem:[%s2914_s5 + $0x48] sm:$0xff] }
 0x14b   :  { %v658_v63 = vld [vmem:[%s2914_s5 + $0x40] sm:$0xff] }
 0x14c   :  { %v1750_v19 = vpack.c.bf16 %v89_v14, %v88_v13  ;;  %v183_v13 = vpack.c.bf16 %v150_v4, %v134_v3  ;;  %v185_v14 = vpack.c.bf16 %v152_v8, %v136_v6  ;;  %v690_v3 = vld [vmem:[%s2914_s5 + $0x140] sm:$0xff]  ;;  %v691_v4 = vld [vmem:[%s2914_s5 + $0x148] sm:$0xff]  ;;  %v708_v6 = vld [vmem:[%s2914_s5 + $0x1d0] sm:$0xff]  ;;  %v926_v9 = vpack.c.bf16 %v659_v0, %v658_v63 }
 0x14d   :  { %v709_v8 = vld [vmem:[%s2914_s5 + $0x1d8] sm:$0xff]  ;;  %v942_v10 = vpack.c.bf16 %v691_v4, %v690_v3  ;;  %v2117_v3 = vld [vmem:[%s2914_s5 + $0x208] sm:$0xff]  ;;  %v2122_v4 = vld [vmem:[%s2914_s5 + $0x300] sm:$0xff] }
 0x14e   :  { %1395 = vmatmul.mubr.msk.bf16.vlgmr.msra.gmra.mrb[0].mxu0 %vm31_vm0, %v1750_v19  ;;  %1396 = vmatmul.mubr.msk.bf16.vlgmr.msra.gmra.mrb[0].mxu1 %vm31_vm0, %v1750_v19 }
 0x14f   :  { %361 = vmatpush1.bf16.msra.mxu0 %v159_v15  ;;  %404 = vmatpush1.bf16.msra.mxu1 %v161_v16  ;;  %v650_v15 = vld [vmem:[%s2914_s5] sm:$0xff]  ;;  %v651_v16 = vld [vmem:[%s2914_s5 + $0x8] sm:$0xff] }
 0x150   :  { %362 = vmatprep.subr.bf16.mxu0 %v176_v20  ;;  %405 = vmatprep.subr.bf16.mxu1 %v178_v21  ;;  %v682_v20 = vld [vmem:[%s2914_s5 + $0x100] sm:$0xff]  ;;  %v683_v21 = vld [vmem:[%s2914_s5 + $0x108] sm:$0xff]  ;;  %v922_v26 = vpack.c.bf16 %v651_v16, %v650_v15  ;;  %v692_v15 = vld [vmem:[%s2914_s5 + $0x150] sm:$0xff] }
 0x151   :  { %392 = vmatprep.mubr.bf16.mxu0 %v1591_v37  ;;  %435 = vmatprep.mubr.bf16.mxu1 %v1591_v37  ;;  %v938_v27 = vpack.c.bf16 %v683_v21, %v682_v20  ;;  %v693_v16 = vld [vmem:[%s2914_s5 + $0x158] sm:$0xff]  ;;  %v678_v20 = vld [vmem:[%s2914_s5 + $0xe0] sm:$0xff]  ;;  %v679_v21 = vld [vmem:[%s2914_s5 + $0xe8] sm:$0xff] }
 0x153   :  { %363 = vmatpush1.bf16.msra.mxu0 %v175_v28  ;;  %406 = vmatpush1.bf16.msra.mxu1 %v177_v29  ;;  %v653_v28 = vld [vmem:[%s2914_s5 + $0x18] sm:$0xff]  ;;  %v931_v29 = vpack.c.bf16 %v669_v23, %v668_v22  ;;  %v710_v22 = vld [vmem:[%s2914_s5 + $0x1e0] sm:$0xff]  ;;  %v936_v23 = vpack.c.bf16 %v679_v21, %v678_v20 }
 0x154   :  { %446 = vmatprep.subr.bf16.mxu0 %v164_v32  ;;  %489 = vmatprep.subr.bf16.mxu1 %v166_v33  ;;  %v685_v32 = vld [vmem:[%s2914_s5 + $0x118] sm:$0xff]  ;;  %v670_v33 = vld [vmem:[%s2914_s5 + $0xa0] sm:$0xff] }
 0x155   :  { %v939_v39 = vpack.c.bf16 %v685_v32, %v684_v31  ;;  %v680_v31 = vld [vmem:[%s2914_s5 + $0xf0] sm:$0xff]  ;;  %v681_v32 = vld [vmem:[%s2914_s5 + $0xf8] sm:$0xff] }
 0x156   :  { %1397 = vmatmul.mubr.msk.bf16.vlgmr.msra.gmra.mrb[4].mxu0 %vm31_vm0, %v1750_v19  ;;  %1398 = vmatmul.mubr.msk.bf16.vlgmr.msra.gmra.mrb[4].mxu1 %vm31_vm0, %v1750_v19 }
 0x157   :  { %447 = vmatpush1.bf16.msra.mxu0 %v163_v41  ;;  %490 = vmatpush1.bf16.msra.mxu1 %v165_v42  ;;  %v655_v41 = vld [vmem:[%s2914_s5 + $0x28] sm:$0xff]  ;;  %v932_v42 = vpack.c.bf16 %v671_v34, %v670_v33  ;;  %v712_v33 = vld [vmem:[%s2914_s5 + $0x1f0] sm:$0xff]  ;;  %v937_v34 = vpack.c.bf16 %v681_v32, %v680_v31 }
 0x158   :  { %448 = vmatprep.subr.bf16.mxu0 %v180_v45  ;;  %491 = vmatprep.subr.bf16.mxu1 %v182_v46  ;;  %v672_v45 = vld [vmem:[%s2914_s5 + $0xb0] sm:$0xff]  ;;  %v673_v46 = vld [vmem:[%s2914_s5 + $0xb8] sm:$0xff]  ;;  %v924_v49 = vpack.c.bf16 %v655_v41, %v654_v40 }
 0x159   :  { %478 = vmatprep.mubr.bf16.mxu0 %v1591_v37  ;;  %521 = vmatprep.mubr.bf16.mxu1 %v1591_v37  ;;  %v696_v41 = vld [vmem:[%s2914_s5 + $0x170] sm:$0xff] }
 0x15b   :  { %449 = vmatpush1.bf16.msra.mxu0 %v179_v53  ;;  %492 = vmatpush1.bf16.msra.mxu1 %v181_v54  ;;  %v933_v53 = vpack.c.bf16 %v673_v46, %v672_v45  ;;  %v949_v54 = vpack.c.bf16 %v705_v48, %v704_v47  ;;  %v762_v45 = vld [vmem:[%s2914_s5 + $0x380] sm:$0xff]  ;;  %v763_v47 = vld [vmem:[%s2914_s5 + $0x388] sm:$0xff] }
 0x15c   :  { %532 = vmatprep.subr.bf16.mxu0 %v168_v57  ;;  %575 = vmatprep.subr.bf16.mxu1 %v170_v58  ;;  %v674_v57 = vld [vmem:[%s2914_s5 + $0xc0] sm:$0xff]  ;;  %v675_v58 = vld [vmem:[%s2914_s5 + $0xc8] sm:$0xff]  ;;  %v978_v48 = vpack.c.bf16 %v763_v47, %v762_v45 }
 0x15d   :  { %v2203_v45 = vld [vmem:[%s2914_s5 + $0x2a8] sm:$0xff] }
 0x15e   :  { %1399 = vmatmul.mubr.msk.bf16.vlgmr.msra.gmra.mrb[8].mxu0 %vm31_vm0, %v1750_v19  ;;  %1400 = vmatmul.mubr.msk.bf16.vlgmr.msra.gmra.mrb[8].mxu1 %vm31_vm0, %v1750_v19 }
 0x15f   :  { %533 = vmatpush1.bf16.msra.mxu0 %v167_v1  ;;  %576 = vmatpush1.bf16.msra.mxu1 %v169_v2  ;;  %v934_v1 = vpack.c.bf16 %v675_v58, %v674_v57  ;;  %v950_v2 = vpack.c.bf16 %v707_v60, %v706_v59 }
 0x160   :  { %534 = vmatprep.subr.bf16.mxu0 %v184_v5  ;;  %577 = vmatprep.subr.bf16.mxu1 %v186_v7  ;;  %v676_v5 = vld [vmem:[%s2914_s5 + $0xd0] sm:$0xff]  ;;  %v677_v7 = vld [vmem:[%s2914_s5 + $0xd8] sm:$0xff] }
 0x161   :  { %564 = vmatprep.mubr.bf16.mxu0 %v1591_v37  ;;  %607 = vmatprep.mubr.bf16.mxu1 %v1591_v37  ;;  %v652_v37 = vld [vmem:[%s2914_s5 + $0x10] sm:$0xff]  ;;  %v935_v12 = vpack.c.bf16 %v677_v7, %v676_v5  ;;  %v2127_v5 = vld [vmem:[%s2914_s5 + $0x308] sm:$0xff] }
 0x162   :  { %v923_v38 = vpack.c.bf16 %v653_v28, %v652_v37  ;;  %v694_v28 = vld [vmem:[%s2914_s5 + $0x160] sm:$0xff]  ;;  %v2132_v7 = vld [vmem:[%s2914_s5 + $0x290] sm:$0xff] }
 0x163   :  { %535 = vmatpush1.bf16.msra.mxu0 %v183_v13  ;;  %578 = vmatpush1.bf16.msra.mxu1 %v185_v14  ;;  %v951_v13 = vpack.c.bf16 %v709_v8, %v708_v6  ;;  %v661_v14 = vld [vmem:[%s2914_s5 + $0x58] sm:$0xff] }
 0x164   :  { %1404 = vmatprep.subr.bf16.mxu0 %v930_v17  ;;  %1426 = vmatprep.subr.bf16.mxu1 %v946_v18  ;;  %v927_v17 = vpack.c.bf16 %v661_v14, %v660_v11  ;;  %v943_v18 = vpack.c.bf16 %v693_v16, %v692_v15  ;;  %v2137_v6 = vld [vmem:[%s2914_s5 + $0x298] sm:$0xff]  ;;  %v2158_v14 = vld [vmem:[%s2914_s5 + $0x210] sm:$0xff] }
 0x166   :  { %1401 = vmatmul.mubr.msk.bf16.vlgmr.msra.gmra.mrb[12].mxu0 %vm31_vm0, %v1750_v19  ;;  %1402 = vmatmul.mubr.msk.bf16.vlgmr.msra.gmra.mrb[12].mxu1 %vm31_vm0, %v1750_v19  ;;  %v686_v19 = vld [vmem:[%s2914_s5 + $0x120] sm:$0xff] }
 0x167   :  { %1405 = vmatpush3.bf16.msra.mxu0 %v922_v26  ;;  %1427 = vmatpush3.bf16.msra.mxu1 %v938_v27  ;;  %v940_v50 = vpack.c.bf16 %v687_v44, %v686_v19  ;;  %v663_v26 = vld [vmem:[%s2914_s5 + $0x68] sm:$0xff]  ;;  %v952_v27 = vpack.c.bf16 %v711_v24, %v710_v22  ;;  %v730_v19 = vld [vmem:[%s2914_s5 + $0x280] sm:$0xff]  ;;  %v2171_v22 = vld [vmem:[%s2914_s5 + $0x218] sm:$0xff] }
 0x168   :  { %1406 = vmatprep.subr.bf16.mxu0 %v931_v29  ;;  %1428 = vmatprep.subr.bf16.mxu1 %v947_v30  ;;  %v928_v37 = vpack.c.bf16 %v663_v26, %v662_v25  ;;  %v695_v29 = vld [vmem:[%s2914_s5 + $0x168] sm:$0xff]  ;;  %v2181_v24 = vld [vmem:[%s2914_s5 + $0x318] sm:$0xff] }
 0x169   :  { %v944_v30 = vpack.c.bf16 %v695_v29, %v694_v28  ;;  %v731_v44 = vld [vmem:[%s2914_s5 + $0x288] sm:$0xff]  ;;  %v970_v29 = vpack.c.bf16 %v2127_v5, %v2122_v4  ;;  %v2228_v4 = vld [vmem:[%s2914_s5 + $0x220] sm:$0xff] }
 0x16a   :  { %v962_v46 = vpack.c.bf16 %v731_v44, %v730_v19  ;;  %v2198_v44 = vld [vmem:[%s2914_s5 + $0x2a0] sm:$0xff]  ;;  %v2233_v5 = vld [vmem:[%s2914_s5 + $0x228] sm:$0xff] }
 0x16b   :  { %1407 = vmatpush3.bf16.msra.mxu0 %v923_v38  ;;  %1429 = vmatpush3.bf16.msra.mxu1 %v939_v39  ;;  %v665_v38 = vld [vmem:[%s2914_s5 + $0x78] sm:$0xff]  ;;  %v953_v39 = vpack.c.bf16 %v713_v35, %v712_v33 }
 0x16c   :  { %1408 = vmatprep.subr.bf16.mxu0 %v932_v42  ;;  %1430 = vmatprep.subr.bf16.mxu1 %v948_v43  ;;  %v929_v40 = vpack.c.bf16 %v665_v38, %v664_v36  ;;  %v697_v42 = vld [vmem:[%s2914_s5 + $0x178] sm:$0xff] }
 0x16d   :  { %v945_v43 = vpack.c.bf16 %v697_v42, %v696_v41 }
 0x16f   :  { %1409 = vmatpush3.bf16.msra.mxu0 %v924_v49  ;;  %1431 = vmatpush3.bf16.msra.mxu1 %v940_v50  ;;  %v191_v49 = vlaneseq }
 0x170   :  { %1410 = vmatprep.subr.bf16.mxu0 %v933_v53  ;;  %1432 = vmatprep.subr.bf16.mxu1 %v949_v54 }
 0x171   :  { %v2080_v50 = vshrl.u32 %v191_v49, 7 }
 0x173   :  { %1411 = vmatpush3.bf16.msra.mxu0 %v925_v61  ;;  %1433 = vmatpush3.bf16.msra.mxu1 %v941_v62  ;;  %v217_v51 = vsub.s32 6, %v2080_v50  ;;  %v193_v54 = vsub.s32 0, %v2080_v50  ;;  %v201_v55 = vsub.s32 2, %v2080_v50  ;;  %v197_v57 = vsub.s32 1, %v2080_v50 }
 0x174   :  { %1412 = vmatprep.subr.bf16.mxu0 %v934_v1  ;;  %1434 = vmatprep.subr.bf16.mxu1 %v950_v2  ;;  %v205_v58 = vsub.s32 3, %v2080_v50  ;;  %v209_v59 = vsub.s32 4, %v2080_v50  ;;  %v213_v62 = vsub.s32 5, %v2080_v50  ;;  %v221_v63 = vsub.s32 7, %v2080_v50  ;;  %v2112_v2 = vld [vmem:[%s2914_s5 + $0x200] sm:$0xff] }
 0x175   :  { %v2089_v53 = vrot.slane %v2086_v52, %v217_v51  ;;  %v194_v60 = vrot.slane %v187_v56, %v193_v54  ;;  %v202_v61 = vrot.slane %v187_v56, %v201_v55  ;;  %v198_v0 = vrot.slane %v187_v56, %v197_v57 }
 0x176   :  { %v206_v1 = vrot.slane %v187_v56, %v205_v58  ;;  %v2143_v11 = vrot.slane %v187_v56, %v217_v51  ;;  %v2162_v20 = vrot.slane %v187_v56, %v213_v62  ;;  %v2166_v21 = vrot.slane %v187_v56, %v221_v63  ;;  %v2208_v51 = vld [vmem:[%s2914_s5 + $0x3a0] sm:$0xff] }
 0x177   :  { %1413 = vmatpush3.bf16.msra.mxu0 %v926_v9  ;;  %1435 = vmatpush3.bf16.msra.mxu1 %v942_v10  ;;  %v2141_v10 = vrot.slane %v187_v56, %v209_v59  ;;  %v954_v28 = vpack.c.bf16 %v2117_v3, %v2112_v2  ;;  %v2213_v56 = vld [vmem:[%s2914_s5 + $0x3a8] sm:$0xff] }
 0x178   :  { %1414 = vmatprep.subr.bf16.mxu0 %v935_v12  ;;  %1436 = vmatprep.subr.bf16.mxu1 %v951_v13  ;;  %v2148_v12 = vld [vmem:[%s2914_s5 + $0x390] sm:$0xff]  ;;  %v2153_v13 = vld [vmem:[%s2914_s5 + $0x398] sm:$0xff] }
 0x179   :  { %v979_v35 = vpack.c.bf16 %v2153_v13, %v2148_v12 }
 0x17b   :  { %1415 = vmatpush3.bf16.msra.mxu0 %v927_v17  ;;  %1437 = vmatpush3.bf16.msra.mxu1 %v943_v18 }
 0x17c   :  { %1416 = vmatprep.subr.bf16.mxu0 %v936_v23  ;;  %1438 = vmatprep.subr.bf16.mxu1 %v952_v27  ;;  %v2176_v23 = vld [vmem:[%s2914_s5 + $0x310] sm:$0xff] }
 0x17f   :  { %1417 = vmatpush3.bf16.msra.mxu0 %v928_v37  ;;  %1439 = vmatpush3.bf16.msra.mxu1 %v944_v30 }
 0x180   :  { %1418 = vmatprep.subr.bf16.mxu0 %v937_v34  ;;  %1440 = vmatprep.subr.bf16.mxu1 %v953_v39  ;;  %v963_v34 = vpack.c.bf16 %v2137_v6, %v2132_v7  ;;  %v955_v39 = vpack.c.bf16 %v2171_v22, %v2158_v14 }
 0x183   :  { %1419 = vmatpush3.bf16.msra.mxu0 %v929_v40  ;;  %1441 = vmatpush3.bf16.msra.mxu1 %v945_v43  ;;  %v971_v40 = vpack.c.bf16 %v2181_v24, %v2176_v23 }
 0x184   :  { %1448 = vmatprep.subr.bf16.mxu0 %v962_v46  ;;  %1470 = vmatprep.subr.bf16.mxu1 %v978_v48 }
 0x221   :  { %v308_v8 = vpop.f32.mrb[0].mxu0  ;;  %v351_v9 = vpop.f32.mrb[0].mxu1 }
 0x222   :  { %v309_v15 = vadd.f32 %v308_v8, %v194_v60  ;;  %v352_v16 = vadd.f32 %v351_v9, %v202_v61  ;;  %v310_v17 = vpop.f32.mrb[1].mxu0  ;;  %v353_v18 = vpop.f32.mrb[1].mxu1 }
 0x223   :  { %v311_v25 = vadd.f32 %v310_v17, %v198_v0  ;;  %v354_v26 = vadd.f32 %v353_v18, %v206_v1  ;;  %v312_v27 = vpop.f32.mrb[2].mxu0  ;;  %v355_v37 = vpop.f32.mrb[2].mxu1  ;;  %v2248_v17 = vld [vmem:[%s2914_s5 + $0x320] sm:$0xff]  ;;  %v2253_v18 = vld [vmem:[%s2914_s5 + $0x328] sm:$0xff] }
 0x224   :  { %v313_v30 = vadd.f32 %v312_v27, %v194_v60  ;;  %v356_v31 = vadd.f32 %v355_v37, %v202_v61  ;;  %v314_v32 = vpop.f32.mrb[3].mxu0  ;;  %v357_v33 = vpop.f32.mrb[3].mxu1  ;;  %v618_v41 = vmax.f32 %v309_v15, 0.0  ;;  %v620_v42 = vmax.f32 %v352_v16, 0.0 }
 0x225   :  { %v315_v36 = vadd.f32 %v314_v32, %v198_v0  ;;  %v358_v38 = vadd.f32 %v357_v33, %v206_v1  ;;  %v619_v46 = vmax.f32 %v311_v25, 0.0  ;;  %v621_v47 = vmax.f32 %v354_v26, 0.0 }
 0x226   :  { %v634_v43 = vmax.f32 %v313_v30, 0.0  ;;  %v636_v19 = vmax.f32 %v356_v31, 0.0  ;;  %v2218_v0 = vrot.slane %v2086_v52, %v193_v54  ;;  %v2223_v1 = vrot.slane %v2086_v52, %v201_v55  ;;  %v2264_v30 = vld [vmem:[%s2914_s5 + $0x2b0] sm:$0xff]  ;;  %v2269_v31 = vld [vmem:[%s2914_s5 + $0x2b8] sm:$0xff] }
 0x227   :  { %v635_v48 = vmax.f32 %v315_v36, 0.0  ;;  %v637_v49 = vmax.f32 %v358_v38, 0.0  ;;  %v2238_v16 = vrot.slane %v2086_v52, %v197_v57  ;;  %v2243_v55 = vrot.slane %v2086_v52, %v205_v58 }
 0x228   :  { %v906_v60 = vpack.c.bf16 %v634_v43, %v618_v41  ;;  %v908_v61 = vpack.c.bf16 %v636_v19, %v620_v42  ;;  %v964_v58 = vpack.c.bf16 %v2203_v45, %v2198_v44  ;;  %v980_v37 = vpack.c.bf16 %v2213_v56, %v2208_v51  ;;  %v2320_v51 = vld [vmem:[%s2914_s5 + $0x338] sm:$0xff] }
 0x229   :  { %v907_v8 = vpack.c.bf16 %v635_v48, %v619_v46  ;;  %v909_v9 = vpack.c.bf16 %v637_v49, %v621_v47  ;;  %v394_v15 = vpop.f32.mrb[4].mxu0  ;;  %v437_v54 = vpop.f32.mrb[4].mxu1  ;;  %v956_v41 = vpack.c.bf16 %v2233_v5, %v2228_v4  ;;  %v972_v45 = vpack.c.bf16 %v2253_v18, %v2248_v17  ;;  %v2282_v46 = vld [vmem:[%s2914_s5 + $0x3b0] sm:$0xff]  ;;  %v2341_v17 = vld [vmem:[%s2914_s5 + $0x2c0] sm:$0xff]  ;;  %v2346_v18 = vld [vmem:[%s2914_s5 + $0x2c8] sm:$0xff] }
 0x22a   :  { %v395_v25 = vadd.f32 %v394_v15, %v2141_v10  ;;  %v438_v57 = vadd.f32 %v437_v54, %v2143_v11  ;;  %v396_v26 = vpop.f32.mrb[5].mxu0  ;;  %v439_v27 = vpop.f32.mrb[5].mxu1  ;;  %v2299_v49 = vld [vmem:[%s2914_s5 + $0x230] sm:$0xff]  ;;  %v741_v5 = vld [vmem:[%s2914_s5 + $0x2d8] sm:$0xff] }
 0x22b   :  { %v397_v32 = vadd.f32 %v396_v26, %v2162_v20  ;;  %v440_v33 = vadd.f32 %v439_v27, %v2166_v21  ;;  %v398_v36 = vpop.f32.mrb[6].mxu0  ;;  %v441_v38 = vpop.f32.mrb[6].mxu1  ;;  %1089 = vmatprep.mubr.bf16.mxu0 %v907_v8  ;;  %1130 = vmatprep.mubr.bf16.mxu1 %v909_v9  ;;  %v740_v4 = vld [vmem:[%s2914_s5 + $0x2d0] sm:$0xff] }
 0x22c   :  { %v399_v42 = vadd.f32 %v398_v36, %v2141_v10  ;;  %v442_v43 = vadd.f32 %v441_v38, %v2143_v11  ;;  %v400_v19 = vpop.f32.mrb[7].mxu0  ;;  %v443_v44 = vpop.f32.mrb[7].mxu1  ;;  %1090 = vmatmul.mubr.bf16.vlgmr.msra.gmra.mrb[16].mxu0 %v906_v60  ;;  %1131 = vmatmul.mubr.bf16.vlgmr.msra.gmra.mrb[16].mxu1 %v908_v61  ;;  %v965_v10 = vpack.c.bf16 %v2269_v31, %v2264_v30  ;;  %v2294_v11 = vld [vmem:[%s2914_s5 + $0x3b8] sm:$0xff]  ;;  %v622_v2 = vmax.f32 %v395_v25, 0.0  ;;  %v771_v25 = vld [vmem:[%s2914_s5 + $0x3c8] sm:$0xff] }
 0x22d   :  { %v401_v47 = vadd.f32 %v400_v19, %v2162_v20  ;;  %v444_v48 = vadd.f32 %v443_v44, %v2166_v21  ;;  %1449 = vmatpush3.bf16.msra.mxu0 %v954_v28  ;;  %1471 = vmatpush3.bf16.msra.mxu1 %v970_v29  ;;  %v2304_v20 = vld [vmem:[%s2914_s5 + $0x238] sm:$0xff]  ;;  %v624_v3 = vmax.f32 %v438_v57, 0.0  ;;  %v2315_v29 = vld [vmem:[%s2914_s5 + $0x330] sm:$0xff]  ;;  %v623_v56 = vmax.f32 %v397_v32, 0.0 }
 0x22e   :  { %v638_v21 = vmax.f32 %v399_v42, 0.0  ;;  %v640_v28 = vmax.f32 %v442_v43, 0.0  ;;  %1450 = vmatprep.subr.bf16.mxu0 %v963_v34  ;;  %1472 = vmatprep.subr.bf16.mxu1 %v979_v35  ;;  %v625_v60 = vmax.f32 %v440_v33, 0.0  ;;  %v981_v12 = vpack.c.bf16 %v2294_v11, %v2282_v46  ;;  %v2380_v43 = vld [vmem:[%s2914_s5 + $0x240] sm:$0xff]  ;;  %v773_v30 = vld [vmem:[%s2914_s5 + $0x3d8] sm:$0xff] }
 0x22f   :  { %v639_v61 = vmax.f32 %v401_v47, 0.0  ;;  %v641_v8 = vmax.f32 %v444_v48, 0.0  ;;  %v957_v13 = vpack.c.bf16 %v2304_v20, %v2299_v49  ;;  %v973_v54 = vpack.c.bf16 %v2320_v51, %v2315_v29  ;;  %v772_v48 = vld [vmem:[%s2914_s5 + $0x3d0] sm:$0xff] }
 0x230   :  { %v2322_v7 = vpack.c.bf16 %v638_v21, %v622_v2  ;;  %v2324_v6 = vpack.c.bf16 %v640_v28, %v624_v3  ;;  %v2373_v38 = vrot.slane %v2086_v52, %v221_v63  ;;  %v966_v42 = vpack.c.bf16 %v2346_v18, %v2341_v17  ;;  %v754_v63 = vld [vmem:[%s2914_s5 + $0x340] sm:$0xff]  ;;  %v724_v3 = vld [vmem:[%s2914_s5 + $0x250] sm:$0xff]  ;;  %v725_v21 = vld [vmem:[%s2914_s5 + $0x258] sm:$0xff] }
 0x231   :  { %v911_v34 = vpack.c.bf16 %v639_v61, %v623_v56  ;;  %v913_v35 = vpack.c.bf16 %v641_v8, %v625_v60  ;;  %1451 = vmatpush3.bf16.msra.mxu0 %v955_v39  ;;  %1473 = vmatpush3.bf16.msra.mxu1 %v971_v40  ;;  %v480_v9 = vpop.f32.mrb[8].mxu0  ;;  %v523_v15 = vpop.f32.mrb[8].mxu1  ;;  %v2353_v39 = vrot.slane %v2086_v52, %v209_v59  ;;  %v770_v40 = vld [vmem:[%s2914_s5 + $0x3c0] sm:$0xff]  ;;  %v756_v28 = vld [vmem:[%s2914_s5 + $0x350] sm:$0xff]  ;;  %v757_v8 = vld [vmem:[%s2914_s5 + $0x358] sm:$0xff] }
 0x232   :  { %v481_v14 = vadd.f32 %v480_v9, %v2218_v0  ;;  %v524_v22 = vadd.f32 %v523_v15, %v2223_v1  ;;  %v482_v23 = vpop.f32.mrb[9].mxu0  ;;  %v525_v24 = vpop.f32.mrb[9].mxu1  ;;  %1452 = vmatprep.subr.bf16.mxu0 %v964_v58  ;;  %1474 = vmatprep.subr.bf16.mxu1 %v980_v37  ;;  %v2366_v59 = vrot.slane %v2086_v52, %v213_v62  ;;  %v723_v52 = vld [vmem:[%s2914_s5 + $0x248] sm:$0xff]  ;;  %v774_v15 = vld [vmem:[%s2914_s5 + $0x3e0] sm:$0xff] }
 0x233   :  { %v483_v57 = vadd.f32 %v482_v23, %v2238_v16  ;;  %v526_v26 = vadd.f32 %v525_v24, %v2243_v55  ;;  %v484_v27 = vpop.f32.mrb[10].mxu0  ;;  %v527_v58 = vpop.f32.mrb[10].mxu1  ;;  %1171 = vmatprep.mubr.bf16.mxu0 %v911_v34  ;;  %1212 = vmatprep.mubr.bf16.mxu1 %v913_v35  ;;  %v982_v50 = vpack.c.bf16 %v771_v25, %v770_v40  ;;  %v743_v34 = vld [vmem:[%s2914_s5 + $0x2e8] sm:$0xff] }
 0x234   :  { %v485_v37 = vadd.f32 %v484_v27, %v2218_v0  ;;  %v528_v32 = vadd.f32 %v527_v58, %v2223_v1  ;;  %v486_v33 = vpop.f32.mrb[11].mxu0  ;;  %v529_v36 = vpop.f32.mrb[11].mxu1  ;;  %v755_v1 = vld [vmem:[%s2914_s5 + $0x348] sm:$0xff]  ;;  %v958_v11 = vpack.c.bf16 %v723_v52, %v2380_v43  ;;  %v967_v61 = vpack.c.bf16 %v741_v5, %v740_v4  ;;  %v726_v58 = vld [vmem:[%s2914_s5 + $0x260] sm:$0xff] }
 0x235   :  { %v487_v62 = vadd.f32 %v486_v33, %v2238_v16  ;;  %v530_v0 = vadd.f32 %v529_v36, %v2243_v55  ;;  %1453 = vmatpush3.bf16.msra.mxu0 %v956_v41  ;;  %1475 = vmatpush3.bf16.msra.mxu1 %v972_v45  ;;  %v626_v16 = vmax.f32 %v481_v14, 0.0  ;;  %v628_v55 = vmax.f32 %v524_v22, 0.0  ;;  %v759_v36 = vld [vmem:[%s2914_s5 + $0x368] sm:$0xff] }
 0x236   :  { %v642_v19 = vmax.f32 %v485_v37, 0.0  ;;  %v644_v44 = vmax.f32 %v528_v32, 0.0  ;;  %1454 = vmatprep.subr.bf16.mxu0 %v965_v10  ;;  %1476 = vmatprep.subr.bf16.mxu1 %v981_v12  ;;  %v627_v41 = vmax.f32 %v483_v57, 0.0  ;;  %v629_v45 = vmax.f32 %v526_v26, 0.0  ;;  %v742_v12 = vld [vmem:[%s2914_s5 + $0x2e0] sm:$0xff] }
 0x237   :  { %v643_v46 = vmax.f32 %v487_v62, 0.0  ;;  %v645_v47 = vmax.f32 %v530_v0, 0.0  ;;  %v974_v2 = vpack.c.bf16 %v755_v1, %v754_v63  ;;  %v983_v9 = vpack.c.bf16 %v773_v30, %v772_v48  ;;  %v745_v0 = vld [vmem:[%s2914_s5 + $0x2f8] sm:$0xff] }
 0x238   :  { %v2411_v31 = vpack.c.bf16 %v642_v19, %v626_v16  ;;  %v2413_v10 = vpack.c.bf16 %v644_v44, %v628_v55  ;;  %v959_v23 = vpack.c.bf16 %v725_v21, %v724_v3  ;;  %v975_v26 = vpack.c.bf16 %v757_v8, %v756_v28  ;;  %v776_v16 = vld [vmem:[%s2914_s5 + $0x3f0] sm:$0xff]  ;;  %v777_v55 = vld [vmem:[%s2914_s5 + $0x3f8] sm:$0xff]  ;;  %v794_v3 = vld [vmem:[%s2914_s5 + $0x480] sm:$0xff] }
 0x239   :  { %v2425_v29 = vpack.c.bf16 %v643_v46, %v627_v41  ;;  %v2427_v51 = vpack.c.bf16 %v645_v47, %v629_v45  ;;  %1455 = vmatpush3.bf16.msra.mxu0 %v957_v13  ;;  %1477 = vmatpush3.bf16.msra.mxu1 %v973_v54  ;;  %v566_v56 = vpop.f32.mrb[12].mxu0  ;;  %v609_v60 = vpop.f32.mrb[12].mxu1  ;;  %v775_v54 = vld [vmem:[%s2914_s5 + $0x3e8] sm:$0xff]  ;;  %v968_v27 = vpack.c.bf16 %v743_v34, %v742_v12  ;;  %v728_v46 = vld [vmem:[%s2914_s5 + $0x270] sm:$0xff]  ;;  %v729_v47 = vld [vmem:[%s2914_s5 + $0x278] sm:$0xff] }
 0x23a   :  { %v567_v35 = vadd.f32 %v566_v56, %v2353_v39  ;;  %v610_v49 = vadd.f32 %v609_v60, %v2089_v53  ;;  %v568_v20 = vpop.f32.mrb[13].mxu0  ;;  %v611_v13 = vpop.f32.mrb[13].mxu1  ;;  %1456 = vmatprep.subr.bf16.mxu0 %v966_v42  ;;  %1478 = vmatprep.subr.bf16.mxu1 %v982_v50  ;;  %v984_v33 = vpack.c.bf16 %v775_v54, %v774_v15  ;;  %v795_v21 = vld [vmem:[%s2914_s5 + $0x488] sm:$0xff]  ;;  %v826_v28 = vld [vmem:[%s2914_s5 + $0x580] sm:$0xff]  ;;  %v828_v15 = vld [vmem:[%s2914_s5 + $0x590] sm:$0xff] }
 0x23b   :  { %v569_v17 = vadd.f32 %v568_v20, %v2366_v59  ;;  %v612_v18 = vadd.f32 %v611_v13, %v2373_v38  ;;  %v570_v14 = vpop.f32.mrb[14].mxu0  ;;  %v613_v22 = vpop.f32.mrb[14].mxu1  ;;  %v985_v30 = vpack.c.bf16 %v777_v55, %v776_v16  ;;  %v827_v56 = vld [vmem:[%s2914_s5 + $0x588] sm:$0xff]  ;;  %v961_v60 = vpack.c.bf16 %v729_v47, %v728_v46  ;;  %v778_v34 = vld [vmem:[%s2914_s5 + $0x400] sm:$0xff]  ;;  %v796_v13 = vld [vmem:[%s2914_s5 + $0x490] sm:$0xff] }
 0x23c   :  { %v571_v24 = vadd.f32 %v570_v14, %v2353_v39  ;;  %v614_v40 = vadd.f32 %v613_v22, %v2089_v53  ;;  %v572_v25 = vpop.f32.mrb[15].mxu0  ;;  %v615_v57 = vpop.f32.mrb[15].mxu1  ;;  %v727_v39 = vld [vmem:[%s2914_s5 + $0x268] sm:$0xff]  ;;  %v758_v53 = vld [vmem:[%s2914_s5 + $0x360] sm:$0xff]  ;;  %v630_v42 = vmax.f32 %v567_v35, 0.0  ;;  %v632_v43 = vmax.f32 %v610_v49, 0.0 }
 0x23d   :  { %v573_v37 = vadd.f32 %v572_v25, %v2366_v59  ;;  %v616_v32 = vadd.f32 %v615_v57, %v2373_v38  ;;  %1457 = vmatpush3.bf16.msra.mxu0 %v958_v11  ;;  %1479 = vmatpush3.bf16.msra.mxu1 %v974_v2  ;;  %v744_v38 = vld [vmem:[%s2914_s5 + $0x2f0] sm:$0xff]  ;;  %v631_v50 = vmax.f32 %v569_v17, 0.0  ;;  %v633_v52 = vmax.f32 %v612_v18, 0.0  ;;  %v761_v2 = vld [vmem:[%s2914_s5 + $0x378] sm:$0xff]  ;;  %v779_v35 = vld [vmem:[%s2914_s5 + $0x408] sm:$0xff] }
 0x23e   :  { %v646_v59 = vmax.f32 %v571_v24, 0.0  ;;  %v648_v62 = vmax.f32 %v614_v40, 0.0  ;;  %1458 = vmatprep.subr.bf16.mxu0 %v967_v61  ;;  %1480 = vmatprep.subr.bf16.mxu1 %v983_v9  ;;  %v960_v4 = vpack.c.bf16 %v727_v39, %v726_v58  ;;  %v976_v45 = vpack.c.bf16 %v759_v36, %v758_v53  ;;  %v760_v11 = vld [vmem:[%s2914_s5 + $0x370] sm:$0xff]  ;;  %v810_v49 = vld [vmem:[%s2914_s5 + $0x500] sm:$0xff]  ;;  %v811_v20 = vld [vmem:[%s2914_s5 + $0x508] sm:$0xff] }
 0x23f   :  { %v647_v63 = vmax.f32 %v573_v37, 0.0  ;;  %v649_v1 = vmax.f32 %v616_v32, 0.0  ;;  %v969_v48 = vpack.c.bf16 %v745_v0, %v744_v38  ;;  %v977_v61 = vpack.c.bf16 %v761_v2, %v760_v11  ;;  %v797_v9 = vld [vmem:[%s2914_s5 + $0x498] sm:$0xff]  ;;  %v780_v14 = vld [vmem:[%s2914_s5 + $0x410] sm:$0xff]  ;;  %v798_v57 = vld [vmem:[%s2914_s5 + $0x4a0] sm:$0xff] }
 0x240   :  { %v2479_v19 = vpack.c.bf16 %v646_v59, %v630_v42  ;;  %v2481_v44 = vpack.c.bf16 %v648_v62, %v632_v43  ;;  %v994_v8 = vpack.c.bf16 %v795_v21, %v794_v3  ;;  %v1010_v12 = vpack.c.bf16 %v827_v56, %v826_v28  ;;  %v829_v54 = vld [vmem:[%s2914_s5 + $0x598] sm:$0xff]  ;;  %v831_v58 = vld [vmem:[%s2914_s5 + $0x5a8] sm:$0xff]  ;;  %v814_v39 = vld [vmem:[%s2914_s5 + $0x520] sm:$0xff] }
 0x241   :  { %v2483_v5 = vpack.c.bf16 %v647_v63, %v631_v50  ;;  %v2485_v41 = vpack.c.bf16 %v649_v1, %v633_v52  ;;  %1459 = vmatpush3.bf16.msra.mxu0 %v959_v23  ;;  %1481 = vmatpush3.bf16.msra.mxu1 %v975_v26  ;;  %v986_v17 = vpack.c.bf16 %v779_v35, %v778_v34  ;;  %v781_v22 = vld [vmem:[%s2914_s5 + $0x418] sm:$0xff]  ;;  %v812_v23 = vld [vmem:[%s2914_s5 + $0x510] sm:$0xff]  ;;  %v799_v26 = vld [vmem:[%s2914_s5 + $0x4a8] sm:$0xff] }
 0x242   :  { %1460 = vmatprep.subr.bf16.mxu0 %v968_v27  ;;  %1482 = vmatprep.subr.bf16.mxu1 %v984_v33  ;;  %v1002_v18 = vpack.c.bf16 %v811_v20, %v810_v49  ;;  %v995_v24 = vpack.c.bf16 %v797_v9, %v796_v13  ;;  %v1011_v40 = vpack.c.bf16 %v829_v54, %v828_v15  ;;  %v813_v25 = vld [vmem:[%s2914_s5 + $0x518] sm:$0xff]  ;;  %v830_v27 = vld [vmem:[%s2914_s5 + $0x5a0] sm:$0xff]  ;;  %v800_v53 = vld [vmem:[%s2914_s5 + $0x4b0] sm:$0xff] }
 0x243   :  { %v987_v37 = vpack.c.bf16 %v781_v22, %v780_v14  ;;  %v1003_v32 = vpack.c.bf16 %v813_v25, %v812_v23  ;;  %v996_v33 = vpack.c.bf16 %v799_v26, %v798_v57  ;;  %v801_v36 = vld [vmem:[%s2914_s5 + $0x4b8] sm:$0xff]  ;;  %v832_v42 = vld [vmem:[%s2914_s5 + $0x5b0] sm:$0xff]  ;;  %v802_v16 = vld [vmem:[%s2914_s5 + $0x4c0] sm:$0xff] }
 0x244   :  { %v833_v43 = vld [vmem:[%s2914_s5 + $0x5b8] sm:$0xff]  ;;  %v997_v38 = vpack.c.bf16 %v801_v36, %v800_v53  ;;  %v784_v0 = vld [vmem:[%s2914_s5 + $0x430] sm:$0xff]  ;;  %v803_v55 = vld [vmem:[%s2914_s5 + $0x4c8] sm:$0xff] }
 0x245   :  { %1461 = vmatpush3.bf16.msra.mxu0 %v960_v4  ;;  %1483 = vmatpush3.bf16.msra.mxu1 %v976_v45  ;;  %v785_v50 = vld [vmem:[%s2914_s5 + $0x438] sm:$0xff]  ;;  %v816_v52 = vld [vmem:[%s2914_s5 + $0x530] sm:$0xff]  ;;  %v1013_v63 = vpack.c.bf16 %v833_v43, %v832_v42  ;;  %v834_v4 = vld [vmem:[%s2914_s5 + $0x5c0] sm:$0xff] }
 0x246   :  { %1462 = vmatprep.subr.bf16.mxu0 %v969_v48  ;;  %1484 = vmatprep.subr.bf16.mxu1 %v985_v30  ;;  %v817_v1 = vld [vmem:[%s2914_s5 + $0x538] sm:$0xff]  ;;  %v835_v45 = vld [vmem:[%s2914_s5 + $0x5c8] sm:$0xff]  ;;  %v989_v46 = vpack.c.bf16 %v785_v50, %v784_v0  ;;  %v998_v48 = vpack.c.bf16 %v803_v55, %v802_v16  ;;  %v786_v30 = vld [vmem:[%s2914_s5 + $0x440] sm:$0xff] }
 0x247   :  { %v1005_v47 = vpack.c.bf16 %v817_v1, %v816_v52  ;;  %v787_v11 = vld [vmem:[%s2914_s5 + $0x448] sm:$0xff]  ;;  %v818_v2 = vld [vmem:[%s2914_s5 + $0x540] sm:$0xff]  ;;  %v1014_v3 = vpack.c.bf16 %v835_v45, %v834_v4  ;;  %v804_v28 = vld [vmem:[%s2914_s5 + $0x4d0] sm:$0xff] }
 0x248   :  { %v819_v21 = vld [vmem:[%s2914_s5 + $0x548] sm:$0xff]  ;;  %v805_v56 = vld [vmem:[%s2914_s5 + $0x4d8] sm:$0xff]  ;;  %v788_v35 = vld [vmem:[%s2914_s5 + $0x450] sm:$0xff] }
 0x249   :  { %1463 = vmatpush3.bf16.msra.mxu0 %v961_v60  ;;  %1485 = vmatpush3.bf16.msra.mxu1 %v977_v61  ;;  %v836_v60 = vld [vmem:[%s2914_s5 + $0x5d0] sm:$0xff]  ;;  %v837_v61 = vld [vmem:[%s2914_s5 + $0x5d8] sm:$0xff]  ;;  %v999_v34 = vpack.c.bf16 %v805_v56, %v804_v28  ;;  %v806_v15 = vld [vmem:[%s2914_s5 + $0x4e0] sm:$0xff] }
 0x24a   :  { %1492 = vmatprep.subr.bf16.mxu0 %v994_v8  ;;  %1514 = vmatprep.subr.bf16.mxu1 %v1010_v12  ;;  %v990_v8 = vpack.c.bf16 %v787_v11, %v786_v30  ;;  %v1006_v12 = vpack.c.bf16 %v819_v21, %v818_v2  ;;  %v789_v49 = vld [vmem:[%s2914_s5 + $0x458] sm:$0xff]  ;;  %v820_v20 = vld [vmem:[%s2914_s5 + $0x550] sm:$0xff]  ;;  %v1015_v13 = vpack.c.bf16 %v837_v61, %v836_v60  ;;  %v807_v54 = vld [vmem:[%s2914_s5 + $0x4e8] sm:$0xff] }
 0x24b   :  { %v821_v9 = vld [vmem:[%s2914_s5 + $0x558] sm:$0xff]  ;;  %v991_v14 = vpack.c.bf16 %v789_v49, %v788_v35  ;;  %v1000_v23 = vpack.c.bf16 %v807_v54, %v806_v15  ;;  %v822_v25 = vld [vmem:[%s2914_s5 + $0x560] sm:$0xff]  ;;  %v823_v26 = vld [vmem:[%s2914_s5 + $0x568] sm:$0xff] }
 0x24c   :  { %1172 = vmatmul.mubr.bf16.vlgmr.msra.gmra.mrb[20].mxu0 %v2322_v7  ;;  %1213 = vmatmul.mubr.bf16.vlgmr.msra.gmra.mrb[20].mxu1 %v2324_v6  ;;  %v782_v7 = vld [vmem:[%s2914_s5 + $0x420] sm:$0xff]  ;;  %v783_v6 = vld [vmem:[%s2914_s5 + $0x428] sm:$0xff]  ;;  %v1007_v22 = vpack.c.bf16 %v821_v9, %v820_v20  ;;  %v825_v36 = vld [vmem:[%s2914_s5 + $0x578] sm:$0xff] }
 0x24d   :  { %1493 = vmatpush3.bf16.msra.mxu0 %v986_v17  ;;  %1253 = vmatprep.mubr.bf16.mxu0 %v2425_v29  ;;  %v1012_v29 = vpack.c.bf16 %v831_v58, %v830_v27  ;;  %v988_v59 = vpack.c.bf16 %v783_v6, %v782_v7  ;;  %v838_v17 = vld [vmem:[%s2914_s5 + $0x5e0] sm:$0xff]  ;;  %v808_v27 = vld [vmem:[%s2914_s5 + $0x4f0] sm:$0xff]  ;;  %v809_v58 = vld [vmem:[%s2914_s5 + $0x4f8] sm:$0xff]  ;;  %v1008_v7 = vpack.c.bf16 %v823_v26, %v822_v25 }
 0x24e   :  { %1515 = vmatpush3.bf16.msra.mxu1 %v1002_v18  ;;  %1294 = vmatprep.mubr.bf16.mxu1 %v2427_v51  ;;  %v815_v51 = vld [vmem:[%s2914_s5 + $0x528] sm:$0xff]  ;;  %v1001_v6 = vpack.c.bf16 %v809_v58, %v808_v27  ;;  %v858_v42 = vld [vmem:[%s2914_s5 + $0x680] sm:$0xff]  ;;  %v860_v4 = vld [vmem:[%s2914_s5 + $0x690] sm:$0xff] }
 0x24f   :  { %1494 = vmatprep.subr.bf16.mxu0 %v995_v24  ;;  %1516 = vmatprep.subr.bf16.mxu1 %v1011_v40  ;;  %v1004_v62 = vpack.c.bf16 %v815_v51, %v814_v39  ;;  %v839_v18 = vld [vmem:[%s2914_s5 + $0x5e8] sm:$0xff]  ;;  %v790_v24 = vld [vmem:[%s2914_s5 + $0x460] sm:$0xff]  ;;  %v792_v39 = vld [vmem:[%s2914_s5 + $0x470] sm:$0xff] }
 0x250   :  { %v791_v40 = vld [vmem:[%s2914_s5 + $0x468] sm:$0xff]  ;;  %v1016_v57 = vpack.c.bf16 %v839_v18, %v838_v17  ;;  %v824_v51 = vld [vmem:[%s2914_s5 + $0x570] sm:$0xff]  ;;  %v842_v52 = vld [vmem:[%s2914_s5 + $0x600] sm:$0xff] }
 0x251   :  { %1495 = vmatpush3.bf16.msra.mxu0 %v987_v37  ;;  %v840_v37 = vld [vmem:[%s2914_s5 + $0x5f0] sm:$0xff]  ;;  %v859_v43 = vld [vmem:[%s2914_s5 + $0x688] sm:$0xff]  ;;  %v1009_v0 = vpack.c.bf16 %v825_v36, %v824_v51  ;;  %v874_v16 = vld [vmem:[%s2914_s5 + $0x700] sm:$0xff] }
 0x252   :  { %1517 = vmatpush3.bf16.msra.mxu1 %v1003_v32  ;;  %1496 = vmatprep.subr.bf16.mxu0 %v996_v33  ;;  %v841_v32 = vld [vmem:[%s2914_s5 + $0x5f8] sm:$0xff]  ;;  %v992_v33 = vpack.c.bf16 %v791_v40, %v790_v24  ;;  %v1026_v50 = vpack.c.bf16 %v859_v43, %v858_v42  ;;  %v875_v55 = vld [vmem:[%s2914_s5 + $0x708] sm:$0xff]  ;;  %v844_v11 = vld [vmem:[%s2914_s5 + $0x610] sm:$0xff] }
 0x253   :  { %1518 = vmatprep.subr.bf16.mxu1 %v1012_v29  ;;  %v793_v29 = vld [vmem:[%s2914_s5 + $0x478] sm:$0xff]  ;;  %v1017_v53 = vpack.c.bf16 %v841_v32, %v840_v37  ;;  %v1034_v30 = vpack.c.bf16 %v875_v55, %v874_v16  ;;  %v862_v56 = vld [vmem:[%s2914_s5 + $0x6a0] sm:$0xff]  ;;  %v863_v60 = vld [vmem:[%s2914_s5 + $0x6a8] sm:$0xff] }
 0x254   :  { %v861_v45 = vld [vmem:[%s2914_s5 + $0x698] sm:$0xff]  ;;  %v1028_v49 = vpack.c.bf16 %v863_v60, %v862_v56  ;;  %v847_v20 = vld [vmem:[%s2914_s5 + $0x628] sm:$0xff]  ;;  %v864_v9 = vld [vmem:[%s2914_s5 + $0x6b0] sm:$0xff] }
 0x255   :  { %1497 = vmatpush3.bf16.msra.mxu0 %v988_v59  ;;  %v890_v59 = vld [vmem:[%s2914_s5 + $0x780] sm:$0xff]  ;;  %v845_v2 = vld [vmem:[%s2914_s5 + $0x618] sm:$0xff]  ;;  %v1027_v21 = vpack.c.bf16 %v861_v45, %v860_v4  ;;  %v896_v54 = vld [vmem:[%s2914_s5 + $0x7b0] sm:$0xff] }
 0x256   :  { %1519 = vmatpush3.bf16.msra.mxu1 %v1004_v62  ;;  %1498 = vmatprep.subr.bf16.mxu0 %v997_v38  ;;  %v891_v62 = vld [vmem:[%s2914_s5 + $0x788] sm:$0xff]  ;;  %v993_v38 = vpack.c.bf16 %v793_v29, %v792_v39  ;;  %v877_v28 = vld [vmem:[%s2914_s5 + $0x718] sm:$0xff]  ;;  %v880_v24 = vld [vmem:[%s2914_s5 + $0x730] sm:$0xff] }
 0x257   :  { %1520 = vmatprep.subr.bf16.mxu1 %v1013_v63  ;;  %v843_v63 = vld [vmem:[%s2914_s5 + $0x608] sm:$0xff]  ;;  %v1042_v1 = vpack.c.bf16 %v891_v62, %v890_v59  ;;  %v865_v15 = vld [vmem:[%s2914_s5 + $0x6b8] sm:$0xff]  ;;  %v898_v27 = vld [vmem:[%s2914_s5 + $0x7c0] sm:$0xff] }
 0x258   :  { %v881_v25 = vld [vmem:[%s2914_s5 + $0x738] sm:$0xff]  ;;  %v867_v26 = vld [vmem:[%s2914_s5 + $0x6c8] sm:$0xff]  ;;  %v882_v39 = vld [vmem:[%s2914_s5 + $0x740] sm:$0xff] }
 0x259   :  { %1499 = vmatpush3.bf16.msra.mxu0 %v989_v46  ;;  %v1018_v46 = vpack.c.bf16 %v843_v63, %v842_v52  ;;  %v899_v58 = vld [vmem:[%s2914_s5 + $0x7c8] sm:$0xff]  ;;  %v1037_v32 = vpack.c.bf16 %v881_v25, %v880_v24  ;;  %v869_v36 = vld [vmem:[%s2914_s5 + $0x6d8] sm:$0xff]  ;;  %v900_v42 = vld [vmem:[%s2914_s5 + $0x7d0] sm:$0xff] }
 0x25a   :  { %1521 = vmatpush3.bf16.msra.mxu1 %v1005_v47  ;;  %1500 = vmatprep.subr.bf16.mxu0 %v998_v48  ;;  %v892_v47 = vld [vmem:[%s2914_s5 + $0x790] sm:$0xff]  ;;  %v893_v48 = vld [vmem:[%s2914_s5 + $0x798] sm:$0xff]  ;;  %v1046_v29 = vpack.c.bf16 %v899_v58, %v898_v27  ;;  %v883_v51 = vld [vmem:[%s2914_s5 + $0x748] sm:$0xff] }
 0x25b   :  { %1522 = vmatprep.subr.bf16.mxu1 %v1014_v3  ;;  %v876_v3 = vld [vmem:[%s2914_s5 + $0x710] sm:$0xff]  ;;  %v1043_v61 = vpack.c.bf16 %v893_v48, %v892_v47  ;;  %v901_v43 = vld [vmem:[%s2914_s5 + $0x7d8] sm:$0xff]  ;;  %v1038_v62 = vpack.c.bf16 %v883_v51, %v882_v39  ;;  %v870_v16 = vld [vmem:[%s2914_s5 + $0x6e0] sm:$0xff] }
 0x25c   :  { %v1035_v35 = vpack.c.bf16 %v877_v28, %v876_v3  ;;  %v884_v52 = vld [vmem:[%s2914_s5 + $0x750] sm:$0xff]  ;;  %v1047_v63 = vpack.c.bf16 %v901_v43, %v900_v42  ;;  %v871_v55 = vld [vmem:[%s2914_s5 + $0x6e8] sm:$0xff]  ;;  %v902_v4 = vld [vmem:[%s2914_s5 + $0x7e0] sm:$0xff] }
 0x25d   :  { %1501 = vmatpush3.bf16.msra.mxu0 %v990_v8  ;;  %v894_v8 = vld [vmem:[%s2914_s5 + $0x7a0] sm:$0xff]  ;;  %v903_v45 = vld [vmem:[%s2914_s5 + $0x7e8] sm:$0xff]  ;;  %v1032_v48 = vpack.c.bf16 %v871_v55, %v870_v16  ;;  %v872_v28 = vld [vmem:[%s2914_s5 + $0x6f0] sm:$0xff] }
 0x25e   :  { %1523 = vmatpush3.bf16.msra.mxu1 %v1006_v12  ;;  %1502 = vmatprep.subr.bf16.mxu0 %v999_v34  ;;  %v895_v12 = vld [vmem:[%s2914_s5 + $0x7a8] sm:$0xff]  ;;  %v1019_v34 = vpack.c.bf16 %v845_v2, %v844_v11  ;;  %v886_v2 = vld [vmem:[%s2914_s5 + $0x760] sm:$0xff]  ;;  %v1048_v3 = vpack.c.bf16 %v903_v45, %v902_v4  ;;  %v873_v56 = vld [vmem:[%s2914_s5 + $0x6f8] sm:$0xff] }
 0x25f   :  { %1524 = vmatprep.subr.bf16.mxu1 %v1015_v13  ;;  %v878_v13 = vld [vmem:[%s2914_s5 + $0x720] sm:$0xff]  ;;  %v855_v11 = vld [vmem:[%s2914_s5 + $0x668] sm:$0xff]  ;;  %v904_v60 = vld [vmem:[%s2914_s5 + $0x7f0] sm:$0xff] }
 0x261   :  { %1503 = vmatpush3.bf16.msra.mxu0 %v991_v14  ;;  %v1029_v14 = vpack.c.bf16 %v865_v15, %v864_v9 }
 0x262   :  { %1525 = vmatpush3.bf16.msra.mxu1 %v1007_v22  ;;  %1504 = vmatprep.subr.bf16.mxu0 %v1000_v23  ;;  %v848_v22 = vld [vmem:[%s2914_s5 + $0x630] sm:$0xff]  ;;  %v849_v23 = vld [vmem:[%s2914_s5 + $0x638] sm:$0xff] }
 0x263   :  { %1526 = vmatprep.subr.bf16.mxu1 %v1016_v57  ;;  %v866_v57 = vld [vmem:[%s2914_s5 + $0x6c0] sm:$0xff]  ;;  %v1021_v37 = vpack.c.bf16 %v849_v23, %v848_v22 }
 0x265   :  { %1505 = vmatpush3.bf16.msra.mxu0 %v992_v33  ;;  %v1030_v33 = vpack.c.bf16 %v867_v26, %v866_v57 }
 0x266   :  { %1527 = vmatpush3.bf16.msra.mxu1 %v1008_v7  ;;  %1506 = vmatprep.subr.bf16.mxu0 %v1001_v6  ;;  %v850_v7 = vld [vmem:[%s2914_s5 + $0x640] sm:$0xff]  ;;  %v851_v6 = vld [vmem:[%s2914_s5 + $0x648] sm:$0xff] }
 0x267   :  { %1528 = vmatprep.subr.bf16.mxu1 %v1017_v53  ;;  %v868_v53 = vld [vmem:[%s2914_s5 + $0x6d0] sm:$0xff]  ;;  %v1022_v59 = vpack.c.bf16 %v851_v6, %v850_v7 }
 0x269   :  { %1507 = vmatpush3.bf16.msra.mxu0 %v993_v38  ;;  %v1031_v38 = vpack.c.bf16 %v869_v36, %v868_v53 }
 0x26a   :  { %1529 = vmatpush3.bf16.msra.mxu1 %v1009_v0  ;;  %1536 = vmatprep.subr.bf16.mxu0 %v1026_v50  ;;  %v852_v0 = vld [vmem:[%s2914_s5 + $0x650] sm:$0xff]  ;;  %v853_v50 = vld [vmem:[%s2914_s5 + $0x658] sm:$0xff] }
 0x26b   :  { %1558 = vmatprep.subr.bf16.mxu1 %v1042_v1  ;;  %v885_v1 = vld [vmem:[%s2914_s5 + $0x758] sm:$0xff] }
 0x26c   :  { %1254 = vmatmul.mubr.bf16.vlgmr.msra.gmra.mrb[24].mxu0 %v2411_v31  ;;  %v846_v31 = vld [vmem:[%s2914_s5 + $0x620] sm:$0xff]  ;;  %v1039_v47 = vpack.c.bf16 %v885_v1, %v884_v52 }
 0x26d   :  { %1295 = vmatmul.mubr.bf16.vlgmr.msra.gmra.mrb[24].mxu1 %v2413_v10  ;;  %1537 = vmatpush3.bf16.msra.mxu0 %v1018_v46  ;;  %v1044_v10 = vpack.c.bf16 %v895_v12, %v894_v8  ;;  %v1020_v17 = vpack.c.bf16 %v847_v20, %v846_v31  ;;  %v1023_v46 = vpack.c.bf16 %v853_v50, %v852_v0  ;;  %v888_v20 = vld [vmem:[%s2914_s5 + $0x770] sm:$0xff] }
 0x26e   :  { %1335 = vmatprep.mubr.bf16.mxu0 %v2483_v5  ;;  %1559 = vmatpush3.bf16.msra.mxu1 %v1034_v30  ;;  %v879_v5 = vld [vmem:[%s2914_s5 + $0x728] sm:$0xff]  ;;  %v854_v30 = vld [vmem:[%s2914_s5 + $0x660] sm:$0xff] }
 0x26f   :  { %1376 = vmatprep.mubr.bf16.mxu1 %v2485_v41  ;;  %1538 = vmatprep.subr.bf16.mxu0 %v1027_v21  ;;  %v897_v41 = vld [vmem:[%s2914_s5 + $0x7b8] sm:$0xff]  ;;  %v1036_v18 = vpack.c.bf16 %v879_v5, %v878_v13  ;;  %v887_v21 = vld [vmem:[%s2914_s5 + $0x768] sm:$0xff]  ;;  %v1024_v8 = vpack.c.bf16 %v855_v11, %v854_v30 }
 0x270   :  { %1560 = vmatprep.subr.bf16.mxu1 %v1043_v61  ;;  %v1045_v40 = vpack.c.bf16 %v897_v41, %v896_v54  ;;  %v905_v61 = vld [vmem:[%s2914_s5 + $0x7f8] sm:$0xff]  ;;  %v1040_v12 = vpack.c.bf16 %v887_v21, %v886_v2  ;;  %v1403_v54 = vld [vmem:[%s2916_s6] ss:$0 sm:$0xff] }
 0x271   :  { %1539 = vmatpush3.bf16.msra.mxu0 %v1019_v34  ;;  %v1033_v34 = vpack.c.bf16 %v873_v56, %v872_v28  ;;  %v1049_v31 = vpack.c.bf16 %v905_v61, %v904_v60  ;;  %v889_v13 = vld [vmem:[%s2914_s5 + $0x778] sm:$0xff] }
 0x272   :  { %1561 = vmatpush3.bf16.msra.mxu1 %v1035_v35  ;;  %1540 = vmatprep.subr.bf16.mxu0 %v1028_v49  ;;  %v856_v35 = vld [vmem:[%s2914_s5 + $0x670] sm:$0xff]  ;;  %v857_v49 = vld [vmem:[%s2914_s5 + $0x678] sm:$0xff]  ;;  %v1041_v5 = vpack.c.bf16 %v889_v13, %v888_v20 }
 0x273   :  { %1562 = vmatprep.subr.bf16.mxu1 %v1044_v10  ;;  %v1025_v10 = vpack.c.bf16 %v857_v49, %v856_v35 }
 0x275   :  { %1541 = vmatpush3.bf16.msra.mxu0 %v1020_v17 }
 0x276   :  { %1563 = vmatpush3.bf16.msra.mxu1 %v1036_v18  ;;  %1542 = vmatprep.subr.bf16.mxu0 %v1029_v14 }
 0x277   :  { %1564 = vmatprep.subr.bf16.mxu1 %v1045_v40 }
 0x279   :  { %1543 = vmatpush3.bf16.msra.mxu0 %v1021_v37 }
 0x27a   :  { %1565 = vmatpush3.bf16.msra.mxu1 %v1037_v32  ;;  %1544 = vmatprep.subr.bf16.mxu0 %v1030_v33 }
 0x27b   :  { %1566 = vmatprep.subr.bf16.mxu1 %v1046_v29 }
 0x27d   :  { %1545 = vmatpush3.bf16.msra.mxu0 %v1022_v59 }
 0x27e   :  { %1567 = vmatpush3.bf16.msra.mxu1 %v1038_v62  ;;  %1546 = vmatprep.subr.bf16.mxu0 %v1031_v38 }
 0x27f   :  { %1568 = vmatprep.subr.bf16.mxu1 %v1047_v63 }
 0x281   :  { %1547 = vmatpush3.bf16.msra.mxu0 %v1023_v46 }
 0x282   :  { %1569 = vmatpush3.bf16.msra.mxu1 %v1039_v47  ;;  %1548 = vmatprep.subr.bf16.mxu0 %v1032_v48 }
 0x283   :  { %1570 = vmatprep.subr.bf16.mxu1 %v1048_v3 }
 0x285   :  { %1549 = vmatpush3.bf16.msra.mxu0 %v1024_v8 }
 0x286   :  { %1571 = vmatpush3.bf16.msra.mxu1 %v1040_v12  ;;  %1550 = vmatprep.subr.bf16.mxu0 %v1033_v34 }
 0x287   :  { %1572 = vmatprep.subr.bf16.mxu1 %v1049_v31 }
 0x289   :  { %1551 = vmatpush3.bf16.msra.mxu0 %v1025_v10 }
 0x28a   :  { %1573 = vmatpush3.bf16.msra.mxu1 %v1041_v5 }
 0x28c   :  { %1336 = vmatmul.mubr.bf16.vlgmr.msra.gmra.mrb[28].mxu0 %v2479_v19 }
 0x28d   :  { %1377 = vmatmul.mubr.bf16.vlgmr.msra.gmra.mrb[28].mxu1 %v2481_v44 }
 0x2ff   :  { %v1420_v9 = vpop.f32.mrb[16].mxu0  ;;  %v1442_v15 = vpop.f32.mrb[16].mxu1 }
 0x300   :  { %v1421_v41 = vpop.f32.mrb[17].mxu0  ;;  %v1443_v17 = vpop.f32.mrb[17].mxu1 }
 0x301   :  { %v1422_v18 = vadd.f32 %v1421_v41, %v1420_v9  ;;  %v1444_v14 = vadd.f32 %v1443_v17, %v1442_v15  ;;  %v1423_v22 = vpop.f32.mrb[18].mxu0  ;;  %v1445_v23 = vpop.f32.mrb[18].mxu1  ;;  %v1589_v9 = vld [vmem:[%s2910_s0] sm:$0xff]  ;;  %v1590_v41 = vld [vmem:[%s2910_s0 + $0x8] sm:$0xff] }
 0x302   :  { %v1424_v24 = vpop.f32.mrb[19].mxu0  ;;  %v1446_v40 = vpop.f32.mrb[19].mxu1 }
 0x303   :  { %v1092_v25 = vadd.f32 %v1422_v18, %v1403_v54  ;;  %v1425_v57 = vadd.f32 %v1424_v24, %v1423_v22  ;;  %v1447_v26 = vadd.f32 %v1446_v40, %v1445_v23 }
 0x305   :  { %v1133_v19 = vadd.f32 %v1444_v14, %v1092_v25  ;;  %v1095_v27 = vadd.f32 %v1425_v57, %v1403_v54 }
 0x307   :  { %v1136_v44 = vadd.f32 %v1447_v26, %v1095_v27 }
 0x31f   :  { %v1464_v58 = vpop.f32.mrb[20].mxu0  ;;  %v1486_v37 = vpop.f32.mrb[20].mxu1 }
 0x320   :  { %v1465_v32 = vpop.f32.mrb[21].mxu0  ;;  %v1487_v33 = vpop.f32.mrb[21].mxu1 }
 0x321   :  { %v1466_v7 = vadd.f32 %v1465_v32, %v1464_v58  ;;  %v1488_v6 = vadd.f32 %v1487_v33, %v1486_v37  ;;  %v1467_v39 = vpop.f32.mrb[22].mxu0  ;;  %v1489_v29 = vpop.f32.mrb[22].mxu1 }
 0x322   :  { %v1468_v51 = vpop.f32.mrb[23].mxu0  ;;  %v1490_v53 = vpop.f32.mrb[23].mxu1 }
 0x323   :  { %v1174_v36 = vadd.f32 %v1466_v7, %v1133_v19  ;;  %v1469_v42 = vadd.f32 %v1468_v51, %v1467_v39  ;;  %v1491_v43 = vadd.f32 %v1490_v53, %v1489_v29 }
 0x325   :  { %v1215_v59 = vadd.f32 %v1488_v6, %v1174_v36  ;;  %v1177_v62 = vadd.f32 %v1469_v42, %v1136_v44 }
 0x327   :  { %v1218_v38 = vadd.f32 %v1491_v43, %v1177_v62 }
 0x33f   :  { %v1508_v0 = vpop.f32.mrb[24].mxu0 }
 0x340   :  { %v1530_v50 = vpop.f32.mrb[24].mxu1  ;;  %v1509_v52 = vpop.f32.mrb[25].mxu0 }
 0x341   :  { %v1510_v63 = vadd.f32 %v1509_v52, %v1508_v0  ;;  %v1531_v1 = vpop.f32.mrb[25].mxu1  ;;  %v1511_v16 = vpop.f32.mrb[26].mxu0 }
 0x342   :  { %v1532_v55 = vadd.f32 %v1531_v1, %v1530_v50  ;;  %v1533_v4 = vpop.f32.mrb[26].mxu1  ;;  %v1512_v45 = vpop.f32.mrb[27].mxu0 }
 0x343   :  { %v1256_v46 = vadd.f32 %v1510_v63, %v1215_v59  ;;  %v1513_v47 = vadd.f32 %v1512_v45, %v1511_v16  ;;  %v1534_v48 = vpop.f32.mrb[27].mxu1 }
 0x344   :  { %v1535_v30 = vadd.f32 %v1534_v48, %v1533_v4 }
 0x345   :  { %v1297_v11 = vadd.f32 %v1532_v55, %v1256_v46  ;;  %v1259_v2 = vadd.f32 %v1513_v47, %v1218_v38 }
 0x347   :  { %v1300_v3 = vadd.f32 %v1535_v30, %v1259_v2 }
 0x35f   :  { %v1552_v21 = vpop.f32.mrb[28].mxu0 }
 0x360   :  { %v1574_v28 = vpop.f32.mrb[28].mxu1  ;;  %v1553_v56 = vpop.f32.mrb[29].mxu0 }
 0x361   :  { %v1554_v60 = vadd.f32 %v1553_v56, %v1552_v21  ;;  %v1575_v61 = vpop.f32.mrb[29].mxu1  ;;  %v1555_v8 = vpop.f32.mrb[30].mxu0 }
 0x362   :  { %v1576_v12 = vadd.f32 %v1575_v61, %v1574_v28  ;;  %v1577_v34 = vpop.f32.mrb[30].mxu1  ;;  %v1556_v35 = vpop.f32.mrb[31].mxu0 }
 0x363   :  { %v1338_v49 = vadd.f32 %v1554_v60, %v1297_v11  ;;  %v1557_v31 = vadd.f32 %v1556_v35, %v1555_v8  ;;  %v1578_v20 = vpop.f32.mrb[31].mxu1 }
 0x364   :  { %v1579_v13 = vadd.f32 %v1578_v20, %v1577_v34 }
 0x365   :  { %v1379_v10 = vadd.f32 %v1576_v12, %v1338_v49  ;;  %v1341_v5 = vadd.f32 %v1557_v31, %v1300_v3 }
 0x367   :  { %v1385_v15 = vadd.f32 %v1589_v9, %v1379_v10  ;;  %v1382_v54 = vadd.f32 %v1579_v13, %v1341_v5 }
 0x369   :  { %1387 = vst.msk [vmem:[%s2917_s7] sm:$0xff] %vm31_vm0, %v1385_v15  ;;  %v1386_v17 = vadd.f32 %v1590_v41, %v1382_v54 }
 0x36b   :  { %1388 = vst.msk [vmem:[%s2917_s7 + $0x8] sm:$0xff] %vm31_vm0, %v1386_v17 }

// kernel: transformer_forward.27
= control target key start
LH: loop header
LB: loop body
LE: loop exit
PB: predicated region body
PF: predicated region fallthrough
CT: control target
= control target key end

     0   :  { %vm26_vm0 = vcmask 261120   ;;  %s293_s0 = inlined_call_operand.vmem [shape: f32[16,32], index: 0, kind: input, shape index: {}]   ;;  %s294_s1 = inlined_call_operand.vmem [shape: f32[1,32], index: 1, kind: input, shape index: {}]   ;;  %s295_s2 = inlined_call_operand.vmem [shape: f32[1,32], index: 2, kind: input, shape index: {}]   ;;  %s296_s3 = inlined_call_operand.vmem [shape: f32[32,13], index: 3, kind: input, shape index: {}]   ;;  %s297_s4 = inlined_call_operand.vmem [shape: f32[1,13], index: 4, kind: input, shape index: {}]   ;;  %s298_s5 = inlined_call_operand.hbm [shape: f32[16,13], index: 5, kind: output, shape index: {}]  }
   0x1   :  { %v22_v0 = vld [vmem:[%s293_s0] sm:$0xff]  ;;  %v23_v1 = vld [vmem:[%s293_s0 + $0x8] sm:$0xff] }
   0x2   :  { %v27_v2 = vsel %vm26_vm0, %v22_v0, 0.0 }
   0x3   :  { %10 = vsyncpa [#allocation3], 0  ;;  %28 = vadd.xlane.f32.xlu0 %v27_v2  ;;  %v30_v3 = vsel %vm26_vm0, %v23_v1, 0.0  ;;  %v85_v14 = vld [vmem:[%s296_s3] sm:$0xff]  ;;  %v86_v15 = vld [vmem:[%s296_s3 + $0x8] sm:$0xff]  ;;  %v214_v17 = vmov 0.0  }
   0x4   :  { %v87_v16 = vld [vmem:[%s296_s3 + $0x10] sm:$0xff]  ;;  %169 = vmatprep.subr.bf16.mxu0 %v214_v17  ;;  %v90_v18 = vpack.c.bf16 %v86_v15, %v85_v14  ;;  %v88_v19 = vld [vmem:[%s296_s3 + $0x18] sm:$0xff]  ;;  %vm215_vm1 = vmmov 0   ;;  %v162_v37 = vld [vmem:[%s294_s1] ss:$0 sm:$0xff]  ;;  %s216_s1 = smov [#allocation2]  }
   0x5   :  { %173 = vmatprep.mubr.msk.bf16.mxu0 %vm215_vm1, %v214_v17  ;;  %v91_v20 = vpack.c.bf16 %v88_v19, %v87_v16  ;;  %v163_v43 = vld [vmem:[%s295_s2] ss:$0 sm:$0xff]  ;;  %s151_s9 = sshll.u32 %s216_s1, 4  ;;  %vm143_vm6 = vcmask 105472   ;;  %s152_s9 = int_to_ptr.vmem [resolvable:$true] %s151_s9 }
   0x6   :  { %170 = vmatpush3.bf16.msra.mxu0 %v90_v18  ;;  %v164_v48 = vld [vmem:[%s297_s4] ss:$0 sm:$0xff]  ;;  %s190_s2 = scalar_lea.vmem %s152_s9, 256  ;;  %p195_p1 = scmp.lt.s32.totalorder %s152_s9, %s152_s9 }
   0x7   :  { %31 = vadd.xlane.f32.xlu0 %v30_v3  ;;  %171 = vmatprep.subr.bf16.mxu0 %v214_v17  ;;  %p191_p0 = scmp.ne.s32.totalorder %s152_s9, %s190_s2  ;;  %p196_p2 = scmp.lt.s32.totalorder %s190_s2, %s190_s2 }
   0x9   :  { %p197_p3 = por %p196_p2, %p195_p1 }
   0xa   :  { %172 = vmatpush3.bf16.msra.mxu0 %v91_v20 }
   0xb   :  { %p198_p4 = pnand %p197_p3, %p191_p0 }
  0x90   :  { %v29_v4 = vpop.xlane.xlu0 %28 }
  0x91   :  { %v34_v5 = vmul.f32 0.03125, %v29_v4 }
  0x93   :  { %v36_v6 = vsub.f32 %v22_v0, %v34_v5 }
  0x94   :  { %v32_v7 = vpop.xlane.xlu0 %31 }
  0x95   :  { %v35_v8 = vmul.f32 0.03125, %v32_v7  ;;  %v38_v9 = vmul.f32 %v36_v6, %v36_v6  ;;  %v69_v39 = vmul.f32 %v162_v37, %v36_v6 }
  0x97   :  { %v37_v10 = vsub.f32 %v23_v1, %v35_v8  ;;  %v40_v11 = vsel %vm26_vm0, %v38_v9, 0.0 }
  0x98   :  { %41 = vadd.xlane.f32.xlu1 %v40_v11 }
  0x99   :  { %v39_v12 = vmul.f32 %v37_v10, %v37_v10  ;;  %v70_v40 = vmul.f32 %v162_v37, %v37_v10 }
  0x9b   :  { %v43_v13 = vsel %vm26_vm0, %v39_v12, 0.0 }
  0x9c   :  { %44 = vadd.xlane.f32.xlu1 %v43_v13 }
 0x125   :  { %v42_v21 = vpop.xlane.xlu1 %41 }
 0x126   :  { %v47_v22 = vmul.f32 0.032258064, %v42_v21 }
 0x128   :  { %182 = vrsqrt.f32 %v47_v22  ;;  %vm51_vm2 = vcmp.eq.f32.partialorder %v47_v22, inf  ;;  %v54_v27 = vand.u32 2147483648, %v47_v22  ;;  %vm53_vm3 = vcmp.eq.f32.partialorder %v47_v22, 0.0 }
 0x129   :  { %v45_v23 = vpop.xlane.xlu1 %44 }
 0x12a   :  { %v48_v24 = vmul.f32 0.032258064, %v45_v23 }
 0x12c   :  { %184 = vrsqrt.f32 %v48_v24  ;;  %vm58_vm4 = vcmp.eq.f32.partialorder %v48_v24, inf  ;;  %v61_v33 = vand.u32 2147483648, %v48_v24  ;;  %vm60_vm5 = vcmp.eq.f32.partialorder %v48_v24, 0.0 }
 0x132   :  { %v183_v25 = vpop.eup %182 }
 0x133   :  { %v50_v26 = vmul.f32 %v183_v25, %v47_v22 }
 0x135   :  { %v52_v28 = vsel %vm51_vm2, %v47_v22, %v50_v26 }
 0x136   :  { %v185_v29 = vpop.eup %184  ;;  %v55_v30 = vsel %vm53_vm3, %v54_v27, %v52_v28 }
 0x137   :  { %v71_v31 = vadd.f32 1e-06, %v55_v30  ;;  %v57_v32 = vmul.f32 %v185_v29, %v48_v24 }
 0x139   :  { %186 = vrcp.f32 %v71_v31  ;;  %v59_v34 = vsel %vm58_vm4, %v48_v24, %v57_v32 }
 0x13a   :  { %v62_v35 = vsel %vm60_vm5, %v61_v33, %v59_v34 }
 0x13b   :  { %v72_v36 = vadd.f32 1e-06, %v62_v35 }
 0x13d   :  { %188 = vrcp.f32 %v72_v36 }
 0x143   :  { %v187_v38 = vpop.eup %186 }
 0x144   :  { %v74_v41 = vmul.f32 %v187_v38, %v69_v39 }
 0x146   :  { %v83_v45 = vadd.f32 %v163_v43, %v74_v41 }
 0x147   :  { %v189_v42 = vpop.eup %188 }
 0x148   :  { %v76_v44 = vmul.f32 %v189_v42, %v70_v40 }
 0x14a   :  { %v84_v46 = vadd.f32 %v163_v43, %v76_v44 }
 0x14c   :  { %v89_v47 = vpack.c.bf16 %v84_v46, %v83_v45 }
 0x14e   :  { %174 = vmatmul.mubr.msk.bf16.vlgmr.msra.gmra.mrb[0].mxu0 %vm26_vm0, %v89_v47 }
 0x221   :  { %v136_v49 = vpop.f32.mrb[0].mxu0 }
 0x222   :  { %v137_v50 = vadd.f32 %v164_v48, %v136_v49  ;;  %v175_v51 = vpop.f32.mrb[1].mxu0 }
 0x223   :  { %v139_v52 = vpop.f32.mrb[2].mxu0 }
 0x224   :  { %144 = vst.msk [vmem:[#allocation2] sm:$0xff] %vm143_vm6, %v137_v50  ;;  %v140_v53 = vadd.f32 %v164_v48, %v139_v52  ;;  %v176_v54 = vpop.f32.mrb[3].mxu0 }
 0x226   :  { %145 = vst.msk [vmem:[#allocation2 + $0x8] sm:$0xff] %vm143_vm6, %v140_v53 }
 0x227   :  { %201 = shalt.err (!%p198_p4)
}
 0x228   :  { %s202_s11 = scalar_lea.hbm %s298_s5, 256 }
 0x229   :  { %p203_p5 = scmp.ne.s32.totalorder %s298_s5, %s202_s11  ;;  %p206_p6 = scmp.lt.u32.totalorder %s202_s11, %s298_s5 }
 0x22b   :  { %p208_p7 = pnand %p206_p6, %p203_p5 }
 0x22d   :  { %211 = shalt.err (!%p208_p7)
}
 0x22e   :  { %s217_s16 = smov 128   ;;  %s218_s17 = smov 8  }
 0x22f   :  { %157 = dma.vmem_to_hbm [thread:$0]  %s152_s9, 256, %s298_s5, [#allocation3], %s217_s16, %s217_s16, %s218_s17  }
 0x230   :  { %212 = dma.done.wait [#allocation3], 256  }
 0x231   :  { %213 = vsyncadd [#allocation3], 4294967040 }
 0x232   :  { %161 = vsyncpa [#allocation3], 1 }

// kernel: transformer_forward.22
= control target key start
LH: loop header
LB: loop body
LE: loop exit
PB: predicated region body
PF: predicated region fallthrough
CT: control target
= control target key end

     0   :  { %vm34_vm0 = vcmask 261120   ;;  %s1499_s13 = smov 96   ;;  %v1500_v20 = vmov 0.0   ;;  %vm1501_vm1 = vmmov 0   ;;  %vm204_vm6 = vcmask 64512   ;;  %s1504_s23 = smov 88   ;;  %s1808_s0 = inlined_call_operand.vmem [shape: f32[16,32], index: 0, kind: input, shape index: {}]   ;;  %s1809_s5 = inlined_call_operand.vmem [shape: f32[32,96], index: 5, kind: input, shape index: {}]   ;;  %s1810_s1 = inlined_call_operand.vmem [shape: f32[16,32], index: 1, kind: input, shape index: {}]   ;;  %s1811_s3 = inlined_call_operand.vmem [shape: f32[1,32], index: 3, kind: input, shape index: {}]   ;;  %s1812_s4 = inlined_call_operand.vmem [shape: f32[1,32], index: 4, kind: input, shape index: {}]   ;;  %s1813_s2 = inlined_call_operand.vmem [shape: f32[2,8], index: 2, kind: input, shape index: {}]   ;;  %s1814_s6 = inlined_call_operand.vmem [shape: f32[32,32], index: 6, kind: input, shape index: {}]   ;;  %s1815_s7 = inlined_call_operand.vmem [shape: f32[1,32], index: 7, kind: input, shape index: {}]   ;;  %s1816_s8 = inlined_call_operand.vmem [shape: f32[16,32], index: 8, kind: output, shape index: {}]  }
   0x1   :  { %v1560_v0 = vld [vmem:[%s1808_s0] sm:$0xff]  ;;  %v1565_v1 = vld [vmem:[%s1808_s0 + $0x8] sm:$0xff]  ;;  %v95_v17 = vld [vmem:[%s1809_s5 + $0x10] sm:$0xff]  ;;  %1319 = vmatprep.subr.bf16.mxu1 %v1500_v20  ;;  %1311 = vmatprep.subr.bf16.mxu0 %v1500_v20  ;;  %vm368_vm9 = vcmask 1043456   ;;  %s1505_s24 = smov 112   ;;  %s1506_s25 = smov 80  }
   0x2   :  { %v35_v2 = vsel %vm34_vm0, %v1560_v0, 0.0  ;;  %v38_v3 = vsel %vm34_vm0, %v1565_v1, 0.0  ;;  %v93_v4 = vld [vmem:[%s1809_s5] sm:$0xff]  ;;  %v94_v5 = vld [vmem:[%s1809_s5 + $0x8] sm:$0xff]  ;;  %v96_v18 = vld [vmem:[%s1809_s5 + $0x18] sm:$0xff]  ;;  %1323 = vmatprep.mubr.msk.bf16.mxu1 %vm1501_vm1, %v1500_v20  ;;  %1315 = vmatprep.mubr.msk.bf16.mxu0 %vm1501_vm1, %v1500_v20  ;;  %s1507_s26 = smov 104  }
   0x3   :  { %36 = vadd.xlane.f32.xlu0 %v35_v2  ;;  %v98_v6 = vpack.c.bf16 %v94_v5, %v93_v4  ;;  %v99_v19 = vpack.c.bf16 %v96_v18, %v95_v17  ;;  %v144_v26 = vld [vmem:[%s1810_s1] sm:$0xff]  ;;  %v145_v27 = vld [vmem:[%s1810_s1 + $0x8] sm:$0xff]  ;;  %v1502_v5 = vmov 1966171168   ;;  %s1508_s27 = smov 72   ;;  %s1509_s28 = smov 8  }
   0x4   :  { %v146_v29 = vpack.c.bf16 %v145_v27, %v144_v26  ;;  %v1247_v42 = vld [vmem:[%s1811_s3] ss:$0 sm:$0xff]  ;;  %s1510_s29 = smov 16   ;;  %s1511_s15 = smov 24  }
   0x5   :  { %1312 = vmatpush3.bf16.msra.mxu0 %v98_v6  ;;  %v1248_v48 = vld [vmem:[%s1812_s4] ss:$0 sm:$0xff] }
   0x6   :  { %1313 = vmatprep.subr.bf16.mxu0 %v1500_v20 }
   0x7   :  { %39 = vadd.xlane.f32.xlu0 %v38_v3 }
   0x9   :  { %1314 = vmatpush3.bf16.msra.mxu0 %v99_v19 }
   0xa   :  { %1327 = vmatprep.subr.bf16.mxu0 %v1500_v20 }
  0x1d   :  { %149 = vrot.lane.b32.xlu0 %v98_v6, %s1499_s13  ;;  %v309_v6 = vunpack.c.l.s4 %v1502_v5 }
  0x90   :  { %v37_v7 = vpop.xlane.xlu0 %36 }
  0x91   :  { %v42_v8 = vmul.f32 0.03125, %v37_v7  ;;  %v311_v7 = vlaneseq }
  0x93   :  { %v1579_v9 = vsub.f32 %v1560_v0, %v42_v8  ;;  %v310_v8 = vunpack.c.0.s8 %v309_v6 }
  0x94   :  { %v40_v10 = vpop.xlane.xlu0 %39 }
  0x95   :  { %v43_v11 = vmul.f32 0.03125, %v40_v10  ;;  %v46_v12 = vmul.f32 %v1579_v9, %v1579_v9  ;;  %v77_v44 = vmul.f32 %v1247_v42, %v1579_v9  ;;  %v312_v9 = vshrl.u32 %v311_v7, 7  ;;  %v1253_v10 = vld.sshfl [vmem:[%s1813_s2] sm:$0x11 pattern:$0x75316420] }
  0x96   :  { %s1503_s2 = smov 120  }
  0x97   :  { %v45_v13 = vsub.f32 %v1565_v1, %v43_v11  ;;  %v48_v14 = vsel %vm34_vm0, %v46_v12, 0.0  ;;  %v313_v11 = vsub.s32 %v310_v8, %v312_v9  ;;  %v307_v12 = vcombine.high %v1253_v10, %v1253_v10 }
  0x98   :  { %49 = vadd.xlane.f32.xlu1 %v48_v14  ;;  %v150_v21 = vpop.permute.xlu0 %149  ;;  %v324_v14 = vsub.s32 0, %v312_v9 }
  0x99   :  { %v47_v15 = vmul.f32 %v45_v13, %v45_v13  ;;  %1320 = vmatpush3.bf16.msra.mxu1 %v150_v21  ;;  %v78_v45 = vmul.f32 %v1247_v42, %v45_v13  ;;  %v314_v13 = vrot.slane %v1253_v10, %v313_v11 }
  0x9a   :  { %1321 = vmatprep.subr.bf16.mxu1 %v1500_v20 }
  0x9b   :  { %v51_v16 = vsel %vm34_vm0, %v47_v15, 0.0  ;;  %v321_v15 = vrot.slane %v307_v12, %v313_v11 }
  0x9c   :  { %52 = vadd.xlane.f32.xlu1 %v51_v16  ;;  %v1647_v16 = vrot.slane %v314_v13, %v324_v14 }
  0x9d   :  { %v1649_v21 = vrot.slane %v321_v15, %v324_v14 }
  0xad   :  { %151 = vrot.lane.b32.xlu1 %v99_v19, %s1499_s13 }
 0x125   :  { %v50_v22 = vpop.xlane.xlu1 %49 }
 0x126   :  { %v55_v23 = vmul.f32 0.032258064, %v50_v22 }
 0x128   :  { %1459 = vrsqrt.f32 %v55_v23  ;;  %vm59_vm2 = vcmp.eq.f32.partialorder %v55_v23, inf  ;;  %v62_v32 = vand.u32 2147483648, %v55_v23  ;;  %vm61_vm3 = vcmp.eq.f32.partialorder %v55_v23, 0.0 }
 0x129   :  { %v53_v24 = vpop.xlane.xlu1 %52 }
 0x12a   :  { %v56_v25 = vmul.f32 0.032258064, %v53_v24 }
 0x12c   :  { %1461 = vrsqrt.f32 %v56_v25  ;;  %vm66_vm4 = vcmp.eq.f32.partialorder %v56_v25, inf  ;;  %v69_v38 = vand.u32 2147483648, %v56_v25  ;;  %vm68_vm5 = vcmp.eq.f32.partialorder %v56_v25, 0.0 }
 0x12d   :  { %v152_v28 = vpop.permute.xlu1 %151 }
 0x12e   :  { %1322 = vmatpush3.bf16.msra.mxu1 %v152_v28 }
 0x12f   :  { %1333 = vmatprep.subr.bf16.mxu1 %v1500_v20 }
 0x131   :  { %1324 = vmatmul.mubr.msk.bf16.vlgmr.msra.gmra.mrb[0].mxu1 %vm34_vm0, %v146_v29 }
 0x132   :  { %v1460_v30 = vpop.eup %1459  ;;  %1335 = vmatprep.mubr.msk.bf16.mxu1 %vm1501_vm1, %v1500_v20 }
 0x133   :  { %v58_v31 = vmul.f32 %v1460_v30, %v55_v23 }
 0x135   :  { %v60_v33 = vsel %vm59_vm2, %v55_v23, %v58_v31  ;;  %vm1176_vm2 = vcmask 195584  }
 0x136   :  { %v1462_v34 = vpop.eup %1461  ;;  %v63_v35 = vsel %vm61_vm3, %v62_v32, %v60_v33 }
 0x137   :  { %v79_v36 = vadd.f32 1e-06, %v63_v35  ;;  %v65_v37 = vmul.f32 %v1462_v34, %v56_v25 }
 0x139   :  { %1463 = vrcp.f32 %v79_v36  ;;  %v67_v39 = vsel %vm66_vm4, %v56_v25, %v65_v37 }
 0x13a   :  { %v70_v40 = vsel %vm68_vm5, %v69_v38, %v67_v39 }
 0x13b   :  { %v80_v41 = vadd.f32 1e-06, %v70_v40 }
 0x13d   :  { %1465 = vrcp.f32 %v80_v41 }
 0x143   :  { %v1464_v43 = vpop.eup %1463 }
 0x144   :  { %v82_v46 = vmul.f32 %v1464_v43, %v77_v44 }
 0x146   :  { %v91_v50 = vadd.f32 %v1248_v48, %v82_v46 }
 0x147   :  { %v1466_v47 = vpop.eup %1465 }
 0x148   :  { %v84_v49 = vmul.f32 %v1466_v47, %v78_v45 }
 0x14a   :  { %v92_v51 = vadd.f32 %v1248_v48, %v84_v49 }
 0x14c   :  { %v97_v52 = vpack.c.bf16 %v92_v51, %v91_v50 }
 0x14e   :  { %1316 = vmatmul.mubr.msk.bf16.vlgmr.msra.gmra.mrb[0].mxu0 %vm34_vm0, %v97_v52 }
 0x14f   :  { %1329 = vmatprep.mubr.msk.bf16.mxu0 %vm1501_vm1, %v1500_v20 }
 0x204   :  { %v192_v53 = vpop.f32.mrb[0].mxu1 }
 0x205   :  { %v1622_v54 = vpack.c.bf16 %v192_v53, %v192_v53  ;;  %v1325_v55 = vpop.f32.mrb[1].mxu1 }
 0x206   :  { %v195_v56 = vpop.f32.mrb[2].mxu1 }
 0x207   :  { %v1624_v57 = vpack.c.bf16 %v195_v56, %v195_v56  ;;  %v1326_v58 = vpop.f32.mrb[3].mxu1  ;;  %v209_v59 = vsel %vm204_vm6, %v1622_v54, 0 }
 0x208   :  { %1328 = vmatpush3.bf16.xpose.msra.mxu0 %v209_v59 }
 0x209   :  { %v255_v60 = vsel %vm204_vm6, %v1624_v57, 0  ;;  %1339 = vmatprep.subr.bf16.mxu0 %v1500_v20 }
 0x20a   :  { %1334 = vmatpush3.bf16.xpose.msra.mxu1 %v255_v60 }
 0x20b   :  { %1345 = vmatprep.subr.bf16.mxu1 %v1500_v20 }
 0x221   :  { %v137_v61 = vpop.f32.mrb[0].mxu0 }
 0x222   :  { %v1632_v62 = vpack.c.bf16 %v137_v61, %v137_v61  ;;  %v1317_v63 = vpop.f32.mrb[1].mxu0 }
 0x223   :  { %v140_v2 = vpop.f32.mrb[2].mxu0 }
 0x224   :  { %v1634_v3 = vpack.c.bf16 %v140_v2, %v140_v2  ;;  %v1318_v4 = vpop.f32.mrb[3].mxu0  ;;  %1330 = vmatmul.mubr.msk.bf16.vlgmr.msra.gmra.mrb[4].mxu0 %vm204_vm6, %v1632_v62 }
 0x225   :  { %1341 = vmatprep.mubr.msk.bf16.mxu0 %vm1501_vm1, %v1500_v20 }
 0x226   :  { %1336 = vmatmul.mubr.msk.bf16.vlgmr.msra.gmra.mrb[4].mxu1 %vm204_vm6, %v1634_v3 }
 0x227   :  { %1347 = vmatprep.mubr.msk.bf16.mxu1 %vm1501_vm1, %v1500_v20 }
 0x2f7   :  { %v245_v17 = vpop.f32.mrb[4].mxu0 }
 0x2f8   :  { %v297_v18 = vmul.f32 0.35355338, %v245_v17  ;;  %v1331_v19 = vpop.f32.mrb[5].mxu0 }
 0x2f9   :  { %v248_v22 = vpop.f32.mrb[6].mxu0  ;;  %v291_v23 = vpop.f32.mrb[4].mxu1 }
 0x2fa   :  { %v332_v24 = vmul.f32 %v1647_v16, %v297_v18  ;;  %v298_v25 = vmul.f32 0.35355338, %v291_v23  ;;  %v1332_v26 = vpop.f32.mrb[7].mxu0  ;;  %v1337_v27 = vpop.f32.mrb[5].mxu1 }
 0x2fb   :  { %v294_v28 = vpop.f32.mrb[6].mxu1 }
 0x2fc   :  { %v333_v29 = vmul.f32 %v1649_v21, %v298_v25  ;;  %v1338_v30 = vpop.f32.mrb[7].mxu1  ;;  %vm334_vm7 = vcmp.eq.f32.partialorder %v332_v24, 0.0 }
 0x2fd   :  { %v336_v31 = vsel %vm334_vm7, -inf, %v332_v24 }
 0x2fe   :  { %v338_v32 = vsel %vm204_vm6, %v336_v31, -inf  ;;  %vm335_vm8 = vcmp.eq.f32.partialorder %v333_v29, 0.0 }
 0x2ff   :  { %339 = vmax.xlane.f32.xlu1 %v338_v32  ;;  %v337_v33 = vsel %vm335_vm8, -inf, %v333_v29 }
 0x300   :  { %v341_v34 = vsel %vm204_vm6, %v337_v33, -inf }
 0x301   :  { %342 = vmax.xlane.f32.xlu0 %v341_v34 }
 0x310   :  { %413 = vrot.lane.b32.xlu1 %v1624_v57, %s1499_s13 }
 0x314   :  { %464 = vrot.lane.b32.xlu1 %v1622_v54, %s1503_s2 }
 0x38c   :  { %v340_v35 = vpop.xlane.xlu1 %339 }
 0x38d   :  { %v344_v36 = vsub.f32 %v336_v31, %v340_v35 }
 0x38e   :  { %v343_v37 = vpop.xlane.xlu0 %342 }
 0x38f   :  { %v346_v38 = vmul.f32 1.442695, %v344_v36  ;;  %v345_v39 = vsub.f32 %v337_v33, %v343_v37 }
 0x390   :  { %v414_v40 = vpop.permute.xlu1 %413 }
 0x391   :  { %1467 = vpow2.f32 %v346_v38  ;;  %v348_v41 = vmul.f32 1.442695, %v345_v39  ;;  %v419_v42 = vsel %vm368_vm9, %v414_v40, 0 }
 0x392   :  { %1346 = vmatpush3.bf16.msra.mxu1 %v419_v42 }
 0x393   :  { %1469 = vpow2.f32 %v348_v41  ;;  %1357 = vmatprep.subr.bf16.mxu1 %v1500_v20 }
 0x394   :  { %v465_v47 = vpop.permute.xlu1 %464 }
 0x395   :  { %v470_v60 = vsel %vm204_vm6, %v465_v47, 0 }
 0x39b   :  { %v1468_v43 = vpop.eup %1467 }
 0x39c   :  { %v350_v44 = vsel %vm204_vm6, %v1468_v43, 0.0 }
 0x39d   :  { %v1470_v45 = vpop.eup %1469  ;;  %351 = vadd.xlane.f32.xlu0 %v350_v44 }
 0x39e   :  { %v353_v46 = vsel %vm204_vm6, %v1470_v45, 0.0 }
 0x39f   :  { %354 = vadd.xlane.f32.xlu1 %v353_v46 }
 0x3b0   :  { %515 = vrot.lane.b32.xlu1 %v1624_v57, %s1503_s2 }
 0x3b3   :  { %363 = vrot.lane.b32.xlu0 %v1622_v54, %s1499_s13 }
 0x3b4   :  { %513 = vrot.lane.b32.xlu1 %v1634_v3, %s1503_s2 }
 0x3b7   :  { %462 = vrot.lane.b32.xlu0 %v1632_v62, %s1503_s2 }
 0x42a   :  { %v352_v48 = vpop.xlane.xlu0 %351 }
 0x42b   :  { %1471 = vrcp.f32 %v352_v48 }
 0x42c   :  { %v355_v49 = vpop.xlane.xlu1 %354 }
 0x42d   :  { %1473 = vrcp.f32 %v355_v49 }
 0x42e   :  { %v364_v50 = vpop.permute.xlu0 %363 }
 0x42f   :  { %v370_v51 = vsel %vm368_vm9, %v364_v50, 0 }
 0x430   :  { %1340 = vmatpush3.bf16.msra.mxu0 %v370_v51  ;;  %v516_v59 = vpop.permute.xlu1 %515 }
 0x431   :  { %1351 = vmatprep.subr.bf16.mxu0 %v1500_v20  ;;  %v521_v63 = vsel %vm204_vm6, %v516_v59, 0 }
 0x432   :  { %v463_v2 = vpop.permute.xlu0 %462 }
 0x434   :  { %v514_v4 = vpop.permute.xlu1 %513 }
 0x435   :  { %v1472_v52 = vpop.eup %1471 }
 0x436   :  { %v358_v53 = vmul.f32 %v1472_v52, %v1468_v43 }
 0x437   :  { %v1474_v55 = vpop.eup %1473 }
 0x438   :  { %v359_v56 = vmul.f32 %v1474_v55, %v1470_v45  ;;  %v360_v58 = vpack.c.bf16 %v358_v53, %v358_v53 }
 0x43a   :  { %1342 = vmatmul.mubr.msk.bf16.vlgmr.msra.gmra.mrb[8].mxu0 %vm204_vm6, %v360_v58  ;;  %v361_v61 = vpack.c.bf16 %v359_v56, %v359_v56 }
 0x43b   :  { %1352 = vmatpush3.bf16.xpose.msra.mxu0 %v470_v60  ;;  %1353 = vmatprep.mubr.msk.bf16.mxu0 %vm1501_vm1, %v1500_v20 }
 0x43c   :  { %1348 = vmatmul.mubr.msk.bf16.vlgmr.msra.gmra.mrb[8].mxu1 %vm204_vm6, %v361_v61  ;;  %1363 = vmatprep.subr.bf16.mxu0 %v1500_v20 }
 0x43d   :  { %1358 = vmatpush3.bf16.xpose.msra.mxu1 %v521_v63  ;;  %1359 = vmatprep.mubr.msk.bf16.mxu1 %vm1501_vm1, %v1500_v20 }
 0x43e   :  { %1369 = vmatprep.subr.bf16.mxu1 %v1500_v20 }
 0x442   :  { %1354 = vmatmul.mubr.msk.bf16.vlgmr.msra.gmra.mrb[12].mxu0 %vm204_vm6, %v463_v2 }
 0x443   :  { %1365 = vmatprep.mubr.msk.bf16.mxu0 %vm1501_vm1, %v1500_v20 }
 0x444   :  { %1360 = vmatmul.mubr.msk.bf16.vlgmr.msra.gmra.mrb[12].mxu1 %vm204_vm6, %v514_v4 }
 0x445   :  { %1371 = vmatprep.mubr.msk.bf16.mxu1 %vm1501_vm1, %v1500_v20 }
 0x50d   :  { %v1685_v5 = vpop.f32.mrb[8].mxu0 }
 0x50e   :  { %v1343_v6 = vpop.f32.mrb[9].mxu0 }
 0x50f   :  { %v409_v7 = vpop.f32.mrb[10].mxu0  ;;  %v1687_v8 = vpop.f32.mrb[8].mxu1 }
 0x510   :  { %v1344_v9 = vpop.f32.mrb[11].mxu0  ;;  %v1349_v10 = vpop.f32.mrb[9].mxu1 }
 0x511   :  { %v458_v11 = vpop.f32.mrb[10].mxu1 }
 0x512   :  { %v1350_v12 = vpop.f32.mrb[11].mxu1 }
 0x515   :  { %v506_v13 = vpop.f32.mrb[12].mxu0 }
 0x516   :  { %v563_v14 = vmul.f32 0.35355338, %v506_v13  ;;  %v1355_v15 = vpop.f32.mrb[13].mxu0 }
 0x517   :  { %v509_v17 = vpop.f32.mrb[14].mxu0  ;;  %v557_v18 = vpop.f32.mrb[12].mxu1 }
 0x518   :  { %v565_v19 = vmul.f32 %v563_v14, %v1647_v16  ;;  %v564_v22 = vmul.f32 0.35355338, %v557_v18  ;;  %v1356_v23 = vpop.f32.mrb[15].mxu0  ;;  %v1361_v24 = vpop.f32.mrb[13].mxu1 }
 0x519   :  { %v560_v25 = vpop.f32.mrb[14].mxu1 }
 0x51a   :  { %v566_v26 = vmul.f32 %v564_v22, %v1649_v21  ;;  %v1362_v27 = vpop.f32.mrb[15].mxu1  ;;  %vm567_vm10 = vcmp.eq.f32.partialorder %v565_v19, 0.0 }
 0x51b   :  { %v569_v28 = vsel %vm567_vm10, -inf, %v565_v19 }
 0x51c   :  { %v571_v29 = vsel %vm204_vm6, %v569_v28, -inf  ;;  %vm568_vm11 = vcmp.eq.f32.partialorder %v566_v26, 0.0 }
 0x51d   :  { %572 = vmax.xlane.f32.xlu0 %v571_v29  ;;  %v570_v30 = vsel %vm568_vm11, -inf, %v566_v26 }
 0x51e   :  { %v574_v31 = vsel %vm204_vm6, %v570_v30, -inf }
 0x51f   :  { %575 = vmax.xlane.f32.xlu1 %v574_v31 }
 0x530   :  { %643 = vrot.lane.b32.xlu1 %v1624_v57, %s1504_s23 }
 0x534   :  { %693 = vrot.lane.b32.xlu1 %v1622_v54, %s1505_s24 }
 0x538   :  { %743 = vrot.lane.b32.xlu1 %v1624_v57, %s1505_s24 }
 0x53c   :  { %741 = vrot.lane.b32.xlu1 %v1634_v3, %s1505_s24 }
 0x5aa   :  { %v573_v32 = vpop.xlane.xlu0 %572 }
 0x5ab   :  { %v577_v33 = vsub.f32 %v569_v28, %v573_v32 }
 0x5ac   :  { %v576_v34 = vpop.xlane.xlu1 %575 }
 0x5ad   :  { %v579_v35 = vmul.f32 1.442695, %v577_v33  ;;  %v578_v36 = vsub.f32 %v570_v30, %v576_v34 }
 0x5af   :  { %1475 = vpow2.f32 %v579_v35  ;;  %v581_v37 = vmul.f32 1.442695, %v578_v36 }
 0x5b0   :  { %v644_v38 = vpop.permute.xlu1 %643 }
 0x5b1   :  { %1477 = vpow2.f32 %v581_v37  ;;  %v649_v39 = vsel %vm368_vm9, %v644_v38, 0 }
 0x5b2   :  { %1370 = vmatpush3.bf16.msra.mxu1 %v649_v39 }
 0x5b3   :  { %1381 = vmatprep.subr.bf16.mxu1 %v1500_v20 }
 0x5b4   :  { %v694_v49 = vpop.permute.xlu1 %693 }
 0x5b5   :  { %v699_v56 = vsel %vm204_vm6, %v694_v49, 0 }
 0x5b8   :  { %v744_v55 = vpop.permute.xlu1 %743 }
 0x5b9   :  { %v1476_v40 = vpop.eup %1475  ;;  %v749_v59 = vsel %vm204_vm6, %v744_v55, 0 }
 0x5ba   :  { %v583_v41 = vsel %vm204_vm6, %v1476_v40, 0.0 }
 0x5bb   :  { %v1478_v42 = vpop.eup %1477  ;;  %584 = vadd.xlane.f32.xlu0 %v583_v41 }
 0x5bc   :  { %v586_v43 = vsel %vm204_vm6, %v1478_v42, 0.0  ;;  %v742_v61 = vpop.permute.xlu1 %741 }
 0x5bf   :  { %587 = vadd.xlane.f32.xlu0 %v586_v43 }
 0x5d5   :  { %595 = vrot.lane.b32.xlu0 %v1622_v54, %s1504_s23 }
 0x5d9   :  { %691 = vrot.lane.b32.xlu0 %v1632_v62, %s1505_s24 }
 0x648   :  { %v585_v44 = vpop.xlane.xlu0 %584 }
 0x649   :  { %1479 = vrcp.f32 %v585_v44 }
 0x64c   :  { %v588_v45 = vpop.xlane.xlu0 %587 }
 0x64d   :  { %1481 = vrcp.f32 %v588_v45 }
 0x650   :  { %v596_v46 = vpop.permute.xlu0 %595 }
 0x651   :  { %v601_v47 = vsel %vm368_vm9, %v596_v46, 0 }
 0x652   :  { %1364 = vmatpush3.bf16.msra.mxu0 %v601_v47 }
 0x653   :  { %v1480_v48 = vpop.eup %1479  ;;  %1375 = vmatprep.subr.bf16.mxu0 %v1500_v20 }
 0x654   :  { %v591_v50 = vmul.f32 %v1480_v48, %v1476_v40  ;;  %v692_v60 = vpop.permute.xlu0 %691 }
 0x656   :  { %v593_v51 = vpack.c.bf16 %v591_v50, %v591_v50 }
 0x657   :  { %v1482_v52 = vpop.eup %1481 }
 0x658   :  { %v592_v53 = vmul.f32 %v1482_v52, %v1478_v42  ;;  %1366 = vmatmul.mubr.msk.bf16.vlgmr.msra.gmra.mrb[16].mxu0 %vm204_vm6, %v593_v51 }
 0x659   :  { %1377 = vmatprep.mubr.msk.bf16.mxu0 %vm1501_vm1, %v1500_v20 }
 0x65a   :  { %v594_v58 = vpack.c.bf16 %v592_v53, %v592_v53 }
 0x65b   :  { %1376 = vmatpush3.bf16.xpose.msra.mxu0 %v699_v56 }
 0x65c   :  { %1372 = vmatmul.mubr.msk.bf16.vlgmr.msra.gmra.mrb[16].mxu1 %vm204_vm6, %v594_v58  ;;  %1387 = vmatprep.subr.bf16.mxu0 %v1500_v20 }
 0x65d   :  { %1382 = vmatpush3.bf16.xpose.msra.mxu1 %v749_v59  ;;  %1383 = vmatprep.mubr.msk.bf16.mxu1 %vm1501_vm1, %v1500_v20 }
 0x65e   :  { %1393 = vmatprep.subr.bf16.mxu1 %v1500_v20 }
 0x662   :  { %1378 = vmatmul.mubr.msk.bf16.vlgmr.msra.gmra.mrb[20].mxu0 %vm204_vm6, %v692_v60 }
 0x663   :  { %1389 = vmatprep.mubr.msk.bf16.mxu0 %vm1501_vm1, %v1500_v20 }
 0x664   :  { %1384 = vmatmul.mubr.msk.bf16.vlgmr.msra.gmra.mrb[20].mxu1 %vm204_vm6, %v742_v61 }
 0x665   :  { %1395 = vmatprep.mubr.msk.bf16.mxu1 %vm1501_vm1, %v1500_v20 }
 0x72b   :  { %v1721_v63 = vpop.f32.mrb[16].mxu0 }
 0x72c   :  { %v1367_v2 = vpop.f32.mrb[17].mxu0 }
 0x72d   :  { %v640_v4 = vpop.f32.mrb[18].mxu0 }
 0x72e   :  { %v1368_v6 = vpop.f32.mrb[19].mxu0 }
 0x72f   :  { %v1723_v7 = vpop.f32.mrb[16].mxu1 }
 0x730   :  { %v1444_v9 = vpack.i.bf16 %v1723_v7, %v1721_v63  ;;  %v1373_v10 = vpop.f32.mrb[17].mxu1 }
 0x731   :  { %v688_v11 = vpop.f32.mrb[18].mxu1 }
 0x732   :  { %v1374_v12 = vpop.f32.mrb[19].mxu1 }
 0x735   :  { %v735_v13 = vpop.f32.mrb[20].mxu0 }
 0x736   :  { %v791_v14 = vmul.f32 0.35355338, %v735_v13  ;;  %v1379_v15 = vpop.f32.mrb[21].mxu0 }
 0x737   :  { %v738_v17 = vpop.f32.mrb[22].mxu0  ;;  %v785_v18 = vpop.f32.mrb[20].mxu1 }
 0x738   :  { %v793_v19 = vmul.f32 %v791_v14, %v1647_v16  ;;  %v792_v22 = vmul.f32 0.35355338, %v785_v18  ;;  %v1380_v23 = vpop.f32.mrb[23].mxu0  ;;  %v1385_v24 = vpop.f32.mrb[21].mxu1 }
 0x739   :  { %v788_v25 = vpop.f32.mrb[22].mxu1 }
 0x73a   :  { %v794_v26 = vmul.f32 %v792_v22, %v1649_v21  ;;  %v1386_v27 = vpop.f32.mrb[23].mxu1  ;;  %vm795_vm12 = vcmp.eq.f32.partialorder %v793_v19, 0.0 }
 0x73b   :  { %v797_v28 = vsel %vm795_vm12, -inf, %v793_v19 }
 0x73c   :  { %v799_v29 = vsel %vm204_vm6, %v797_v28, -inf  ;;  %vm796_vm13 = vcmp.eq.f32.partialorder %v794_v26, 0.0 }
 0x73d   :  { %800 = vmax.xlane.f32.xlu0 %v799_v29  ;;  %v798_v30 = vsel %vm796_vm13, -inf, %v794_v26 }
 0x73e   :  { %v802_v31 = vsel %vm204_vm6, %v798_v30, -inf }
 0x73f   :  { %803 = vmax.xlane.f32.xlu1 %v802_v31 }
 0x750   :  { %871 = vrot.lane.b32.xlu1 %v1624_v57, %s1506_s25 }
 0x754   :  { %921 = vrot.lane.b32.xlu1 %v1622_v54, %s1507_s26 }
 0x758   :  { %971 = vrot.lane.b32.xlu1 %v1624_v57, %s1507_s26 }
 0x75c   :  { %969 = vrot.lane.b32.xlu1 %v1634_v3, %s1507_s26 }
 0x7ca   :  { %v801_v32 = vpop.xlane.xlu0 %800 }
 0x7cb   :  { %v805_v33 = vsub.f32 %v797_v28, %v801_v32 }
 0x7cc   :  { %v804_v34 = vpop.xlane.xlu1 %803 }
 0x7cd   :  { %v807_v35 = vmul.f32 1.442695, %v805_v33  ;;  %v806_v36 = vsub.f32 %v798_v30, %v804_v34 }
 0x7cf   :  { %1483 = vpow2.f32 %v807_v35  ;;  %v809_v37 = vmul.f32 1.442695, %v806_v36 }
 0x7d0   :  { %v872_v38 = vpop.permute.xlu1 %871 }
 0x7d1   :  { %1485 = vpow2.f32 %v809_v37  ;;  %v877_v39 = vsel %vm368_vm9, %v872_v38, 0 }
 0x7d2   :  { %1394 = vmatpush3.bf16.msra.mxu1 %v877_v39 }
 0x7d3   :  { %1405 = vmatprep.subr.bf16.mxu1 %v1500_v20 }
 0x7d4   :  { %v922_v48 = vpop.permute.xlu1 %921 }
 0x7d8   :  { %v972_v53 = vpop.permute.xlu1 %971 }
 0x7d9   :  { %v1484_v40 = vpop.eup %1483  ;;  %v977_v56 = vsel %vm204_vm6, %v972_v53, 0 }
 0x7da   :  { %v811_v41 = vsel %vm204_vm6, %v1484_v40, 0.0 }
 0x7db   :  { %v1486_v42 = vpop.eup %1485  ;;  %812 = vadd.xlane.f32.xlu0 %v811_v41 }
 0x7dc   :  { %v814_v3 = vsel %vm204_vm6, %v1486_v42, 0.0  ;;  %v970_v59 = vpop.permute.xlu1 %969 }
 0x7df   :  { %815 = vadd.xlane.f32.xlu0 %v814_v3 }
 0x7f5   :  { %823 = vrot.lane.b32.xlu0 %v1622_v54, %s1506_s25 }
 0x7f9   :  { %919 = vrot.lane.b32.xlu0 %v1632_v62, %s1507_s26  ;;  %v927_v62 = vsel %vm204_vm6, %v922_v48, 0  ;;  %v1180_v48 = vld [vmem:[%s1814_s6 + $0x8] sm:$0xff] }
 0x868   :  { %v813_v43 = vpop.xlane.xlu0 %812 }
 0x869   :  { %1487 = vrcp.f32 %v813_v43 }
 0x86c   :  { %v816_v44 = vpop.xlane.xlu0 %815 }
 0x86d   :  { %1489 = vrcp.f32 %v816_v44 }
 0x870   :  { %v824_v45 = vpop.permute.xlu0 %823 }
 0x871   :  { %v829_v46 = vsel %vm368_vm9, %v824_v45, 0 }
 0x872   :  { %1388 = vmatpush3.bf16.msra.mxu0 %v829_v46 }
 0x873   :  { %v1488_v47 = vpop.eup %1487  ;;  %1399 = vmatprep.subr.bf16.mxu0 %v1500_v20 }
 0x874   :  { %v819_v49 = vmul.f32 %v1488_v47, %v1484_v40  ;;  %v920_v58 = vpop.permute.xlu0 %919  ;;  %v1179_v47 = vld [vmem:[%s1814_s6] sm:$0xff] }
 0x876   :  { %v821_v50 = vpack.c.bf16 %v819_v49, %v819_v49  ;;  %v1184_v49 = vpack.c.bf16 %v1180_v48, %v1179_v47 }
 0x877   :  { %v1490_v51 = vpop.eup %1489 }
 0x878   :  { %v820_v52 = vmul.f32 %v1490_v51, %v1486_v42  ;;  %1390 = vmatmul.mubr.msk.bf16.vlgmr.msra.gmra.mrb[24].mxu0 %vm204_vm6, %v821_v50  ;;  %v1181_v50 = vld [vmem:[%s1814_s6 + $0x10] sm:$0xff]  ;;  %v1182_v51 = vld [vmem:[%s1814_s6 + $0x18] sm:$0xff] }
 0x879   :  { %1401 = vmatprep.mubr.msk.bf16.mxu0 %vm1501_vm1, %v1500_v20 }
 0x87a   :  { %v822_v55 = vpack.c.bf16 %v820_v52, %v820_v52  ;;  %v1185_v52 = vpack.c.bf16 %v1182_v51, %v1181_v50 }
 0x87b   :  { %1400 = vmatpush3.bf16.xpose.msra.mxu0 %v927_v62 }
 0x87c   :  { %1396 = vmatmul.mubr.msk.bf16.vlgmr.msra.gmra.mrb[24].mxu1 %vm204_vm6, %v822_v55  ;;  %1411 = vmatprep.subr.bf16.mxu0 %v1500_v20 }
 0x87d   :  { %1406 = vmatpush3.bf16.xpose.msra.mxu1 %v977_v56  ;;  %1407 = vmatprep.mubr.msk.bf16.mxu1 %vm1501_vm1, %v1500_v20 }
 0x87e   :  { %1417 = vmatprep.subr.bf16.mxu1 %v1500_v20 }
 0x882   :  { %1402 = vmatmul.mubr.msk.bf16.vlgmr.msra.gmra.mrb[28].mxu0 %vm204_vm6, %v920_v58 }
 0x883   :  { %1413 = vmatprep.mubr.msk.bf16.mxu0 %vm1501_vm1, %v1500_v20 }
 0x884   :  { %1408 = vmatmul.mubr.msk.bf16.vlgmr.msra.gmra.mrb[28].mxu1 %vm204_vm6, %v970_v59 }
 0x885   :  { %1419 = vmatprep.mubr.msk.bf16.mxu1 %vm1501_vm1, %v1500_v20 }
 0x94b   :  { %v865_v60 = vpop.f32.mrb[24].mxu0 }
 0x94c   :  { %v1391_v61 = vpop.f32.mrb[25].mxu0 }
 0x94d   :  { %v868_v2 = vpop.f32.mrb[26].mxu0 }
 0x94e   :  { %v1392_v4 = vpop.f32.mrb[27].mxu0 }
 0x94f   :  { %v913_v6 = vpop.f32.mrb[24].mxu1 }
 0x950   :  { %v1449_v10 = vpack.i.bf16 %v913_v6, %v865_v60  ;;  %v1397_v11 = vpop.f32.mrb[25].mxu1 }
 0x951   :  { %v916_v12 = vpop.f32.mrb[26].mxu1 }
 0x952   :  { %v1398_v13 = vpop.f32.mrb[27].mxu1 }
 0x955   :  { %v963_v14 = vpop.f32.mrb[28].mxu0 }
 0x956   :  { %v1019_v15 = vmul.f32 0.35355338, %v963_v14  ;;  %v1403_v17 = vpop.f32.mrb[29].mxu0 }
 0x957   :  { %v966_v18 = vpop.f32.mrb[30].mxu0  ;;  %v1013_v19 = vpop.f32.mrb[28].mxu1 }
 0x958   :  { %v1021_v22 = vmul.f32 %v1019_v15, %v1647_v16  ;;  %v1020_v23 = vmul.f32 0.35355338, %v1013_v19  ;;  %v1404_v24 = vpop.f32.mrb[31].mxu0  ;;  %v1409_v25 = vpop.f32.mrb[29].mxu1 }
 0x959   :  { %v1016_v26 = vpop.f32.mrb[30].mxu1 }
 0x95a   :  { %v1022_v27 = vmul.f32 %v1020_v23, %v1649_v21  ;;  %v1410_v28 = vpop.f32.mrb[31].mxu1  ;;  %vm1023_vm14 = vcmp.eq.f32.partialorder %v1021_v22, 0.0 }
 0x95b   :  { %v1025_v29 = vsel %vm1023_vm14, -inf, %v1021_v22 }
 0x95c   :  { %v1027_v30 = vsel %vm204_vm6, %v1025_v29, -inf  ;;  %vm1024_vm15 = vcmp.eq.f32.partialorder %v1022_v27, 0.0 }
 0x95d   :  { %1028 = vmax.xlane.f32.xlu0 %v1027_v30  ;;  %v1026_v31 = vsel %vm1024_vm15, -inf, %v1022_v27  ;;  %v1269_v27 = vld [vmem:[%s1815_s7] ss:$0 sm:$0xff] }
 0x95e   :  { %v1030_v32 = vsel %vm204_vm6, %v1026_v31, -inf }
 0x95f   :  { %1031 = vmax.xlane.f32.xlu1 %v1030_v32 }
 0x970   :  { %1099 = vrot.lane.b32.xlu1 %v1624_v57, %s1508_s27 }
 0x974   :  { %1445 = vrot.lane.b32.xlu1 %v1444_v9, %s1509_s28 }
 0x978   :  { %1450 = vrot.lane.b32.xlu1 %v1449_v10, %s1510_s29 }
 0x9ea   :  { %v1029_v16 = vpop.xlane.xlu0 %1028 }
 0x9eb   :  { %v1033_v21 = vsub.f32 %v1025_v29, %v1029_v16 }
 0x9ec   :  { %v1032_v33 = vpop.xlane.xlu1 %1031 }
 0x9ed   :  { %v1035_v34 = vmul.f32 1.442695, %v1033_v21  ;;  %v1034_v35 = vsub.f32 %v1026_v31, %v1032_v33 }
 0x9ef   :  { %1491 = vpow2.f32 %v1035_v34  ;;  %v1037_v36 = vmul.f32 1.442695, %v1034_v35 }
 0x9f0   :  { %v1100_v37 = vpop.permute.xlu1 %1099 }
 0x9f1   :  { %1493 = vpow2.f32 %v1037_v36  ;;  %v1105_v38 = vsel %vm368_vm9, %v1100_v37, 0 }
 0x9f2   :  { %1418 = vmatpush3.bf16.msra.mxu1 %v1105_v38 }
 0x9f4   :  { %v1446_v2 = vpop.permute.xlu1 %1445 }
 0x9f5   :  { %v1448_v6 = vunpack.i.h.bf16 %v1446_v2  ;;  %v1447_v10 = vunpack.i.l.bf16 %v1446_v2 }
 0x9f7   :  { %v1172_v14 = vsel %vm204_vm6, %v1687_v8, %v1448_v6  ;;  %v1171_v15 = vsel %vm204_vm6, %v1685_v5, %v1447_v10 }
 0x9f8   :  { %v1451_v4 = vpop.permute.xlu1 %1450 }
 0x9f9   :  { %v1492_v57 = vpop.eup %1491  ;;  %v1453_v11 = vunpack.i.h.bf16 %v1451_v4  ;;  %v1452_v12 = vunpack.i.l.bf16 %v1451_v4 }
 0x9fa   :  { %v1039_v39 = vsel %vm204_vm6, %v1492_v57, 0.0 }
 0x9fb   :  { %v1494_v40 = vpop.eup %1493  ;;  %1040 = vadd.xlane.f32.xlu0 %v1039_v39 }
 0x9fc   :  { %v1042_v63 = vsel %vm204_vm6, %v1494_v40, 0.0 }
 0x9ff   :  { %1043 = vadd.xlane.f32.xlu0 %v1042_v63 }
 0xa15   :  { %1051 = vrot.lane.b32.xlu0 %v1622_v54, %s1508_s27 }
 0xa88   :  { %v1041_v7 = vpop.xlane.xlu0 %1040 }
 0xa89   :  { %1495 = vrcp.f32 %v1041_v7 }
 0xa8c   :  { %v1044_v9 = vpop.xlane.xlu0 %1043 }
 0xa8d   :  { %1497 = vrcp.f32 %v1044_v9 }
 0xa90   :  { %v1052_v41 = vpop.permute.xlu0 %1051 }
 0xa91   :  { %v1057_v42 = vsel %vm368_vm9, %v1052_v41, 0 }
 0xa92   :  { %1412 = vmatpush3.bf16.msra.mxu0 %v1057_v42 }
 0xa93   :  { %v1496_v3 = vpop.eup %1495  ;;  %1423 = vmatprep.subr.bf16.mxu0 %v1500_v20 }
 0xa94   :  { %v1047_v43 = vmul.f32 %v1496_v3, %v1492_v57 }
 0xa96   :  { %v1049_v44 = vpack.c.bf16 %v1047_v43, %v1047_v43 }
 0xa97   :  { %v1498_v45 = vpop.eup %1497 }
 0xa98   :  { %v1048_v46 = vmul.f32 %v1498_v45, %v1494_v40  ;;  %1414 = vmatmul.mubr.msk.bf16.vlgmr.msra.gmra.mrb[32].mxu0 %vm204_vm6, %v1049_v44 }
 0xa99   :  { %1427 = vmatprep.mubr.msk.bf16.mxu0 %vm1501_vm1, %v1500_v20  ;;  %1424 = vmatpush3.bf16.msra.mxu0 %v1184_v49  ;;  %vm1173_vm1 = vcmask 130048  }
 0xa9a   :  { %v1050_v54 = vpack.c.bf16 %v1048_v46, %v1048_v46  ;;  %1425 = vmatprep.subr.bf16.mxu0 %v1500_v20  ;;  %v1174_v19 = vsel %vm1173_vm1, %v1171_v15, %v1452_v12  ;;  %v1175_v22 = vsel %vm1173_vm1, %v1172_v14, %v1453_v11 }
 0xa9c   :  { %1420 = vmatmul.mubr.msk.bf16.vlgmr.msra.gmra.mrb[32].mxu1 %vm204_vm6, %v1050_v54 }
 0xa9d   :  { %1426 = vmatpush3.bf16.msra.mxu0 %v1185_v52 }
 0xb6b   :  { %v1093_v53 = vpop.f32.mrb[32].mxu0 }
 0xb6c   :  { %v1415_v62 = vpop.f32.mrb[33].mxu0 }
 0xb6d   :  { %v1096_v55 = vpop.f32.mrb[34].mxu0 }
 0xb6e   :  { %v1416_v56 = vpop.f32.mrb[35].mxu0 }
 0xb6f   :  { %v1141_v58 = vpop.f32.mrb[32].mxu1 }
 0xb70   :  { %v1454_v59 = vpack.i.bf16 %v1141_v58, %v1093_v53  ;;  %v1421_v60 = vpop.f32.mrb[33].mxu1 }
 0xb71   :  { %v1144_v61 = vpop.f32.mrb[34].mxu1 }
 0xb72   :  { %1455 = vrot.lane.b32.xlu0 %v1454_v59, %s1511_s15  ;;  %v1422_v20 = vpop.f32.mrb[35].mxu1 }
 0xbe4   :  { %v1456_v13 = vpop.permute.xlu0 %1455 }
 0xbe5   :  { %v1458_v17 = vunpack.i.h.bf16 %v1456_v13  ;;  %v1457_v18 = vunpack.i.l.bf16 %v1456_v13 }
 0xbe7   :  { %v1178_v23 = vsel %vm1176_vm2, %v1175_v22, %v1458_v17  ;;  %v1177_v24 = vsel %vm1176_vm2, %v1174_v19, %v1457_v18 }
 0xbe8   :  { %v1183_v25 = vpack.c.bf16 %v1178_v23, %v1177_v24 }
 0xbea   :  { %1428 = vmatmul.mubr.msk.bf16.vlgmr.msra.gmra.mrb[36].mxu0 %vm34_vm0, %v1183_v25 }
 0xcbd   :  { %v1223_v26 = vpop.f32.mrb[36].mxu0 }
 0xcbe   :  { %v1230_v28 = vadd.f32 %v1223_v26, %v1560_v0  ;;  %v1429_v8 = vpop.f32.mrb[37].mxu0 }
 0xcbf   :  { %v1226_v29 = vpop.f32.mrb[38].mxu0 }
 0xcc0   :  { %v1239_v30 = vadd.f32 %v1269_v27, %v1230_v28  ;;  %v1231_v5 = vadd.f32 %v1226_v29, %v1565_v1  ;;  %v1430_v31 = vpop.f32.mrb[39].mxu0 }
 0xcc2   :  { %1241 = vst.msk [vmem:[%s1816_s8] sm:$0xff] %vm34_vm0, %v1239_v30  ;;  %v1240_v32 = vadd.f32 %v1269_v27, %v1231_v5 }
 0xcc4   :  { %1242 = vst.msk [vmem:[%s1816_s8 + $0x8] sm:$0xff] %vm34_vm0, %v1240_v32 }

</bundles_post_ra>
